<compile_context>
chip_gen: v6e
topology: v6e:2x2x1
jax: 0.10.0
libtpu: 0.0.40
codegen_flags: <defaults>
</compile_context>

<pallas_src>
import functools

import jax
import jax.numpy as jnp
import numpy as np
from jax.experimental import pallas as pl
from jax.experimental.pallas import tpu as pltpu

EPSILON = 1e-3  # RENRG.epsilon


# ---------------------------------------------------------------------------
# Parameter construction (glue, plain JAX) -- mirrors RENRG.__init__/
# set_model_param and ThreeRENL2.set_model_param (inverses, Cayley transform).
# ---------------------------------------------------------------------------
def renrg_init(key, n, m, n_xi, l):
    s = max(n, m)
    ks = jax.random.split(key, 8)
    f32 = jnp.float32
    return dict(
        X=jax.random.normal(ks[0], (2 * n_xi + l, 2 * n_xi + l), f32),
        Y=jax.random.normal(ks[1], (n_xi, n_xi), f32),
        B2=jax.random.normal(ks[2], (n_xi, n), f32),
        C2=jax.random.normal(ks[3], (m, n_xi), f32),
        D21=jax.random.normal(ks[4], (m, l), f32),
        X3=jax.random.normal(ks[5], (s, s), f32),
        Y3=jax.random.normal(ks[6], (s, s), f32),
        D12=jax.random.normal(ks[7], (l, n), f32),
    )


def renrg_set_model_param(raw, gamma, n, m, n_xi, l):
    s = max(n, m)
    X, Y, B2, C2, D21, X3, Y3, D12 = (
        raw[k] for k in ("X", "Y", "B2", "C2", "D21", "X3", "Y3", "D12"))
    I_m, I_s = jnp.eye(m), jnp.eye(s)
    I_n = jnp.eye(n)
    R = gamma * I_n
    Q = (-1.0 / gamma) * I_m
    Mmat = X3 @ X3.T + Y3 - Y3.T + EPSILON * I_s                # F.linear(X3, X3) + ...
    M_tilde = (I_s - Mmat) @ jnp.linalg.inv(I_s + Mmat)         # F.linear(I-M, inv(I+M).T)
    Zeta = M_tilde[:m, :n]
    D22 = gamma * Zeta
    R_cap = R - (1.0 / gamma) * (D22.T @ D22)
    C2_cap = D22.T @ Q @ C2
    D21_cap = D22.T @ Q @ D21 - D12.T
    vec_R = jnp.concatenate([C2_cap.T, D21_cap.T, B2], axis=0)
    vec_Q = jnp.concatenate([C2.T, D21.T, jnp.zeros((n_xi, m), jnp.float32)], axis=0)
    H = (X.T @ X + EPSILON * jnp.eye(2 * n_xi + l)
         + vec_R @ jnp.linalg.inv(R_cap) @ vec_R.T
         - vec_Q @ Q @ vec_Q.T)
    H11 = H[:n_xi, :n_xi]
    H21 = H[n_xi:n_xi + l, :n_xi]
    H22 = H[n_xi:n_xi + l, n_xi:n_xi + l]
    H31 = H[n_xi + l:, :n_xi]
    H32 = H[n_xi + l:, n_xi:n_xi + l]
    H33 = H[n_xi + l:, n_xi + l:]
    E = 0.5 * (H11 + H33 + Y - Y.T)
    return dict(
        F=H31, B1=H32, B2=B2, Einv=jnp.linalg.inv(E),
        Lambda=jnp.diag(H22), D11=-jnp.tril(H22, k=-1), C1=-H21,
        C2=C2, D21=D21, D22=D22, D12=D12,
    )


def three_ren_build_params(key, N, n, p, n_xi, l):
    keys = jax.random.split(key, N + 3)
    raws = [renrg_init(keys[j], n, p, n_xi, l) for j in range(N)]
    pr = jax.random.normal(keys[N], (N,), jnp.float32)
    yp = jax.random.normal(keys[N + 1], (N,), jnp.float32)
    Mtop = jax.random.normal(keys[N + 2], (N, N), jnp.float32)
    # ThreeRENL2.set_model_param: gamma for each REN
    PR = jnp.diag(jnp.exp(pr))
    A = Mtop.T @ PR @ Mtop
    pv = jnp.trace(A) + jnp.exp(yp)
    Rg = jnp.linalg.inv(jnp.diag(pv)) @ PR
    gamma = jnp.sqrt(jnp.diag(Rg))
    per_ren = [renrg_set_model_param(raws[j], gamma[j], n, p, n_xi, l)
               for j in range(N)]
    return per_ren


# ---------------------------------------------------------------------------
# Host-side packing.
#
# VMEM slab: (N, 4*WL+2, WL) with WL = round_up(max(n_xi, l+1), 8):
#   rows [0*WL, 0*WL+l)     C1          (l, n_xi)
#   rows [1*WL, 1*WL+n_xi)  F           (n_xi, n_xi)
#   rows [2*WL, 2*WL+n_xi)  [B1 | B2]   (n_xi, l+1)       (col l = B2[:,0])
#   rows [3*WL, 3*WL+n_xi)  Einv        (n_xi, n_xi)
#   row   4*WL              C2          (1, n_xi)
#   row   4*WL+1            [D21 | D22] (1, l+1)          (col l = D22[0,0])
# SMEM: d11 (N, l*l) row-major, d12 (N, l), ilam (N, l) = 1/Lambda.
# Zero padding is load-bearing: padded rows/cols keep lanes >= n_xi / >= l+1
# out of every contraction.
# ---------------------------------------------------------------------------
def pack_three_ren_params(per_ren, n_xi, l):
    N = len(per_ren)
    WL = ((max(n_xi, l + 1) + 7) // 8) * 8
    R = 4 * WL + 2
    OFF_C1, OFF_F, OFF_G, OFF_EI, OFF_C2, OFF_DU = 0, WL, 2 * WL, 3 * WL, 4 * WL, 4 * WL + 1
    P = np.zeros((N, R, WL), np.float32)
    d11 = np.zeros((N, l * l), np.float32)
    d12 = np.zeros((N, l), np.float32)
    ilam = np.zeros((N, l), np.float32)
    for j, q in enumerate(per_ren):
        C1 = np.asarray(q["C1"], np.float32)
        D11 = np.asarray(q["D11"], np.float32)
        Fm = np.asarray(q["F"], np.float32)
        B1 = np.asarray(q["B1"], np.float32)
        B2 = np.asarray(q["B2"], np.float32)
        Einv = np.asarray(q["Einv"], np.float32)
        D12 = np.asarray(q["D12"], np.float32)
        Lam = np.asarray(q["Lambda"], np.float32)
        C2 = np.asarray(q["C2"], np.float32)
        D21 = np.asarray(q["D21"], np.float32)
        D22 = np.asarray(q["D22"], np.float32)
        assert np.all(Lam > 0.0), "Lambda (diag of H22) must be positive"
        P[j, OFF_C1:OFF_C1 + l, :n_xi] = C1
        P[j, OFF_F:OFF_F + n_xi, :n_xi] = Fm
        P[j, OFF_G:OFF_G + n_xi, :l] = B1
        P[j, OFF_G:OFF_G + n_xi, l] = B2[:, 0]
        P[j, OFF_EI:OFF_EI + n_xi, :n_xi] = Einv
        P[j, OFF_C2, :n_xi] = C2[0, :]
        P[j, OFF_DU, :l] = D21[0, :]
        P[j, OFF_DU, l] = D22[0, 0]
        d11[j] = D11.reshape(-1)
        d12[j] = D12[:, 0]
        ilam[j] = 1.0 / Lam
    return jnp.asarray(P), jnp.asarray(d11), jnp.asarray(d12), jnp.asarray(ilam)


# ---------------------------------------------------------------------------
# Pallas kernel: the whole N-REN chain, lane-batched over BB evaluations.
# ---------------------------------------------------------------------------
def _make_kernel(N, n_xi, l, WL, BB):
    OFF_C1, OFF_F, OFF_G, OFF_EI, OFF_C2, OFF_DU = 0, WL, 2 * WL, 3 * WL, 4 * WL, 4 * WL + 1
    HI = jax.lax.Precision.HIGHEST

    def kernel(d11_ref, d12_ref, ilam_ref, p_ref, ymv_ref, xim_ref, y_ref, xi_ref):
        f32 = jnp.float32
        # REN 0 consumes w = -ym + v, lane-batched (1, BB).
        w = ymv_ref[1:2, :] - ymv_ref[0:1, :]

        # xi-only matvecs for ALL RENs, hoisted off the serial w-chain.
        # (MXU matmuls, f32 operands, precision=HIGHEST; overlap the recurrences.)
        cxi, fxi, c2xi = [], [], []
        for j in range(N):
            xim_j = xim_ref[j]                                              # (WL, BB)
            cxi.append(jnp.dot(p_ref[j, OFF_C1:OFF_C1 + l, :], xim_j,
                               precision=HI, preferred_element_type=f32))   # (l, BB)
            fxi.append(jnp.dot(p_ref[j, OFF_F:OFF_F + WL, :], xim_j,
                               precision=HI, preferred_element_type=f32))   # (WL, BB)
            c2xi.append(jnp.dot(p_ref[j, OFF_C2:OFF_C2 + 1, :], xim_j,
                                precision=HI, preferred_element_type=f32))  # (1, BB)

        y_rows = []
        for j in range(N):                                  # unrolled REN chain
            # Rows of C1@xi, extracted once (off the serial chain).
            c_rows = [cxi[j][i:i + 1, :] for i in range(l)]

            # eps recurrence on (1,BB) lane rows.  D11/D12/1-over-Lambda come
            # from SMEM as scalars, so each serial step is pure VPU (scalar*vec
            # FMA + relu) with no cross-lane / XLU work on the chain.
            e_rows = []
            for i in range(l):
                acc = c_rows[i] + d12_ref[j, i] * w
                for k in range(i):                          # D11 strictly lower tri
                    acc = acc + d11_ref[j, i * l + k] * e_rows[k]
                e_rows.append(jnp.maximum(acc * ilam_ref[j, i], 0.0))

            # z = [eps; w; 0-pad]  (WL, BB) feeds [B1|B2] and [D21|D22] matmuls.
            pads = [jnp.zeros((WL - l - 1, BB), f32)] if WL > l + 1 else []
            z = jnp.concatenate(e_rows + [w] + pads, axis=0)

            gz = jnp.dot(p_ref[j, OFF_G:OFF_G + WL, :], z,
                         precision=HI, preferred_element_type=f32)          # (WL, BB)
            e_xi = fxi[j] + gz
            xi_new = jnp.dot(p_ref[j, OFF_EI:OFF_EI + n_xi, :], e_xi,
                             precision=HI, preferred_element_type=f32)      # (n_xi, BB)
            u = c2xi[j] + jnp.dot(p_ref[j, OFF_DU:OFF_DU + 1, :], z,
                                  precision=HI, preferred_element_type=f32) # (1, BB)

            xi_ref[j] = xi_new                              # dense (n_xi, BB) store
            y_rows.append(u)
            w = u                                           # feed next REN (register carry)

        y_ref[...] = jnp.concatenate(y_rows, axis=0)        # single lane-dense store

    return kernel


def three_ren_forward(packed, d11, d12, ilam, t, ym, v, xim, *, n_xi, l, block_b=128):
    """Batched forward: ym, v are (B,), xim is (B, N, n_xi).  Each batch column
    reproduces one ThreeRENL2.forward(t, ym, v, xim) evaluation."""
    del t  # unused, as in the PyTorch forward
    packed = jnp.asarray(packed, jnp.float32)
    N, R, WL = packed.shape
    ym = jnp.asarray(ym, jnp.float32).reshape(-1)
    v = jnp.asarray(v, jnp.float32).reshape(-1)
    xim = jnp.asarray(xim, jnp.float32)
    B = ym.shape[0]
    nb = (B + block_b - 1) // block_b
    Bp = nb * block_b

    ymv = jnp.zeros((2, Bp), jnp.float32)
    ymv = ymv.at[0, :B].set(ym).at[1, :B].set(v)
    xim_t = jnp.zeros((N, WL, Bp), jnp.float32)
    xim_t = xim_t.at[:, :n_xi, :B].set(jnp.transpose(xim, (1, 2, 0)))

    smem = pl.BlockSpec(memory_space=pltpu.MemorySpace.SMEM)
    in_specs = [
        smem,                                                       # d11  (N, l*l)
        smem,                                                       # d12  (N, l)
        smem,                                                       # ilam (N, l)
        pl.BlockSpec((N, R, WL), lambda b: (0, 0, 0)),              # param slab
        pl.BlockSpec((2, block_b), lambda b: (0, b)),               # [ym; v]
        pl.BlockSpec((N, WL, block_b), lambda b: (0, 0, b)),        # xim
    ]
    out_specs = (
        pl.BlockSpec((N, block_b), lambda b: (0, b)),               # y
        pl.BlockSpec((N, n_xi, block_b), lambda b: (0, 0, b)),      # xi
    )

    y, xi = pl.pallas_call(
        _make_kernel(N, n_xi, l, WL, block_b),
        grid=(nb,),
        in_specs=in_specs,
        out_specs=out_specs,
        out_shape=(jax.ShapeDtypeStruct((N, Bp), jnp.float32),
                   jax.ShapeDtypeStruct((N, n_xi, Bp), jnp.float32)),
        compiler_params=pltpu.CompilerParams(
            dimension_semantics=("parallel",)),   # batch blocks shard across TCs (v7x)
    )(d11, d12, ilam, packed, ymv, xim_t)

    # Back to user layout: y (B, N), xi (B, N, n_xi).
    return jnp.transpose(y, (1, 0))[:B], jnp.transpose(xi, (2, 0, 1))[:B]


# ---------------------------------------------------------------------------
# Pure-JAX reference of the forward chain (for correctness checking only).
# ---------------------------------------------------------------------------
def three_ren_forward_ref(per_ren, t, ym, v, xim):
    del t
    N = len(per_ren)
    w = -ym + v
    ys, xis = [], []
    for j in range(N):
        q = per_ren[j]
        xi = xim[j]
        l = q["Lambda"].shape[0]
        epsv = jnp.zeros((l,), jnp.float32)
        for i in range(l):
            vi = (jnp.sum(q["C1"][i] * xi) + jnp.sum(q["D11"][i] * epsv)
                  + q["D12"][i, 0] * w)
            epsv = epsv.at[i].set(jnp.maximum(vi / q["Lambda"][i], 0.0))
        E_xi = (jnp.sum(q["F"] * xi[None, :], axis=1)
                + jnp.sum(q["B1"] * epsv[None, :], axis=1)
                + q["B2"][:, 0] * w)
        xi_new = jnp.sum(q["Einv"] * E_xi[None, :], axis=1)
        u = (jnp.sum(q["C2"][0] * xi) + jnp.sum(q["D21"][0] * epsv)
             + q["D22"][0, 0] * w)
        ys.append(u)
        xis.append(xi_new)
        w = u
    return jnp.stack(ys), jnp.stack(xis)


if __name__ == "__main__":
    # Shapes implied by the forward: scalar I/O per REN (n = p = 1),
    # N = 3 chained RENs, state n_xi = 8, nonlinearity size l = 8.
    # B independent evaluations are lane-batched inside one kernel call.
    N, n, p, n_xi, l = 3, 1, 1, 8, 8
    B = 5

    key = jax.random.PRNGKey(0)
    kp, kx, ky, kv = jax.random.split(key, 4)
    per_ren = three_ren_build_params(kp, N, n, p, n_xi, l)
    packed, d11, d12, ilam = pack_three_ren_params(per_ren, n_xi, l)

    xim = jax.random.normal(kx, (B, N, n_xi), jnp.float32)   # initial states xi_m[j]
    ym = jax.random.normal(ky, (B,), jnp.float32)
    v = jax.random.normal(kv, (B,), jnp.float32)
    t = 0.0                                                  # unused by the forward

    fwd = jax.jit(functools.partial(three_ren_forward, n_xi=n_xi, l=l))
    y, xi = fwd(packed, d11, d12, ilam, t, ym, v, xim)
    jax.block_until_ready((y, xi))

    ref = jax.jit(jax.vmap(
        lambda ym_b, v_b, xim_b: three_ren_forward_ref(per_ren, 0.0, ym_b, v_b, xim_b)))
    y_ref, xi_ref = ref(ym, v, xim)
    np.testing.assert_allclose(np.asarray(y), np.asarray(y_ref), rtol=2e-3, atol=1e-3)
    np.testing.assert_allclose(np.asarray(xi), np.asarray(xi_ref), rtol=2e-3, atol=1e-3)
    print("KERNEL_OK")
</pallas_src>

<mosaic_0001>
module attributes {stable_mosaic.version = 11 : i64} {
  func.func @kernel(%arg0: i32, %arg1: memref<3x64xf32, #tpu.memory_space<smem>>, %arg2: memref<3x8xf32, #tpu.memory_space<smem>>, %arg3: memref<3x8xf32, #tpu.memory_space<smem>>, %arg4: memref<3x66x16xf32, #tpu.memory_space<vmem>>, %arg5: memref<2x128xf32, #tpu.memory_space<vmem>>, %arg6: memref<3x16x128xf32, #tpu.memory_space<vmem>>, %arg7: memref<3x128xf32, #tpu.memory_space<vmem>>, %arg8: memref<3x8x128xf32, #tpu.memory_space<vmem>>) attributes {dimension_semantics = [#tpu.dimension_semantics<parallel>], iteration_bounds = array<i64: 1>, scalar_prefetch = 0 : i64, scratch_operands = 0 : i64, tpu.core_type = #tpu.core_type<tc>, window_params = [{transform_indices = @transform_0, window_bounds = array<i64: 3, 64>}, {transform_indices = @transform_1, window_bounds = array<i64: 3, 8>}, {transform_indices = @transform_2, window_bounds = array<i64: 3, 8>}, {pipeline_mode = #tpu.pipeline_mode<synchronous>, transform_indices = @transform_3, window_bounds = array<i64: 3, 66, 16>}, {transform_indices = @transform_4, window_bounds = array<i64: 2, 128>}, {transform_indices = @transform_5, window_bounds = array<i64: 3, 16, 128>}, {transform_indices = @transform_6, window_bounds = array<i64: 3, 128>}, {transform_indices = @transform_7, window_bounds = array<i64: 3, 8, 128>}]} {
    %c1 = arith.constant 1 : index
    %c0 = arith.constant 0 : index
    %0 = vector.load %arg5[%c1, %c0] : memref<2x128xf32, #tpu.memory_space<vmem>>, vector<1x128xf32>
    %c0_0 = arith.constant 0 : index
    %c0_1 = arith.constant 0 : index
    %1 = vector.load %arg5[%c0_0, %c0_1] : memref<2x128xf32, #tpu.memory_space<vmem>>, vector<1x128xf32>
    %2 = arith.subf %0, %1 : vector<1x128xf32>
    %c0_2 = arith.constant 0 : index
    %c0_3 = arith.constant 0 : index
    %c0_4 = arith.constant 0 : index
    %3 = vector.load %arg6[%c0_2, %c0_3, %c0_4] : memref<3x16x128xf32, #tpu.memory_space<vmem>>, vector<1x16x128xf32>
    %4 = vector.shape_cast %3 : vector<1x16x128xf32> to vector<16x128xf32>
    %c0_5 = arith.constant 0 : index
    %c0_6 = arith.constant 0 : index
    %c0_7 = arith.constant 0 : index
    %5 = vector.load %arg4[%c0_5, %c0_6, %c0_7] : memref<3x66x16xf32, #tpu.memory_space<vmem>>, vector<1x8x16xf32>
    %6 = vector.shape_cast %5 : vector<1x8x16xf32> to vector<8x16xf32>
    %cst = arith.constant dense<0.000000e+00> : vector<8x128xf32>
    %7 = tpu.matmul %6, %4, %cst {dimension_numbers = #tpu.dot_dimension_numbers<[1], [0], [0], [1], [0, 0, 1, 1], [], []>, precision = #tpu.contract_precision<fp32>} : vector<8x16xf32>, vector<16x128xf32>, vector<8x128xf32> -> vector<8x128xf32>
    %c0_8 = arith.constant 0 : index
    %c16 = arith.constant 16 : index
    %c0_9 = arith.constant 0 : index
    %8 = vector.load %arg4[%c0_8, %c16, %c0_9] : memref<3x66x16xf32, #tpu.memory_space<vmem>>, vector<1x16x16xf32>
    %9 = vector.shape_cast %8 : vector<1x16x16xf32> to vector<16x16xf32>
    %cst_10 = arith.constant dense<0.000000e+00> : vector<16x128xf32>
    %10 = tpu.matmul %9, %4, %cst_10 {dimension_numbers = #tpu.dot_dimension_numbers<[1], [0], [0], [1], [0, 0, 1, 1], [], []>, precision = #tpu.contract_precision<fp32>} : vector<16x16xf32>, vector<16x128xf32>, vector<16x128xf32> -> vector<16x128xf32>
    %c0_11 = arith.constant 0 : index
    %c64 = arith.constant 64 : index
    %c0_12 = arith.constant 0 : index
    %11 = vector.load %arg4[%c0_11, %c64, %c0_12] : memref<3x66x16xf32, #tpu.memory_space<vmem>>, vector<1x1x16xf32>
    %12 = vector.shape_cast %11 : vector<1x1x16xf32> to vector<1x16xf32>
    %cst_13 = arith.constant dense<0.000000e+00> : vector<1x128xf32>
    %13 = tpu.matmul %12, %4, %cst_13 {dimension_numbers = #tpu.dot_dimension_numbers<[1], [0], [0], [1], [0, 0, 1, 1], [], []>, precision = #tpu.contract_precision<fp32>} : vector<1x16xf32>, vector<16x128xf32>, vector<1x128xf32> -> vector<1x128xf32>
    %c1_14 = arith.constant 1 : index
    %c0_15 = arith.constant 0 : index
    %c0_16 = arith.constant 0 : index
    %14 = vector.load %arg6[%c1_14, %c0_15, %c0_16] : memref<3x16x128xf32, #tpu.memory_space<vmem>>, vector<1x16x128xf32>
    %15 = vector.shape_cast %14 : vector<1x16x128xf32> to vector<16x128xf32>
    %c1_17 = arith.constant 1 : index
    %c0_18 = arith.constant 0 : index
    %c0_19 = arith.constant 0 : index
    %16 = vector.load %arg4[%c1_17, %c0_18, %c0_19] : memref<3x66x16xf32, #tpu.memory_space<vmem>>, vector<1x8x16xf32>
    %17 = vector.shape_cast %16 : vector<1x8x16xf32> to vector<8x16xf32>
    %cst_20 = arith.constant dense<0.000000e+00> : vector<8x128xf32>
    %18 = tpu.matmul %17, %15, %cst_20 {dimension_numbers = #tpu.dot_dimension_numbers<[1], [0], [0], [1], [0, 0, 1, 1], [], []>, precision = #tpu.contract_precision<fp32>} : vector<8x16xf32>, vector<16x128xf32>, vector<8x128xf32> -> vector<8x128xf32>
    %c1_21 = arith.constant 1 : index
    %c16_22 = arith.constant 16 : index
    %c0_23 = arith.constant 0 : index
    %19 = vector.load %arg4[%c1_21, %c16_22, %c0_23] : memref<3x66x16xf32, #tpu.memory_space<vmem>>, vector<1x16x16xf32>
    %20 = vector.shape_cast %19 : vector<1x16x16xf32> to vector<16x16xf32>
    %cst_24 = arith.constant dense<0.000000e+00> : vector<16x128xf32>
    %21 = tpu.matmul %20, %15, %cst_24 {dimension_numbers = #tpu.dot_dimension_numbers<[1], [0], [0], [1], [0, 0, 1, 1], [], []>, precision = #tpu.contract_precision<fp32>} : vector<16x16xf32>, vector<16x128xf32>, vector<16x128xf32> -> vector<16x128xf32>
    %c1_25 = arith.constant 1 : index
    %c64_26 = arith.constant 64 : index
    %c0_27 = arith.constant 0 : index
    %22 = vector.load %arg4[%c1_25, %c64_26, %c0_27] : memref<3x66x16xf32, #tpu.memory_space<vmem>>, vector<1x1x16xf32>
    %23 = vector.shape_cast %22 : vector<1x1x16xf32> to vector<1x16xf32>
    %cst_28 = arith.constant dense<0.000000e+00> : vector<1x128xf32>
    %24 = tpu.matmul %23, %15, %cst_28 {dimension_numbers = #tpu.dot_dimension_numbers<[1], [0], [0], [1], [0, 0, 1, 1], [], []>, precision = #tpu.contract_precision<fp32>} : vector<1x16xf32>, vector<16x128xf32>, vector<1x128xf32> -> vector<1x128xf32>
    %c2 = arith.constant 2 : index
    %c0_29 = arith.constant 0 : index
    %c0_30 = arith.constant 0 : index
    %25 = vector.load %arg6[%c2, %c0_29, %c0_30] : memref<3x16x128xf32, #tpu.memory_space<vmem>>, vector<1x16x128xf32>
    %26 = vector.shape_cast %25 : vector<1x16x128xf32> to vector<16x128xf32>
    %c2_31 = arith.constant 2 : index
    %c0_32 = arith.constant 0 : index
    %c0_33 = arith.constant 0 : index
    %27 = vector.load %arg4[%c2_31, %c0_32, %c0_33] : memref<3x66x16xf32, #tpu.memory_space<vmem>>, vector<1x8x16xf32>
    %28 = vector.shape_cast %27 : vector<1x8x16xf32> to vector<8x16xf32>
    %cst_34 = arith.constant dense<0.000000e+00> : vector<8x128xf32>
    %29 = tpu.matmul %28, %26, %cst_34 {dimension_numbers = #tpu.dot_dimension_numbers<[1], [0], [0], [1], [0, 0, 1, 1], [], []>, precision = #tpu.contract_precision<fp32>} : vector<8x16xf32>, vector<16x128xf32>, vector<8x128xf32> -> vector<8x128xf32>
    %c2_35 = arith.constant 2 : index
    %c16_36 = arith.constant 16 : index
    %c0_37 = arith.constant 0 : index
    %30 = vector.load %arg4[%c2_35, %c16_36, %c0_37] : memref<3x66x16xf32, #tpu.memory_space<vmem>>, vector<1x16x16xf32>
    %31 = vector.shape_cast %30 : vector<1x16x16xf32> to vector<16x16xf32>
    %cst_38 = arith.constant dense<0.000000e+00> : vector<16x128xf32>
    %32 = tpu.matmul %31, %26, %cst_38 {dimension_numbers = #tpu.dot_dimension_numbers<[1], [0], [0], [1], [0, 0, 1, 1], [], []>, precision = #tpu.contract_precision<fp32>} : vector<16x16xf32>, vector<16x128xf32>, vector<16x128xf32> -> vector<16x128xf32>
    %c2_39 = arith.constant 2 : index
    %c64_40 = arith.constant 64 : index
    %c0_41 = arith.constant 0 : index
    %33 = vector.load %arg4[%c2_39, %c64_40, %c0_41] : memref<3x66x16xf32, #tpu.memory_space<vmem>>, vector<1x1x16xf32>
    %34 = vector.shape_cast %33 : vector<1x1x16xf32> to vector<1x16xf32>
    %cst_42 = arith.constant dense<0.000000e+00> : vector<1x128xf32>
    %35 = tpu.matmul %34, %26, %cst_42 {dimension_numbers = #tpu.dot_dimension_numbers<[1], [0], [0], [1], [0, 0, 1, 1], [], []>, precision = #tpu.contract_precision<fp32>} : vector<1x16xf32>, vector<16x128xf32>, vector<1x128xf32> -> vector<1x128xf32>
    %36 = vector.extract_strided_slice %7 {offsets = [0, 0], sizes = [1, 128], strides = [1, 1]} : vector<8x128xf32> to vector<1x128xf32>
    %37 = vector.extract_strided_slice %7 {offsets = [1, 0], sizes = [1, 128], strides = [1, 1]} : vector<8x128xf32> to vector<1x128xf32>
    %38 = vector.extract_strided_slice %7 {offsets = [2, 0], sizes = [1, 128], strides = [1, 1]} : vector<8x128xf32> to vector<1x128xf32>
    %39 = vector.extract_strided_slice %7 {offsets = [3, 0], sizes = [1, 128], strides = [1, 1]} : vector<8x128xf32> to vector<1x128xf32>
    %40 = vector.extract_strided_slice %7 {offsets = [4, 0], sizes = [1, 128], strides = [1, 1]} : vector<8x128xf32> to vector<1x128xf32>
    %41 = vector.extract_strided_slice %7 {offsets = [5, 0], sizes = [1, 128], strides = [1, 1]} : vector<8x128xf32> to vector<1x128xf32>
    %42 = vector.extract_strided_slice %7 {offsets = [6, 0], sizes = [1, 128], strides = [1, 1]} : vector<8x128xf32> to vector<1x128xf32>
    %43 = vector.extract_strided_slice %7 {offsets = [7, 0], sizes = [1, 128], strides = [1, 1]} : vector<8x128xf32> to vector<1x128xf32>
    %c0_43 = arith.constant 0 : index
    %c0_44 = arith.constant 0 : index
    %44 = memref.load %arg2[%c0_43, %c0_44] : memref<3x8xf32, #tpu.memory_space<smem>>
    %45 = vector.broadcast %44 : f32 to vector<1x128xf32>
    %46 = arith.mulf %45, %2 : vector<1x128xf32>
    %47 = arith.addf %36, %46 : vector<1x128xf32>
    %c0_45 = arith.constant 0 : index
    %c0_46 = arith.constant 0 : index
    %48 = memref.load %arg3[%c0_45, %c0_46] : memref<3x8xf32, #tpu.memory_space<smem>>
    %49 = vector.broadcast %48 : f32 to vector<1x128xf32>
    %50 = arith.mulf %47, %49 : vector<1x128xf32>
    %cst_47 = arith.constant 0.000000e+00 : f32
    %51 = vector.broadcast %cst_47 : f32 to vector<1x128xf32>
    %52 = arith.maximumf %50, %51 : vector<1x128xf32>
    %c0_48 = arith.constant 0 : index
    %c1_49 = arith.constant 1 : index
    %53 = memref.load %arg2[%c0_48, %c1_49] : memref<3x8xf32, #tpu.memory_space<smem>>
    %54 = vector.broadcast %53 : f32 to vector<1x128xf32>
    %55 = arith.mulf %54, %2 : vector<1x128xf32>
    %56 = arith.addf %37, %55 : vector<1x128xf32>
    %c0_50 = arith.constant 0 : index
    %c8 = arith.constant 8 : index
    %57 = memref.load %arg1[%c0_50, %c8] : memref<3x64xf32, #tpu.memory_space<smem>>
    %58 = vector.broadcast %57 : f32 to vector<1x128xf32>
    %59 = arith.mulf %58, %52 : vector<1x128xf32>
    %60 = arith.addf %56, %59 : vector<1x128xf32>
    %c0_51 = arith.constant 0 : index
    %c1_52 = arith.constant 1 : index
    %61 = memref.load %arg3[%c0_51, %c1_52] : memref<3x8xf32, #tpu.memory_space<smem>>
    %62 = vector.broadcast %61 : f32 to vector<1x128xf32>
    %63 = arith.mulf %60, %62 : vector<1x128xf32>
    %cst_53 = arith.constant 0.000000e+00 : f32
    %64 = vector.broadcast %cst_53 : f32 to vector<1x128xf32>
    %65 = arith.maximumf %63, %64 : vector<1x128xf32>
    %c0_54 = arith.constant 0 : index
    %c2_55 = arith.constant 2 : index
    %66 = memref.load %arg2[%c0_54, %c2_55] : memref<3x8xf32, #tpu.memory_space<smem>>
    %67 = vector.broadcast %66 : f32 to vector<1x128xf32>
    %68 = arith.mulf %67, %2 : vector<1x128xf32>
    %69 = arith.addf %38, %68 : vector<1x128xf32>
    %c0_56 = arith.constant 0 : index
    %c16_57 = arith.constant 16 : index
    %70 = memref.load %arg1[%c0_56, %c16_57] : memref<3x64xf32, #tpu.memory_space<smem>>
    %71 = vector.broadcast %70 : f32 to vector<1x128xf32>
    %72 = arith.mulf %71, %52 : vector<1x128xf32>
    %73 = arith.addf %69, %72 : vector<1x128xf32>
    %c0_58 = arith.constant 0 : index
    %c17 = arith.constant 17 : index
    %74 = memref.load %arg1[%c0_58, %c17] : memref<3x64xf32, #tpu.memory_space<smem>>
    %75 = vector.broadcast %74 : f32 to vector<1x128xf32>
    %76 = arith.mulf %75, %65 : vector<1x128xf32>
    %77 = arith.addf %73, %76 : vector<1x128xf32>
    %c0_59 = arith.constant 0 : index
    %c2_60 = arith.constant 2 : index
    %78 = memref.load %arg3[%c0_59, %c2_60] : memref<3x8xf32, #tpu.memory_space<smem>>
    %79 = vector.broadcast %78 : f32 to vector<1x128xf32>
    %80 = arith.mulf %77, %79 : vector<1x128xf32>
    %cst_61 = arith.constant 0.000000e+00 : f32
    %81 = vector.broadcast %cst_61 : f32 to vector<1x128xf32>
    %82 = arith.maximumf %80, %81 : vector<1x128xf32>
    %c0_62 = arith.constant 0 : index
    %c3 = arith.constant 3 : index
    %83 = memref.load %arg2[%c0_62, %c3] : memref<3x8xf32, #tpu.memory_space<smem>>
    %84 = vector.broadcast %83 : f32 to vector<1x128xf32>
    %85 = arith.mulf %84, %2 : vector<1x128xf32>
    %86 = arith.addf %39, %85 : vector<1x128xf32>
    %c0_63 = arith.constant 0 : index
    %c24 = arith.constant 24 : index
    %87 = memref.load %arg1[%c0_63, %c24] : memref<3x64xf32, #tpu.memory_space<smem>>
    %88 = vector.broadcast %87 : f32 to vector<1x128xf32>
    %89 = arith.mulf %88, %52 : vector<1x128xf32>
    %90 = arith.addf %86, %89 : vector<1x128xf32>
    %c0_64 = arith.constant 0 : index
    %c25 = arith.constant 25 : index
    %91 = memref.load %arg1[%c0_64, %c25] : memref<3x64xf32, #tpu.memory_space<smem>>
    %92 = vector.broadcast %91 : f32 to vector<1x128xf32>
    %93 = arith.mulf %92, %65 : vector<1x128xf32>
    %94 = arith.addf %90, %93 : vector<1x128xf32>
    %c0_65 = arith.constant 0 : index
    %c26 = arith.constant 26 : index
    %95 = memref.load %arg1[%c0_65, %c26] : memref<3x64xf32, #tpu.memory_space<smem>>
    %96 = vector.broadcast %95 : f32 to vector<1x128xf32>
    %97 = arith.mulf %96, %82 : vector<1x128xf32>
    %98 = arith.addf %94, %97 : vector<1x128xf32>
    %c0_66 = arith.constant 0 : index
    %c3_67 = arith.constant 3 : index
    %99 = memref.load %arg3[%c0_66, %c3_67] : memref<3x8xf32, #tpu.memory_space<smem>>
    %100 = vector.broadcast %99 : f32 to vector<1x128xf32>
    %101 = arith.mulf %98, %100 : vector<1x128xf32>
    %cst_68 = arith.constant 0.000000e+00 : f32
    %102 = vector.broadcast %cst_68 : f32 to vector<1x128xf32>
    %103 = arith.maximumf %101, %102 : vector<1x128xf32>
    %c0_69 = arith.constant 0 : index
    %c4 = arith.constant 4 : index
    %104 = memref.load %arg2[%c0_69, %c4] : memref<3x8xf32, #tpu.memory_space<smem>>
    %105 = vector.broadcast %104 : f32 to vector<1x128xf32>
    %106 = arith.mulf %105, %2 : vector<1x128xf32>
    %107 = arith.addf %40, %106 : vector<1x128xf32>
    %c0_70 = arith.constant 0 : index
    %c32 = arith.constant 32 : index
    %108 = memref.load %arg1[%c0_70, %c32] : memref<3x64xf32, #tpu.memory_space<smem>>
    %109 = vector.broadcast %108 : f32 to vector<1x128xf32>
    %110 = arith.mulf %109, %52 : vector<1x128xf32>
    %111 = arith.addf %107, %110 : vector<1x128xf32>
    %c0_71 = arith.constant 0 : index
    %c33 = arith.constant 33 : index
    %112 = memref.load %arg1[%c0_71, %c33] : memref<3x64xf32, #tpu.memory_space<smem>>
    %113 = vector.broadcast %112 : f32 to vector<1x128xf32>
    %114 = arith.mulf %113, %65 : vector<1x128xf32>
    %115 = arith.addf %111, %114 : vector<1x128xf32>
    %c0_72 = arith.constant 0 : index
    %c34 = arith.constant 34 : index
    %116 = memref.load %arg1[%c0_72, %c34] : memref<3x64xf32, #tpu.memory_space<smem>>
    %117 = vector.broadcast %116 : f32 to vector<1x128xf32>
    %118 = arith.mulf %117, %82 : vector<1x128xf32>
    %119 = arith.addf %115, %118 : vector<1x128xf32>
    %c0_73 = arith.constant 0 : index
    %c35 = arith.constant 35 : index
    %120 = memref.load %arg1[%c0_73, %c35] : memref<3x64xf32, #tpu.memory_space<smem>>
    %121 = vector.broadcast %120 : f32 to vector<1x128xf32>
    %122 = arith.mulf %121, %103 : vector<1x128xf32>
    %123 = arith.addf %119, %122 : vector<1x128xf32>
    %c0_74 = arith.constant 0 : index
    %c4_75 = arith.constant 4 : index
    %124 = memref.load %arg3[%c0_74, %c4_75] : memref<3x8xf32, #tpu.memory_space<smem>>
    %125 = vector.broadcast %124 : f32 to vector<1x128xf32>
    %126 = arith.mulf %123, %125 : vector<1x128xf32>
    %cst_76 = arith.constant 0.000000e+00 : f32
    %127 = vector.broadcast %cst_76 : f32 to vector<1x128xf32>
    %128 = arith.maximumf %126, %127 : vector<1x128xf32>
    %c0_77 = arith.constant 0 : index
    %c5 = arith.constant 5 : index
    %129 = memref.load %arg2[%c0_77, %c5] : memref<3x8xf32, #tpu.memory_space<smem>>
    %130 = vector.broadcast %129 : f32 to vector<1x128xf32>
    %131 = arith.mulf %130, %2 : vector<1x128xf32>
    %132 = arith.addf %41, %131 : vector<1x128xf32>
    %c0_78 = arith.constant 0 : index
    %c40 = arith.constant 40 : index
    %133 = memref.load %arg1[%c0_78, %c40] : memref<3x64xf32, #tpu.memory_space<smem>>
    %134 = vector.broadcast %133 : f32 to vector<1x128xf32>
    %135 = arith.mulf %134, %52 : vector<1x128xf32>
    %136 = arith.addf %132, %135 : vector<1x128xf32>
    %c0_79 = arith.constant 0 : index
    %c41 = arith.constant 41 : index
    %137 = memref.load %arg1[%c0_79, %c41] : memref<3x64xf32, #tpu.memory_space<smem>>
    %138 = vector.broadcast %137 : f32 to vector<1x128xf32>
    %139 = arith.mulf %138, %65 : vector<1x128xf32>
    %140 = arith.addf %136, %139 : vector<1x128xf32>
    %c0_80 = arith.constant 0 : index
    %c42 = arith.constant 42 : index
    %141 = memref.load %arg1[%c0_80, %c42] : memref<3x64xf32, #tpu.memory_space<smem>>
    %142 = vector.broadcast %141 : f32 to vector<1x128xf32>
    %143 = arith.mulf %142, %82 : vector<1x128xf32>
    %144 = arith.addf %140, %143 : vector<1x128xf32>
    %c0_81 = arith.constant 0 : index
    %c43 = arith.constant 43 : index
    %145 = memref.load %arg1[%c0_81, %c43] : memref<3x64xf32, #tpu.memory_space<smem>>
    %146 = vector.broadcast %145 : f32 to vector<1x128xf32>
    %147 = arith.mulf %146, %103 : vector<1x128xf32>
    %148 = arith.addf %144, %147 : vector<1x128xf32>
    %c0_82 = arith.constant 0 : index
    %c44 = arith.constant 44 : index
    %149 = memref.load %arg1[%c0_82, %c44] : memref<3x64xf32, #tpu.memory_space<smem>>
    %150 = vector.broadcast %149 : f32 to vector<1x128xf32>
    %151 = arith.mulf %150, %128 : vector<1x128xf32>
    %152 = arith.addf %148, %151 : vector<1x128xf32>
    %c0_83 = arith.constant 0 : index
    %c5_84 = arith.constant 5 : index
    %153 = memref.load %arg3[%c0_83, %c5_84] : memref<3x8xf32, #tpu.memory_space<smem>>
    %154 = vector.broadcast %153 : f32 to vector<1x128xf32>
    %155 = arith.mulf %152, %154 : vector<1x128xf32>
    %cst_85 = arith.constant 0.000000e+00 : f32
    %156 = vector.broadcast %cst_85 : f32 to vector<1x128xf32>
    %157 = arith.maximumf %155, %156 : vector<1x128xf32>
    %c0_86 = arith.constant 0 : index
    %c6 = arith.constant 6 : index
    %158 = memref.load %arg2[%c0_86, %c6] : memref<3x8xf32, #tpu.memory_space<smem>>
    %159 = vector.broadcast %158 : f32 to vector<1x128xf32>
    %160 = arith.mulf %159, %2 : vector<1x128xf32>
    %161 = arith.addf %42, %160 : vector<1x128xf32>
    %c0_87 = arith.constant 0 : index
    %c48 = arith.constant 48 : index
    %162 = memref.load %arg1[%c0_87, %c48] : memref<3x64xf32, #tpu.memory_space<smem>>
    %163 = vector.broadcast %162 : f32 to vector<1x128xf32>
    %164 = arith.mulf %163, %52 : vector<1x128xf32>
    %165 = arith.addf %161, %164 : vector<1x128xf32>
    %c0_88 = arith.constant 0 : index
    %c49 = arith.constant 49 : index
    %166 = memref.load %arg1[%c0_88, %c49] : memref<3x64xf32, #tpu.memory_space<smem>>
    %167 = vector.broadcast %166 : f32 to vector<1x128xf32>
    %168 = arith.mulf %167, %65 : vector<1x128xf32>
    %169 = arith.addf %165, %168 : vector<1x128xf32>
    %c0_89 = arith.constant 0 : index
    %c50 = arith.constant 50 : index
    %170 = memref.load %arg1[%c0_89, %c50] : memref<3x64xf32, #tpu.memory_space<smem>>
    %171 = vector.broadcast %170 : f32 to vector<1x128xf32>
    %172 = arith.mulf %171, %82 : vector<1x128xf32>
    %173 = arith.addf %169, %172 : vector<1x128xf32>
    %c0_90 = arith.constant 0 : index
    %c51 = arith.constant 51 : index
    %174 = memref.load %arg1[%c0_90, %c51] : memref<3x64xf32, #tpu.memory_space<smem>>
    %175 = vector.broadcast %174 : f32 to vector<1x128xf32>
    %176 = arith.mulf %175, %103 : vector<1x128xf32>
    %177 = arith.addf %173, %176 : vector<1x128xf32>
    %c0_91 = arith.constant 0 : index
    %c52 = arith.constant 52 : index
    %178 = memref.load %arg1[%c0_91, %c52] : memref<3x64xf32, #tpu.memory_space<smem>>
    %179 = vector.broadcast %178 : f32 to vector<1x128xf32>
    %180 = arith.mulf %179, %128 : vector<1x128xf32>
    %181 = arith.addf %177, %180 : vector<1x128xf32>
    %c0_92 = arith.constant 0 : index
    %c53 = arith.constant 53 : index
    %182 = memref.load %arg1[%c0_92, %c53] : memref<3x64xf32, #tpu.memory_space<smem>>
    %183 = vector.broadcast %182 : f32 to vector<1x128xf32>
    %184 = arith.mulf %183, %157 : vector<1x128xf32>
    %185 = arith.addf %181, %184 : vector<1x128xf32>
    %c0_93 = arith.constant 0 : index
    %c6_94 = arith.constant 6 : index
    %186 = memref.load %arg3[%c0_93, %c6_94] : memref<3x8xf32, #tpu.memory_space<smem>>
    %187 = vector.broadcast %186 : f32 to vector<1x128xf32>
    %188 = arith.mulf %185, %187 : vector<1x128xf32>
    %cst_95 = arith.constant 0.000000e+00 : f32
    %189 = vector.broadcast %cst_95 : f32 to vector<1x128xf32>
    %190 = arith.maximumf %188, %189 : vector<1x128xf32>
    %c0_96 = arith.constant 0 : index
    %c7 = arith.constant 7 : index
    %191 = memref.load %arg2[%c0_96, %c7] : memref<3x8xf32, #tpu.memory_space<smem>>
    %192 = vector.broadcast %191 : f32 to vector<1x128xf32>
    %193 = arith.mulf %192, %2 : vector<1x128xf32>
    %194 = arith.addf %43, %193 : vector<1x128xf32>
    %c0_97 = arith.constant 0 : index
    %c56 = arith.constant 56 : index
    %195 = memref.load %arg1[%c0_97, %c56] : memref<3x64xf32, #tpu.memory_space<smem>>
    %196 = vector.broadcast %195 : f32 to vector<1x128xf32>
    %197 = arith.mulf %196, %52 : vector<1x128xf32>
    %198 = arith.addf %194, %197 : vector<1x128xf32>
    %c0_98 = arith.constant 0 : index
    %c57 = arith.constant 57 : index
    %199 = memref.load %arg1[%c0_98, %c57] : memref<3x64xf32, #tpu.memory_space<smem>>
    %200 = vector.broadcast %199 : f32 to vector<1x128xf32>
    %201 = arith.mulf %200, %65 : vector<1x128xf32>
    %202 = arith.addf %198, %201 : vector<1x128xf32>
    %c0_99 = arith.constant 0 : index
    %c58 = arith.constant 58 : index
    %203 = memref.load %arg1[%c0_99, %c58] : memref<3x64xf32, #tpu.memory_space<smem>>
    %204 = vector.broadcast %203 : f32 to vector<1x128xf32>
    %205 = arith.mulf %204, %82 : vector<1x128xf32>
    %206 = arith.addf %202, %205 : vector<1x128xf32>
    %c0_100 = arith.constant 0 : index
    %c59 = arith.constant 59 : index
    %207 = memref.load %arg1[%c0_100, %c59] : memref<3x64xf32, #tpu.memory_space<smem>>
    %208 = vector.broadcast %207 : f32 to vector<1x128xf32>
    %209 = arith.mulf %208, %103 : vector<1x128xf32>
    %210 = arith.addf %206, %209 : vector<1x128xf32>
    %c0_101 = arith.constant 0 : index
    %c60 = arith.constant 60 : index
    %211 = memref.load %arg1[%c0_101, %c60] : memref<3x64xf32, #tpu.memory_space<smem>>
    %212 = vector.broadcast %211 : f32 to vector<1x128xf32>
    %213 = arith.mulf %212, %128 : vector<1x128xf32>
    %214 = arith.addf %210, %213 : vector<1x128xf32>
    %c0_102 = arith.constant 0 : index
    %c61 = arith.constant 61 : index
    %215 = memref.load %arg1[%c0_102, %c61] : memref<3x64xf32, #tpu.memory_space<smem>>
    %216 = vector.broadcast %215 : f32 to vector<1x128xf32>
    %217 = arith.mulf %216, %157 : vector<1x128xf32>
    %218 = arith.addf %214, %217 : vector<1x128xf32>
    %c0_103 = arith.constant 0 : index
    %c62 = arith.constant 62 : index
    %219 = memref.load %arg1[%c0_103, %c62] : memref<3x64xf32, #tpu.memory_space<smem>>
    %220 = vector.broadcast %219 : f32 to vector<1x128xf32>
    %221 = arith.mulf %220, %190 : vector<1x128xf32>
    %222 = arith.addf %218, %221 : vector<1x128xf32>
    %c0_104 = arith.constant 0 : index
    %c7_105 = arith.constant 7 : index
    %223 = memref.load %arg3[%c0_104, %c7_105] : memref<3x8xf32, #tpu.memory_space<smem>>
    %224 = vector.broadcast %223 : f32 to vector<1x128xf32>
    %225 = arith.mulf %222, %224 : vector<1x128xf32>
    %cst_106 = arith.constant 0.000000e+00 : f32
    %226 = vector.broadcast %cst_106 : f32 to vector<1x128xf32>
    %227 = arith.maximumf %225, %226 : vector<1x128xf32>
    %cst_107 = arith.constant 0.000000e+00 : f32
    %228 = vector.broadcast %cst_107 : f32 to vector<7x128xf32>
    %229 = tpu.concatenate %52, %65, %82, %103, %128, %157, %190, %227, %2, %228 in 0 : vector<1x128xf32>, vector<1x128xf32>, vector<1x128xf32>, vector<1x128xf32>, vector<1x128xf32>, vector<1x128xf32>, vector<1x128xf32>, vector<1x128xf32>, vector<1x128xf32>, vector<7x128xf32> -> vector<16x128xf32>
    %c0_108 = arith.constant 0 : index
    %c32_109 = arith.constant 32 : index
    %c0_110 = arith.constant 0 : index
    %230 = vector.load %arg4[%c0_108, %c32_109, %c0_110] : memref<3x66x16xf32, #tpu.memory_space<vmem>>, vector<1x16x16xf32>
    %231 = vector.shape_cast %230 : vector<1x16x16xf32> to vector<16x16xf32>
    %cst_111 = arith.constant dense<0.000000e+00> : vector<16x128xf32>
    %232 = tpu.matmul %231, %229, %cst_111 {dimension_numbers = #tpu.dot_dimension_numbers<[1], [0], [0], [1], [0, 0, 1, 1], [], []>, precision = #tpu.contract_precision<fp32>} : vector<16x16xf32>, vector<16x128xf32>, vector<16x128xf32> -> vector<16x128xf32>
    %233 = arith.addf %10, %232 : vector<16x128xf32>
    %c0_112 = arith.constant 0 : index
    %c48_113 = arith.constant 48 : index
    %c0_114 = arith.constant 0 : index
    %234 = vector.load %arg4[%c0_112, %c48_113, %c0_114] : memref<3x66x16xf32, #tpu.memory_space<vmem>>, vector<1x8x16xf32>
    %235 = vector.shape_cast %234 : vector<1x8x16xf32> to vector<8x16xf32>
    %cst_115 = arith.constant dense<0.000000e+00> : vector<8x128xf32>
    %236 = tpu.matmul %235, %233, %cst_115 {dimension_numbers = #tpu.dot_dimension_numbers<[1], [0], [0], [1], [0, 0, 1, 1], [], []>, precision = #tpu.contract_precision<fp32>} : vector<8x16xf32>, vector<16x128xf32>, vector<8x128xf32> -> vector<8x128xf32>
    %c0_116 = arith.constant 0 : index
    %c65 = arith.constant 65 : index
    %c0_117 = arith.constant 0 : index
    %237 = vector.load %arg4[%c0_116, %c65, %c0_117] : memref<3x66x16xf32, #tpu.memory_space<vmem>>, vector<1x1x16xf32>
    %238 = vector.shape_cast %237 : vector<1x1x16xf32> to vector<1x16xf32>
    %cst_118 = arith.constant dense<0.000000e+00> : vector<1x128xf32>
    %239 = tpu.matmul %238, %229, %cst_118 {dimension_numbers = #tpu.dot_dimension_numbers<[1], [0], [0], [1], [0, 0, 1, 1], [], []>, precision = #tpu.contract_precision<fp32>} : vector<1x16xf32>, vector<16x128xf32>, vector<1x128xf32> -> vector<1x128xf32>
    %240 = arith.addf %13, %239 : vector<1x128xf32>
    %c0_119 = arith.constant 0 : index
    %c0_120 = arith.constant 0 : index
    %c0_121 = arith.constant 0 : index
    %241 = vector.load %arg8[%c0_119, %c0_120, %c0_121] : memref<3x8x128xf32, #tpu.memory_space<vmem>>, vector<1x8x128xf32>
    %242 = vector.shape_cast %241 : vector<1x8x128xf32> to vector<8x128xf32>
    %243 = vector.shape_cast %236 : vector<8x128xf32> to vector<1x8x128xf32>
    tpu.vector_store %arg8[%c0_119, %c0_120, %c0_121], %243 {strides = array<i32>} : memref<3x8x128xf32, #tpu.memory_space<vmem>>, vector<1x8x128xf32>,
    %244 = vector.extract_strided_slice %18 {offsets = [0, 0], sizes = [1, 128], strides = [1, 1]} : vector<8x128xf32> to vector<1x128xf32>
    %245 = vector.extract_strided_slice %18 {offsets = [1, 0], sizes = [1, 128], strides = [1, 1]} : vector<8x128xf32> to vector<1x128xf32>
    %246 = vector.extract_strided_slice %18 {offsets = [2, 0], sizes = [1, 128], strides = [1, 1]} : vector<8x128xf32> to vector<1x128xf32>
    %247 = vector.extract_strided_slice %18 {offsets = [3, 0], sizes = [1, 128], strides = [1, 1]} : vector<8x128xf32> to vector<1x128xf32>
    %248 = vector.extract_strided_slice %18 {offsets = [4, 0], sizes = [1, 128], strides = [1, 1]} : vector<8x128xf32> to vector<1x128xf32>
    %249 = vector.extract_strided_slice %18 {offsets = [5, 0], sizes = [1, 128], strides = [1, 1]} : vector<8x128xf32> to vector<1x128xf32>
    %250 = vector.extract_strided_slice %18 {offsets = [6, 0], sizes = [1, 128], strides = [1, 1]} : vector<8x128xf32> to vector<1x128xf32>
    %251 = vector.extract_strided_slice %18 {offsets = [7, 0], sizes = [1, 128], strides = [1, 1]} : vector<8x128xf32> to vector<1x128xf32>
    %c1_122 = arith.constant 1 : index
    %c0_123 = arith.constant 0 : index
    %252 = memref.load %arg2[%c1_122, %c0_123] : memref<3x8xf32, #tpu.memory_space<smem>>
    %253 = vector.broadcast %252 : f32 to vector<1x128xf32>
    %254 = arith.mulf %253, %240 : vector<1x128xf32>
    %255 = arith.addf %244, %254 : vector<1x128xf32>
    %c1_124 = arith.constant 1 : index
    %c0_125 = arith.constant 0 : index
    %256 = memref.load %arg3[%c1_124, %c0_125] : memref<3x8xf32, #tpu.memory_space<smem>>
    %257 = vector.broadcast %256 : f32 to vector<1x128xf32>
    %258 = arith.mulf %255, %257 : vector<1x128xf32>
    %cst_126 = arith.constant 0.000000e+00 : f32
    %259 = vector.broadcast %cst_126 : f32 to vector<1x128xf32>
    %260 = arith.maximumf %258, %259 : vector<1x128xf32>
    %c1_127 = arith.constant 1 : index
    %c1_128 = arith.constant 1 : index
    %261 = memref.load %arg2[%c1_127, %c1_128] : memref<3x8xf32, #tpu.memory_space<smem>>
    %262 = vector.broadcast %261 : f32 to vector<1x128xf32>
    %263 = arith.mulf %262, %240 : vector<1x128xf32>
    %264 = arith.addf %245, %263 : vector<1x128xf32>
    %c1_129 = arith.constant 1 : index
    %c8_130 = arith.constant 8 : index
    %265 = memref.load %arg1[%c1_129, %c8_130] : memref<3x64xf32, #tpu.memory_space<smem>>
    %266 = vector.broadcast %265 : f32 to vector<1x128xf32>
    %267 = arith.mulf %266, %260 : vector<1x128xf32>
    %268 = arith.addf %264, %267 : vector<1x128xf32>
    %c1_131 = arith.constant 1 : index
    %c1_132 = arith.constant 1 : index
    %269 = memref.load %arg3[%c1_131, %c1_132] : memref<3x8xf32, #tpu.memory_space<smem>>
    %270 = vector.broadcast %269 : f32 to vector<1x128xf32>
    %271 = arith.mulf %268, %270 : vector<1x128xf32>
    %cst_133 = arith.constant 0.000000e+00 : f32
    %272 = vector.broadcast %cst_133 : f32 to vector<1x128xf32>
    %273 = arith.maximumf %271, %272 : vector<1x128xf32>
    %c1_134 = arith.constant 1 : index
    %c2_135 = arith.constant 2 : index
    %274 = memref.load %arg2[%c1_134, %c2_135] : memref<3x8xf32, #tpu.memory_space<smem>>
    %275 = vector.broadcast %274 : f32 to vector<1x128xf32>
    %276 = arith.mulf %275, %240 : vector<1x128xf32>
    %277 = arith.addf %246, %276 : vector<1x128xf32>
    %c1_136 = arith.constant 1 : index
    %c16_137 = arith.constant 16 : index
    %278 = memref.load %arg1[%c1_136, %c16_137] : memref<3x64xf32, #tpu.memory_space<smem>>
    %279 = vector.broadcast %278 : f32 to vector<1x128xf32>
    %280 = arith.mulf %279, %260 : vector<1x128xf32>
    %281 = arith.addf %277, %280 : vector<1x128xf32>
    %c1_138 = arith.constant 1 : index
    %c17_139 = arith.constant 17 : index
    %282 = memref.load %arg1[%c1_138, %c17_139] : memref<3x64xf32, #tpu.memory_space<smem>>
    %283 = vector.broadcast %282 : f32 to vector<1x128xf32>
    %284 = arith.mulf %283, %273 : vector<1x128xf32>
    %285 = arith.addf %281, %284 : vector<1x128xf32>
    %c1_140 = arith.constant 1 : index
    %c2_141 = arith.constant 2 : index
    %286 = memref.load %arg3[%c1_140, %c2_141] : memref<3x8xf32, #tpu.memory_space<smem>>
    %287 = vector.broadcast %286 : f32 to vector<1x128xf32>
    %288 = arith.mulf %285, %287 : vector<1x128xf32>
    %cst_142 = arith.constant 0.000000e+00 : f32
    %289 = vector.broadcast %cst_142 : f32 to vector<1x128xf32>
    %290 = arith.maximumf %288, %289 : vector<1x128xf32>
    %c1_143 = arith.constant 1 : index
    %c3_144 = arith.constant 3 : index
    %291 = memref.load %arg2[%c1_143, %c3_144] : memref<3x8xf32, #tpu.memory_space<smem>>
    %292 = vector.broadcast %291 : f32 to vector<1x128xf32>
    %293 = arith.mulf %292, %240 : vector<1x128xf32>
    %294 = arith.addf %247, %293 : vector<1x128xf32>
    %c1_145 = arith.constant 1 : index
    %c24_146 = arith.constant 24 : index
    %295 = memref.load %arg1[%c1_145, %c24_146] : memref<3x64xf32, #tpu.memory_space<smem>>
    %296 = vector.broadcast %295 : f32 to vector<1x128xf32>
    %297 = arith.mulf %296, %260 : vector<1x128xf32>
    %298 = arith.addf %294, %297 : vector<1x128xf32>
    %c1_147 = arith.constant 1 : index
    %c25_148 = arith.constant 25 : index
    %299 = memref.load %arg1[%c1_147, %c25_148] : memref<3x64xf32, #tpu.memory_space<smem>>
    %300 = vector.broadcast %299 : f32 to vector<1x128xf32>
    %301 = arith.mulf %300, %273 : vector<1x128xf32>
    %302 = arith.addf %298, %301 : vector<1x128xf32>
    %c1_149 = arith.constant 1 : index
    %c26_150 = arith.constant 26 : index
    %303 = memref.load %arg1[%c1_149, %c26_150] : memref<3x64xf32, #tpu.memory_space<smem>>
    %304 = vector.broadcast %303 : f32 to vector<1x128xf32>
    %305 = arith.mulf %304, %290 : vector<1x128xf32>
    %306 = arith.addf %302, %305 : vector<1x128xf32>
    %c1_151 = arith.constant 1 : index
    %c3_152 = arith.constant 3 : index
    %307 = memref.load %arg3[%c1_151, %c3_152] : memref<3x8xf32, #tpu.memory_space<smem>>
    %308 = vector.broadcast %307 : f32 to vector<1x128xf32>
    %309 = arith.mulf %306, %308 : vector<1x128xf32>
    %cst_153 = arith.constant 0.000000e+00 : f32
    %310 = vector.broadcast %cst_153 : f32 to vector<1x128xf32>
    %311 = arith.maximumf %309, %310 : vector<1x128xf32>
    %c1_154 = arith.constant 1 : index
    %c4_155 = arith.constant 4 : index
    %312 = memref.load %arg2[%c1_154, %c4_155] : memref<3x8xf32, #tpu.memory_space<smem>>
    %313 = vector.broadcast %312 : f32 to vector<1x128xf32>
    %314 = arith.mulf %313, %240 : vector<1x128xf32>
    %315 = arith.addf %248, %314 : vector<1x128xf32>
    %c1_156 = arith.constant 1 : index
    %c32_157 = arith.constant 32 : index
    %316 = memref.load %arg1[%c1_156, %c32_157] : memref<3x64xf32, #tpu.memory_space<smem>>
    %317 = vector.broadcast %316 : f32 to vector<1x128xf32>
    %318 = arith.mulf %317, %260 : vector<1x128xf32>
    %319 = arith.addf %315, %318 : vector<1x128xf32>
    %c1_158 = arith.constant 1 : index
    %c33_159 = arith.constant 33 : index
    %320 = memref.load %arg1[%c1_158, %c33_159] : memref<3x64xf32, #tpu.memory_space<smem>>
    %321 = vector.broadcast %320 : f32 to vector<1x128xf32>
    %322 = arith.mulf %321, %273 : vector<1x128xf32>
    %323 = arith.addf %319, %322 : vector<1x128xf32>
    %c1_160 = arith.constant 1 : index
    %c34_161 = arith.constant 34 : index
    %324 = memref.load %arg1[%c1_160, %c34_161] : memref<3x64xf32, #tpu.memory_space<smem>>
    %325 = vector.broadcast %324 : f32 to vector<1x128xf32>
    %326 = arith.mulf %325, %290 : vector<1x128xf32>
    %327 = arith.addf %323, %326 : vector<1x128xf32>
    %c1_162 = arith.constant 1 : index
    %c35_163 = arith.constant 35 : index
    %328 = memref.load %arg1[%c1_162, %c35_163] : memref<3x64xf32, #tpu.memory_space<smem>>
    %329 = vector.broadcast %328 : f32 to vector<1x128xf32>
    %330 = arith.mulf %329, %311 : vector<1x128xf32>
    %331 = arith.addf %327, %330 : vector<1x128xf32>
    %c1_164 = arith.constant 1 : index
    %c4_165 = arith.constant 4 : index
    %332 = memref.load %arg3[%c1_164, %c4_165] : memref<3x8xf32, #tpu.memory_space<smem>>
    %333 = vector.broadcast %332 : f32 to vector<1x128xf32>
    %334 = arith.mulf %331, %333 : vector<1x128xf32>
    %cst_166 = arith.constant 0.000000e+00 : f32
    %335 = vector.broadcast %cst_166 : f32 to vector<1x128xf32>
    %336 = arith.maximumf %334, %335 : vector<1x128xf32>
    %c1_167 = arith.constant 1 : index
    %c5_168 = arith.constant 5 : index
    %337 = memref.load %arg2[%c1_167, %c5_168] : memref<3x8xf32, #tpu.memory_space<smem>>
    %338 = vector.broadcast %337 : f32 to vector<1x128xf32>
    %339 = arith.mulf %338, %240 : vector<1x128xf32>
    %340 = arith.addf %249, %339 : vector<1x128xf32>
    %c1_169 = arith.constant 1 : index
    %c40_170 = arith.constant 40 : index
    %341 = memref.load %arg1[%c1_169, %c40_170] : memref<3x64xf32, #tpu.memory_space<smem>>
    %342 = vector.broadcast %341 : f32 to vector<1x128xf32>
    %343 = arith.mulf %342, %260 : vector<1x128xf32>
    %344 = arith.addf %340, %343 : vector<1x128xf32>
    %c1_171 = arith.constant 1 : index
    %c41_172 = arith.constant 41 : index
    %345 = memref.load %arg1[%c1_171, %c41_172] : memref<3x64xf32, #tpu.memory_space<smem>>
    %346 = vector.broadcast %345 : f32 to vector<1x128xf32>
    %347 = arith.mulf %346, %273 : vector<1x128xf32>
    %348 = arith.addf %344, %347 : vector<1x128xf32>
    %c1_173 = arith.constant 1 : index
    %c42_174 = arith.constant 42 : index
    %349 = memref.load %arg1[%c1_173, %c42_174] : memref<3x64xf32, #tpu.memory_space<smem>>
    %350 = vector.broadcast %349 : f32 to vector<1x128xf32>
    %351 = arith.mulf %350, %290 : vector<1x128xf32>
    %352 = arith.addf %348, %351 : vector<1x128xf32>
    %c1_175 = arith.constant 1 : index
    %c43_176 = arith.constant 43 : index
    %353 = memref.load %arg1[%c1_175, %c43_176] : memref<3x64xf32, #tpu.memory_space<smem>>
    %354 = vector.broadcast %353 : f32 to vector<1x128xf32>
    %355 = arith.mulf %354, %311 : vector<1x128xf32>
    %356 = arith.addf %352, %355 : vector<1x128xf32>
    %c1_177 = arith.constant 1 : index
    %c44_178 = arith.constant 44 : index
    %357 = memref.load %arg1[%c1_177, %c44_178] : memref<3x64xf32, #tpu.memory_space<smem>>
    %358 = vector.broadcast %357 : f32 to vector<1x128xf32>
    %359 = arith.mulf %358, %336 : vector<1x128xf32>
    %360 = arith.addf %356, %359 : vector<1x128xf32>
    %c1_179 = arith.constant 1 : index
    %c5_180 = arith.constant 5 : index
    %361 = memref.load %arg3[%c1_179, %c5_180] : memref<3x8xf32, #tpu.memory_space<smem>>
    %362 = vector.broadcast %361 : f32 to vector<1x128xf32>
    %363 = arith.mulf %360, %362 : vector<1x128xf32>
    %cst_181 = arith.constant 0.000000e+00 : f32
    %364 = vector.broadcast %cst_181 : f32 to vector<1x128xf32>
    %365 = arith.maximumf %363, %364 : vector<1x128xf32>
    %c1_182 = arith.constant 1 : index
    %c6_183 = arith.constant 6 : index
    %366 = memref.load %arg2[%c1_182, %c6_183] : memref<3x8xf32, #tpu.memory_space<smem>>
    %367 = vector.broadcast %366 : f32 to vector<1x128xf32>
    %368 = arith.mulf %367, %240 : vector<1x128xf32>
    %369 = arith.addf %250, %368 : vector<1x128xf32>
    %c1_184 = arith.constant 1 : index
    %c48_185 = arith.constant 48 : index
    %370 = memref.load %arg1[%c1_184, %c48_185] : memref<3x64xf32, #tpu.memory_space<smem>>
    %371 = vector.broadcast %370 : f32 to vector<1x128xf32>
    %372 = arith.mulf %371, %260 : vector<1x128xf32>
    %373 = arith.addf %369, %372 : vector<1x128xf32>
    %c1_186 = arith.constant 1 : index
    %c49_187 = arith.constant 49 : index
    %374 = memref.load %arg1[%c1_186, %c49_187] : memref<3x64xf32, #tpu.memory_space<smem>>
    %375 = vector.broadcast %374 : f32 to vector<1x128xf32>
    %376 = arith.mulf %375, %273 : vector<1x128xf32>
    %377 = arith.addf %373, %376 : vector<1x128xf32>
    %c1_188 = arith.constant 1 : index
    %c50_189 = arith.constant 50 : index
    %378 = memref.load %arg1[%c1_188, %c50_189] : memref<3x64xf32, #tpu.memory_space<smem>>
    %379 = vector.broadcast %378 : f32 to vector<1x128xf32>
    %380 = arith.mulf %379, %290 : vector<1x128xf32>
    %381 = arith.addf %377, %380 : vector<1x128xf32>
    %c1_190 = arith.constant 1 : index
    %c51_191 = arith.constant 51 : index
    %382 = memref.load %arg1[%c1_190, %c51_191] : memref<3x64xf32, #tpu.memory_space<smem>>
    %383 = vector.broadcast %382 : f32 to vector<1x128xf32>
    %384 = arith.mulf %383, %311 : vector<1x128xf32>
    %385 = arith.addf %381, %384 : vector<1x128xf32>
    %c1_192 = arith.constant 1 : index
    %c52_193 = arith.constant 52 : index
    %386 = memref.load %arg1[%c1_192, %c52_193] : memref<3x64xf32, #tpu.memory_space<smem>>
    %387 = vector.broadcast %386 : f32 to vector<1x128xf32>
    %388 = arith.mulf %387, %336 : vector<1x128xf32>
    %389 = arith.addf %385, %388 : vector<1x128xf32>
    %c1_194 = arith.constant 1 : index
    %c53_195 = arith.constant 53 : index
    %390 = memref.load %arg1[%c1_194, %c53_195] : memref<3x64xf32, #tpu.memory_space<smem>>
    %391 = vector.broadcast %390 : f32 to vector<1x128xf32>
    %392 = arith.mulf %391, %365 : vector<1x128xf32>
    %393 = arith.addf %389, %392 : vector<1x128xf32>
    %c1_196 = arith.constant 1 : index
    %c6_197 = arith.constant 6 : index
    %394 = memref.load %arg3[%c1_196, %c6_197] : memref<3x8xf32, #tpu.memory_space<smem>>
    %395 = vector.broadcast %394 : f32 to vector<1x128xf32>
    %396 = arith.mulf %393, %395 : vector<1x128xf32>
    %cst_198 = arith.constant 0.000000e+00 : f32
    %397 = vector.broadcast %cst_198 : f32 to vector<1x128xf32>
    %398 = arith.maximumf %396, %397 : vector<1x128xf32>
    %c1_199 = arith.constant 1 : index
    %c7_200 = arith.constant 7 : index
    %399 = memref.load %arg2[%c1_199, %c7_200] : memref<3x8xf32, #tpu.memory_space<smem>>
    %400 = vector.broadcast %399 : f32 to vector<1x128xf32>
    %401 = arith.mulf %400, %240 : vector<1x128xf32>
    %402 = arith.addf %251, %401 : vector<1x128xf32>
    %c1_201 = arith.constant 1 : index
    %c56_202 = arith.constant 56 : index
    %403 = memref.load %arg1[%c1_201, %c56_202] : memref<3x64xf32, #tpu.memory_space<smem>>
    %404 = vector.broadcast %403 : f32 to vector<1x128xf32>
    %405 = arith.mulf %404, %260 : vector<1x128xf32>
    %406 = arith.addf %402, %405 : vector<1x128xf32>
    %c1_203 = arith.constant 1 : index
    %c57_204 = arith.constant 57 : index
    %407 = memref.load %arg1[%c1_203, %c57_204] : memref<3x64xf32, #tpu.memory_space<smem>>
    %408 = vector.broadcast %407 : f32 to vector<1x128xf32>
    %409 = arith.mulf %408, %273 : vector<1x128xf32>
    %410 = arith.addf %406, %409 : vector<1x128xf32>
    %c1_205 = arith.constant 1 : index
    %c58_206 = arith.constant 58 : index
    %411 = memref.load %arg1[%c1_205, %c58_206] : memref<3x64xf32, #tpu.memory_space<smem>>
    %412 = vector.broadcast %411 : f32 to vector<1x128xf32>
    %413 = arith.mulf %412, %290 : vector<1x128xf32>
    %414 = arith.addf %410, %413 : vector<1x128xf32>
    %c1_207 = arith.constant 1 : index
    %c59_208 = arith.constant 59 : index
    %415 = memref.load %arg1[%c1_207, %c59_208] : memref<3x64xf32, #tpu.memory_space<smem>>
    %416 = vector.broadcast %415 : f32 to vector<1x128xf32>
    %417 = arith.mulf %416, %311 : vector<1x128xf32>
    %418 = arith.addf %414, %417 : vector<1x128xf32>
    %c1_209 = arith.constant 1 : index
    %c60_210 = arith.constant 60 : index
    %419 = memref.load %arg1[%c1_209, %c60_210] : memref<3x64xf32, #tpu.memory_space<smem>>
    %420 = vector.broadcast %419 : f32 to vector<1x128xf32>
    %421 = arith.mulf %420, %336 : vector<1x128xf32>
    %422 = arith.addf %418, %421 : vector<1x128xf32>
    %c1_211 = arith.constant 1 : index
    %c61_212 = arith.constant 61 : index
    %423 = memref.load %arg1[%c1_211, %c61_212] : memref<3x64xf32, #tpu.memory_space<smem>>
    %424 = vector.broadcast %423 : f32 to vector<1x128xf32>
    %425 = arith.mulf %424, %365 : vector<1x128xf32>
    %426 = arith.addf %422, %425 : vector<1x128xf32>
    %c1_213 = arith.constant 1 : index
    %c62_214 = arith.constant 62 : index
    %427 = memref.load %arg1[%c1_213, %c62_214] : memref<3x64xf32, #tpu.memory_space<smem>>
    %428 = vector.broadcast %427 : f32 to vector<1x128xf32>
    %429 = arith.mulf %428, %398 : vector<1x128xf32>
    %430 = arith.addf %426, %429 : vector<1x128xf32>
    %c1_215 = arith.constant 1 : index
    %c7_216 = arith.constant 7 : index
    %431 = memref.load %arg3[%c1_215, %c7_216] : memref<3x8xf32, #tpu.memory_space<smem>>
    %432 = vector.broadcast %431 : f32 to vector<1x128xf32>
    %433 = arith.mulf %430, %432 : vector<1x128xf32>
    %cst_217 = arith.constant 0.000000e+00 : f32
    %434 = vector.broadcast %cst_217 : f32 to vector<1x128xf32>
    %435 = arith.maximumf %433, %434 : vector<1x128xf32>
    %cst_218 = arith.constant 0.000000e+00 : f32
    %436 = vector.broadcast %cst_218 : f32 to vector<7x128xf32>
    %437 = tpu.concatenate %260, %273, %290, %311, %336, %365, %398, %435, %240, %436 in 0 : vector<1x128xf32>, vector<1x128xf32>, vector<1x128xf32>, vector<1x128xf32>, vector<1x128xf32>, vector<1x128xf32>, vector<1x128xf32>, vector<1x128xf32>, vector<1x128xf32>, vector<7x128xf32> -> vector<16x128xf32>
    %c1_219 = arith.constant 1 : index
    %c32_220 = arith.constant 32 : index
    %c0_221 = arith.constant 0 : index
    %438 = vector.load %arg4[%c1_219, %c32_220, %c0_221] : memref<3x66x16xf32, #tpu.memory_space<vmem>>, vector<1x16x16xf32>
    %439 = vector.shape_cast %438 : vector<1x16x16xf32> to vector<16x16xf32>
    %cst_222 = arith.constant dense<0.000000e+00> : vector<16x128xf32>
    %440 = tpu.matmul %439, %437, %cst_222 {dimension_numbers = #tpu.dot_dimension_numbers<[1], [0], [0], [1], [0, 0, 1, 1], [], []>, precision = #tpu.contract_precision<fp32>} : vector<16x16xf32>, vector<16x128xf32>, vector<16x128xf32> -> vector<16x128xf32>
    %441 = arith.addf %21, %440 : vector<16x128xf32>
    %c1_223 = arith.constant 1 : index
    %c48_224 = arith.constant 48 : index
    %c0_225 = arith.constant 0 : index
    %442 = vector.load %arg4[%c1_223, %c48_224, %c0_225] : memref<3x66x16xf32, #tpu.memory_space<vmem>>, vector<1x8x16xf32>
    %443 = vector.shape_cast %442 : vector<1x8x16xf32> to vector<8x16xf32>
    %cst_226 = arith.constant dense<0.000000e+00> : vector<8x128xf32>
    %444 = tpu.matmul %443, %441, %cst_226 {dimension_numbers = #tpu.dot_dimension_numbers<[1], [0], [0], [1], [0, 0, 1, 1], [], []>, precision = #tpu.contract_precision<fp32>} : vector<8x16xf32>, vector<16x128xf32>, vector<8x128xf32> -> vector<8x128xf32>
    %c1_227 = arith.constant 1 : index
    %c65_228 = arith.constant 65 : index
    %c0_229 = arith.constant 0 : index
    %445 = vector.load %arg4[%c1_227, %c65_228, %c0_229] : memref<3x66x16xf32, #tpu.memory_space<vmem>>, vector<1x1x16xf32>
    %446 = vector.shape_cast %445 : vector<1x1x16xf32> to vector<1x16xf32>
    %cst_230 = arith.constant dense<0.000000e+00> : vector<1x128xf32>
    %447 = tpu.matmul %446, %437, %cst_230 {dimension_numbers = #tpu.dot_dimension_numbers<[1], [0], [0], [1], [0, 0, 1, 1], [], []>, precision = #tpu.contract_precision<fp32>} : vector<1x16xf32>, vector<16x128xf32>, vector<1x128xf32> -> vector<1x128xf32>
    %448 = arith.addf %24, %447 : vector<1x128xf32>
    %c1_231 = arith.constant 1 : index
    %c0_232 = arith.constant 0 : index
    %c0_233 = arith.constant 0 : index
    %449 = vector.load %arg8[%c1_231, %c0_232, %c0_233] : memref<3x8x128xf32, #tpu.memory_space<vmem>>, vector<1x8x128xf32>
    %450 = vector.shape_cast %449 : vector<1x8x128xf32> to vector<8x128xf32>
    %451 = vector.shape_cast %444 : vector<8x128xf32> to vector<1x8x128xf32>
    tpu.vector_store %arg8[%c1_231, %c0_232, %c0_233], %451 {strides = array<i32>} : memref<3x8x128xf32, #tpu.memory_space<vmem>>, vector<1x8x128xf32>,
    %452 = vector.extract_strided_slice %29 {offsets = [0, 0], sizes = [1, 128], strides = [1, 1]} : vector<8x128xf32> to vector<1x128xf32>
    %453 = vector.extract_strided_slice %29 {offsets = [1, 0], sizes = [1, 128], strides = [1, 1]} : vector<8x128xf32> to vector<1x128xf32>
    %454 = vector.extract_strided_slice %29 {offsets = [2, 0], sizes = [1, 128], strides = [1, 1]} : vector<8x128xf32> to vector<1x128xf32>
    %455 = vector.extract_strided_slice %29 {offsets = [3, 0], sizes = [1, 128], strides = [1, 1]} : vector<8x128xf32> to vector<1x128xf32>
    %456 = vector.extract_strided_slice %29 {offsets = [4, 0], sizes = [1, 128], strides = [1, 1]} : vector<8x128xf32> to vector<1x128xf32>
    %457 = vector.extract_strided_slice %29 {offsets = [5, 0], sizes = [1, 128], strides = [1, 1]} : vector<8x128xf32> to vector<1x128xf32>
    %458 = vector.extract_strided_slice %29 {offsets = [6, 0], sizes = [1, 128], strides = [1, 1]} : vector<8x128xf32> to vector<1x128xf32>
    %459 = vector.extract_strided_slice %29 {offsets = [7, 0], sizes = [1, 128], strides = [1, 1]} : vector<8x128xf32> to vector<1x128xf32>
    %c2_234 = arith.constant 2 : index
    %c0_235 = arith.constant 0 : index
    %460 = memref.load %arg2[%c2_234, %c0_235] : memref<3x8xf32, #tpu.memory_space<smem>>
    %461 = vector.broadcast %460 : f32 to vector<1x128xf32>
    %462 = arith.mulf %461, %448 : vector<1x128xf32>
    %463 = arith.addf %452, %462 : vector<1x128xf32>
    %c2_236 = arith.constant 2 : index
    %c0_237 = arith.constant 0 : index
    %464 = memref.load %arg3[%c2_236, %c0_237] : memref<3x8xf32, #tpu.memory_space<smem>>
    %465 = vector.broadcast %464 : f32 to vector<1x128xf32>
    %466 = arith.mulf %463, %465 : vector<1x128xf32>
    %cst_238 = arith.constant 0.000000e+00 : f32
    %467 = vector.broadcast %cst_238 : f32 to vector<1x128xf32>
    %468 = arith.maximumf %466, %467 : vector<1x128xf32>
    %c2_239 = arith.constant 2 : index
    %c1_240 = arith.constant 1 : index
    %469 = memref.load %arg2[%c2_239, %c1_240] : memref<3x8xf32, #tpu.memory_space<smem>>
    %470 = vector.broadcast %469 : f32 to vector<1x128xf32>
    %471 = arith.mulf %470, %448 : vector<1x128xf32>
    %472 = arith.addf %453, %471 : vector<1x128xf32>
    %c2_241 = arith.constant 2 : index
    %c8_242 = arith.constant 8 : index
    %473 = memref.load %arg1[%c2_241, %c8_242] : memref<3x64xf32, #tpu.memory_space<smem>>
    %474 = vector.broadcast %473 : f32 to vector<1x128xf32>
    %475 = arith.mulf %474, %468 : vector<1x128xf32>
    %476 = arith.addf %472, %475 : vector<1x128xf32>
    %c2_243 = arith.constant 2 : index
    %c1_244 = arith.constant 1 : index
    %477 = memref.load %arg3[%c2_243, %c1_244] : memref<3x8xf32, #tpu.memory_space<smem>>
    %478 = vector.broadcast %477 : f32 to vector<1x128xf32>
    %479 = arith.mulf %476, %478 : vector<1x128xf32>
    %cst_245 = arith.constant 0.000000e+00 : f32
    %480 = vector.broadcast %cst_245 : f32 to vector<1x128xf32>
    %481 = arith.maximumf %479, %480 : vector<1x128xf32>
    %c2_246 = arith.constant 2 : index
    %c2_247 = arith.constant 2 : index
    %482 = memref.load %arg2[%c2_246, %c2_247] : memref<3x8xf32, #tpu.memory_space<smem>>
    %483 = vector.broadcast %482 : f32 to vector<1x128xf32>
    %484 = arith.mulf %483, %448 : vector<1x128xf32>
    %485 = arith.addf %454, %484 : vector<1x128xf32>
    %c2_248 = arith.constant 2 : index
    %c16_249 = arith.constant 16 : index
    %486 = memref.load %arg1[%c2_248, %c16_249] : memref<3x64xf32, #tpu.memory_space<smem>>
    %487 = vector.broadcast %486 : f32 to vector<1x128xf32>
    %488 = arith.mulf %487, %468 : vector<1x128xf32>
    %489 = arith.addf %485, %488 : vector<1x128xf32>
    %c2_250 = arith.constant 2 : index
    %c17_251 = arith.constant 17 : index
    %490 = memref.load %arg1[%c2_250, %c17_251] : memref<3x64xf32, #tpu.memory_space<smem>>
    %491 = vector.broadcast %490 : f32 to vector<1x128xf32>
    %492 = arith.mulf %491, %481 : vector<1x128xf32>
    %493 = arith.addf %489, %492 : vector<1x128xf32>
    %c2_252 = arith.constant 2 : index
    %c2_253 = arith.constant 2 : index
    %494 = memref.load %arg3[%c2_252, %c2_253] : memref<3x8xf32, #tpu.memory_space<smem>>
    %495 = vector.broadcast %494 : f32 to vector<1x128xf32>
    %496 = arith.mulf %493, %495 : vector<1x128xf32>
    %cst_254 = arith.constant 0.000000e+00 : f32
    %497 = vector.broadcast %cst_254 : f32 to vector<1x128xf32>
    %498 = arith.maximumf %496, %497 : vector<1x128xf32>
    %c2_255 = arith.constant 2 : index
    %c3_256 = arith.constant 3 : index
    %499 = memref.load %arg2[%c2_255, %c3_256] : memref<3x8xf32, #tpu.memory_space<smem>>
    %500 = vector.broadcast %499 : f32 to vector<1x128xf32>
    %501 = arith.mulf %500, %448 : vector<1x128xf32>
    %502 = arith.addf %455, %501 : vector<1x128xf32>
    %c2_257 = arith.constant 2 : index
    %c24_258 = arith.constant 24 : index
    %503 = memref.load %arg1[%c2_257, %c24_258] : memref<3x64xf32, #tpu.memory_space<smem>>
    %504 = vector.broadcast %503 : f32 to vector<1x128xf32>
    %505 = arith.mulf %504, %468 : vector<1x128xf32>
    %506 = arith.addf %502, %505 : vector<1x128xf32>
    %c2_259 = arith.constant 2 : index
    %c25_260 = arith.constant 25 : index
    %507 = memref.load %arg1[%c2_259, %c25_260] : memref<3x64xf32, #tpu.memory_space<smem>>
    %508 = vector.broadcast %507 : f32 to vector<1x128xf32>
    %509 = arith.mulf %508, %481 : vector<1x128xf32>
    %510 = arith.addf %506, %509 : vector<1x128xf32>
    %c2_261 = arith.constant 2 : index
    %c26_262 = arith.constant 26 : index
    %511 = memref.load %arg1[%c2_261, %c26_262] : memref<3x64xf32, #tpu.memory_space<smem>>
    %512 = vector.broadcast %511 : f32 to vector<1x128xf32>
    %513 = arith.mulf %512, %498 : vector<1x128xf32>
    %514 = arith.addf %510, %513 : vector<1x128xf32>
    %c2_263 = arith.constant 2 : index
    %c3_264 = arith.constant 3 : index
    %515 = memref.load %arg3[%c2_263, %c3_264] : memref<3x8xf32, #tpu.memory_space<smem>>
    %516 = vector.broadcast %515 : f32 to vector<1x128xf32>
    %517 = arith.mulf %514, %516 : vector<1x128xf32>
    %cst_265 = arith.constant 0.000000e+00 : f32
    %518 = vector.broadcast %cst_265 : f32 to vector<1x128xf32>
    %519 = arith.maximumf %517, %518 : vector<1x128xf32>
    %c2_266 = arith.constant 2 : index
    %c4_267 = arith.constant 4 : index
    %520 = memref.load %arg2[%c2_266, %c4_267] : memref<3x8xf32, #tpu.memory_space<smem>>
    %521 = vector.broadcast %520 : f32 to vector<1x128xf32>
    %522 = arith.mulf %521, %448 : vector<1x128xf32>
    %523 = arith.addf %456, %522 : vector<1x128xf32>
    %c2_268 = arith.constant 2 : index
    %c32_269 = arith.constant 32 : index
    %524 = memref.load %arg1[%c2_268, %c32_269] : memref<3x64xf32, #tpu.memory_space<smem>>
    %525 = vector.broadcast %524 : f32 to vector<1x128xf32>
    %526 = arith.mulf %525, %468 : vector<1x128xf32>
    %527 = arith.addf %523, %526 : vector<1x128xf32>
    %c2_270 = arith.constant 2 : index
    %c33_271 = arith.constant 33 : index
    %528 = memref.load %arg1[%c2_270, %c33_271] : memref<3x64xf32, #tpu.memory_space<smem>>
    %529 = vector.broadcast %528 : f32 to vector<1x128xf32>
    %530 = arith.mulf %529, %481 : vector<1x128xf32>
    %531 = arith.addf %527, %530 : vector<1x128xf32>
    %c2_272 = arith.constant 2 : index
    %c34_273 = arith.constant 34 : index
    %532 = memref.load %arg1[%c2_272, %c34_273] : memref<3x64xf32, #tpu.memory_space<smem>>
    %533 = vector.broadcast %532 : f32 to vector<1x128xf32>
    %534 = arith.mulf %533, %498 : vector<1x128xf32>
    %535 = arith.addf %531, %534 : vector<1x128xf32>
    %c2_274 = arith.constant 2 : index
    %c35_275 = arith.constant 35 : index
    %536 = memref.load %arg1[%c2_274, %c35_275] : memref<3x64xf32, #tpu.memory_space<smem>>
    %537 = vector.broadcast %536 : f32 to vector<1x128xf32>
    %538 = arith.mulf %537, %519 : vector<1x128xf32>
    %539 = arith.addf %535, %538 : vector<1x128xf32>
    %c2_276 = arith.constant 2 : index
    %c4_277 = arith.constant 4 : index
    %540 = memref.load %arg3[%c2_276, %c4_277] : memref<3x8xf32, #tpu.memory_space<smem>>
    %541 = vector.broadcast %540 : f32 to vector<1x128xf32>
    %542 = arith.mulf %539, %541 : vector<1x128xf32>
    %cst_278 = arith.constant 0.000000e+00 : f32
    %543 = vector.broadcast %cst_278 : f32 to vector<1x128xf32>
    %544 = arith.maximumf %542, %543 : vector<1x128xf32>
    %c2_279 = arith.constant 2 : index
    %c5_280 = arith.constant 5 : index
    %545 = memref.load %arg2[%c2_279, %c5_280] : memref<3x8xf32, #tpu.memory_space<smem>>
    %546 = vector.broadcast %545 : f32 to vector<1x128xf32>
    %547 = arith.mulf %546, %448 : vector<1x128xf32>
    %548 = arith.addf %457, %547 : vector<1x128xf32>
    %c2_281 = arith.constant 2 : index
    %c40_282 = arith.constant 40 : index
    %549 = memref.load %arg1[%c2_281, %c40_282] : memref<3x64xf32, #tpu.memory_space<smem>>
    %550 = vector.broadcast %549 : f32 to vector<1x128xf32>
    %551 = arith.mulf %550, %468 : vector<1x128xf32>
    %552 = arith.addf %548, %551 : vector<1x128xf32>
    %c2_283 = arith.constant 2 : index
    %c41_284 = arith.constant 41 : index
    %553 = memref.load %arg1[%c2_283, %c41_284] : memref<3x64xf32, #tpu.memory_space<smem>>
    %554 = vector.broadcast %553 : f32 to vector<1x128xf32>
    %555 = arith.mulf %554, %481 : vector<1x128xf32>
    %556 = arith.addf %552, %555 : vector<1x128xf32>
    %c2_285 = arith.constant 2 : index
    %c42_286 = arith.constant 42 : index
    %557 = memref.load %arg1[%c2_285, %c42_286] : memref<3x64xf32, #tpu.memory_space<smem>>
    %558 = vector.broadcast %557 : f32 to vector<1x128xf32>
    %559 = arith.mulf %558, %498 : vector<1x128xf32>
    %560 = arith.addf %556, %559 : vector<1x128xf32>
    %c2_287 = arith.constant 2 : index
    %c43_288 = arith.constant 43 : index
    %561 = memref.load %arg1[%c2_287, %c43_288] : memref<3x64xf32, #tpu.memory_space<smem>>
    %562 = vector.broadcast %561 : f32 to vector<1x128xf32>
    %563 = arith.mulf %562, %519 : vector<1x128xf32>
    %564 = arith.addf %560, %563 : vector<1x128xf32>
    %c2_289 = arith.constant 2 : index
    %c44_290 = arith.constant 44 : index
    %565 = memref.load %arg1[%c2_289, %c44_290] : memref<3x64xf32, #tpu.memory_space<smem>>
    %566 = vector.broadcast %565 : f32 to vector<1x128xf32>
    %567 = arith.mulf %566, %544 : vector<1x128xf32>
    %568 = arith.addf %564, %567 : vector<1x128xf32>
    %c2_291 = arith.constant 2 : index
    %c5_292 = arith.constant 5 : index
    %569 = memref.load %arg3[%c2_291, %c5_292] : memref<3x8xf32, #tpu.memory_space<smem>>
    %570 = vector.broadcast %569 : f32 to vector<1x128xf32>
    %571 = arith.mulf %568, %570 : vector<1x128xf32>
    %cst_293 = arith.constant 0.000000e+00 : f32
    %572 = vector.broadcast %cst_293 : f32 to vector<1x128xf32>
    %573 = arith.maximumf %571, %572 : vector<1x128xf32>
    %c2_294 = arith.constant 2 : index
    %c6_295 = arith.constant 6 : index
    %574 = memref.load %arg2[%c2_294, %c6_295] : memref<3x8xf32, #tpu.memory_space<smem>>
    %575 = vector.broadcast %574 : f32 to vector<1x128xf32>
    %576 = arith.mulf %575, %448 : vector<1x128xf32>
    %577 = arith.addf %458, %576 : vector<1x128xf32>
    %c2_296 = arith.constant 2 : index
    %c48_297 = arith.constant 48 : index
    %578 = memref.load %arg1[%c2_296, %c48_297] : memref<3x64xf32, #tpu.memory_space<smem>>
    %579 = vector.broadcast %578 : f32 to vector<1x128xf32>
    %580 = arith.mulf %579, %468 : vector<1x128xf32>
    %581 = arith.addf %577, %580 : vector<1x128xf32>
    %c2_298 = arith.constant 2 : index
    %c49_299 = arith.constant 49 : index
    %582 = memref.load %arg1[%c2_298, %c49_299] : memref<3x64xf32, #tpu.memory_space<smem>>
    %583 = vector.broadcast %582 : f32 to vector<1x128xf32>
    %584 = arith.mulf %583, %481 : vector<1x128xf32>
    %585 = arith.addf %581, %584 : vector<1x128xf32>
    %c2_300 = arith.constant 2 : index
    %c50_301 = arith.constant 50 : index
    %586 = memref.load %arg1[%c2_300, %c50_301] : memref<3x64xf32, #tpu.memory_space<smem>>
    %587 = vector.broadcast %586 : f32 to vector<1x128xf32>
    %588 = arith.mulf %587, %498 : vector<1x128xf32>
    %589 = arith.addf %585, %588 : vector<1x128xf32>
    %c2_302 = arith.constant 2 : index
    %c51_303 = arith.constant 51 : index
    %590 = memref.load %arg1[%c2_302, %c51_303] : memref<3x64xf32, #tpu.memory_space<smem>>
    %591 = vector.broadcast %590 : f32 to vector<1x128xf32>
    %592 = arith.mulf %591, %519 : vector<1x128xf32>
    %593 = arith.addf %589, %592 : vector<1x128xf32>
    %c2_304 = arith.constant 2 : index
    %c52_305 = arith.constant 52 : index
    %594 = memref.load %arg1[%c2_304, %c52_305] : memref<3x64xf32, #tpu.memory_space<smem>>
    %595 = vector.broadcast %594 : f32 to vector<1x128xf32>
    %596 = arith.mulf %595, %544 : vector<1x128xf32>
    %597 = arith.addf %593, %596 : vector<1x128xf32>
    %c2_306 = arith.constant 2 : index
    %c53_307 = arith.constant 53 : index
    %598 = memref.load %arg1[%c2_306, %c53_307] : memref<3x64xf32, #tpu.memory_space<smem>>
    %599 = vector.broadcast %598 : f32 to vector<1x128xf32>
    %600 = arith.mulf %599, %573 : vector<1x128xf32>
    %601 = arith.addf %597, %600 : vector<1x128xf32>
    %c2_308 = arith.constant 2 : index
    %c6_309 = arith.constant 6 : index
    %602 = memref.load %arg3[%c2_308, %c6_309] : memref<3x8xf32, #tpu.memory_space<smem>>
    %603 = vector.broadcast %602 : f32 to vector<1x128xf32>
    %604 = arith.mulf %601, %603 : vector<1x128xf32>
    %cst_310 = arith.constant 0.000000e+00 : f32
    %605 = vector.broadcast %cst_310 : f32 to vector<1x128xf32>
    %606 = arith.maximumf %604, %605 : vector<1x128xf32>
    %c2_311 = arith.constant 2 : index
    %c7_312 = arith.constant 7 : index
    %607 = memref.load %arg2[%c2_311, %c7_312] : memref<3x8xf32, #tpu.memory_space<smem>>
    %608 = vector.broadcast %607 : f32 to vector<1x128xf32>
    %609 = arith.mulf %608, %448 : vector<1x128xf32>
    %610 = arith.addf %459, %609 : vector<1x128xf32>
    %c2_313 = arith.constant 2 : index
    %c56_314 = arith.constant 56 : index
    %611 = memref.load %arg1[%c2_313, %c56_314] : memref<3x64xf32, #tpu.memory_space<smem>>
    %612 = vector.broadcast %611 : f32 to vector<1x128xf32>
    %613 = arith.mulf %612, %468 : vector<1x128xf32>
    %614 = arith.addf %610, %613 : vector<1x128xf32>
    %c2_315 = arith.constant 2 : index
    %c57_316 = arith.constant 57 : index
    %615 = memref.load %arg1[%c2_315, %c57_316] : memref<3x64xf32, #tpu.memory_space<smem>>
    %616 = vector.broadcast %615 : f32 to vector<1x128xf32>
    %617 = arith.mulf %616, %481 : vector<1x128xf32>
    %618 = arith.addf %614, %617 : vector<1x128xf32>
    %c2_317 = arith.constant 2 : index
    %c58_318 = arith.constant 58 : index
    %619 = memref.load %arg1[%c2_317, %c58_318] : memref<3x64xf32, #tpu.memory_space<smem>>
    %620 = vector.broadcast %619 : f32 to vector<1x128xf32>
    %621 = arith.mulf %620, %498 : vector<1x128xf32>
    %622 = arith.addf %618, %621 : vector<1x128xf32>
    %c2_319 = arith.constant 2 : index
    %c59_320 = arith.constant 59 : index
    %623 = memref.load %arg1[%c2_319, %c59_320] : memref<3x64xf32, #tpu.memory_space<smem>>
    %624 = vector.broadcast %623 : f32 to vector<1x128xf32>
    %625 = arith.mulf %624, %519 : vector<1x128xf32>
    %626 = arith.addf %622, %625 : vector<1x128xf32>
    %c2_321 = arith.constant 2 : index
    %c60_322 = arith.constant 60 : index
    %627 = memref.load %arg1[%c2_321, %c60_322] : memref<3x64xf32, #tpu.memory_space<smem>>
    %628 = vector.broadcast %627 : f32 to vector<1x128xf32>
    %629 = arith.mulf %628, %544 : vector<1x128xf32>
    %630 = arith.addf %626, %629 : vector<1x128xf32>
    %c2_323 = arith.constant 2 : index
    %c61_324 = arith.constant 61 : index
    %631 = memref.load %arg1[%c2_323, %c61_324] : memref<3x64xf32, #tpu.memory_space<smem>>
    %632 = vector.broadcast %631 : f32 to vector<1x128xf32>
    %633 = arith.mulf %632, %573 : vector<1x128xf32>
    %634 = arith.addf %630, %633 : vector<1x128xf32>
    %c2_325 = arith.constant 2 : index
    %c62_326 = arith.constant 62 : index
    %635 = memref.load %arg1[%c2_325, %c62_326] : memref<3x64xf32, #tpu.memory_space<smem>>
    %636 = vector.broadcast %635 : f32 to vector<1x128xf32>
    %637 = arith.mulf %636, %606 : vector<1x128xf32>
    %638 = arith.addf %634, %637 : vector<1x128xf32>
    %c2_327 = arith.constant 2 : index
    %c7_328 = arith.constant 7 : index
    %639 = memref.load %arg3[%c2_327, %c7_328] : memref<3x8xf32, #tpu.memory_space<smem>>
    %640 = vector.broadcast %639 : f32 to vector<1x128xf32>
    %641 = arith.mulf %638, %640 : vector<1x128xf32>
    %cst_329 = arith.constant 0.000000e+00 : f32
    %642 = vector.broadcast %cst_329 : f32 to vector<1x128xf32>
    %643 = arith.maximumf %641, %642 : vector<1x128xf32>
    %cst_330 = arith.constant 0.000000e+00 : f32
    %644 = vector.broadcast %cst_330 : f32 to vector<7x128xf32>
    %645 = tpu.concatenate %468, %481, %498, %519, %544, %573, %606, %643, %448, %644 in 0 : vector<1x128xf32>, vector<1x128xf32>, vector<1x128xf32>, vector<1x128xf32>, vector<1x128xf32>, vector<1x128xf32>, vector<1x128xf32>, vector<1x128xf32>, vector<1x128xf32>, vector<7x128xf32> -> vector<16x128xf32>
    %c2_331 = arith.constant 2 : index
    %c32_332 = arith.constant 32 : index
    %c0_333 = arith.constant 0 : index
    %646 = vector.load %arg4[%c2_331, %c32_332, %c0_333] : memref<3x66x16xf32, #tpu.memory_space<vmem>>, vector<1x16x16xf32>
    %647 = vector.shape_cast %646 : vector<1x16x16xf32> to vector<16x16xf32>
    %cst_334 = arith.constant dense<0.000000e+00> : vector<16x128xf32>
    %648 = tpu.matmul %647, %645, %cst_334 {dimension_numbers = #tpu.dot_dimension_numbers<[1], [0], [0], [1], [0, 0, 1, 1], [], []>, precision = #tpu.contract_precision<fp32>} : vector<16x16xf32>, vector<16x128xf32>, vector<16x128xf32> -> vector<16x128xf32>
    %649 = arith.addf %32, %648 : vector<16x128xf32>
    %c2_335 = arith.constant 2 : index
    %c48_336 = arith.constant 48 : index
    %c0_337 = arith.constant 0 : index
    %650 = vector.load %arg4[%c2_335, %c48_336, %c0_337] : memref<3x66x16xf32, #tpu.memory_space<vmem>>, vector<1x8x16xf32>
    %651 = vector.shape_cast %650 : vector<1x8x16xf32> to vector<8x16xf32>
    %cst_338 = arith.constant dense<0.000000e+00> : vector<8x128xf32>
    %652 = tpu.matmul %651, %649, %cst_338 {dimension_numbers = #tpu.dot_dimension_numbers<[1], [0], [0], [1], [0, 0, 1, 1], [], []>, precision = #tpu.contract_precision<fp32>} : vector<8x16xf32>, vector<16x128xf32>, vector<8x128xf32> -> vector<8x128xf32>
    %c2_339 = arith.constant 2 : index
    %c65_340 = arith.constant 65 : index
    %c0_341 = arith.constant 0 : index
    %653 = vector.load %arg4[%c2_339, %c65_340, %c0_341] : memref<3x66x16xf32, #tpu.memory_space<vmem>>, vector<1x1x16xf32>
    %654 = vector.shape_cast %653 : vector<1x1x16xf32> to vector<1x16xf32>
    %cst_342 = arith.constant dense<0.000000e+00> : vector<1x128xf32>
    %655 = tpu.matmul %654, %645, %cst_342 {dimension_numbers = #tpu.dot_dimension_numbers<[1], [0], [0], [1], [0, 0, 1, 1], [], []>, precision = #tpu.contract_precision<fp32>} : vector<1x16xf32>, vector<16x128xf32>, vector<1x128xf32> -> vector<1x128xf32>
    %656 = arith.addf %35, %655 : vector<1x128xf32>
    %c2_343 = arith.constant 2 : index
    %c0_344 = arith.constant 0 : index
    %c0_345 = arith.constant 0 : index
    %657 = vector.load %arg8[%c2_343, %c0_344, %c0_345] : memref<3x8x128xf32, #tpu.memory_space<vmem>>, vector<1x8x128xf32>
    %658 = vector.shape_cast %657 : vector<1x8x128xf32> to vector<8x128xf32>
    %659 = vector.shape_cast %652 : vector<8x128xf32> to vector<1x8x128xf32>
    tpu.vector_store %arg8[%c2_343, %c0_344, %c0_345], %659 {strides = array<i32>} : memref<3x8x128xf32, #tpu.memory_space<vmem>>, vector<1x8x128xf32>,
    %660 = tpu.concatenate %240, %448, %656 in 0 : vector<1x128xf32>, vector<1x128xf32>, vector<1x128xf32> -> vector<3x128xf32>
    %c0_346 = arith.constant 0 : index
    %c0_347 = arith.constant 0 : index
    %661 = vector.load %arg7[%c0_346, %c0_347] : memref<3x128xf32, #tpu.memory_space<vmem>>, vector<3x128xf32>
    tpu.vector_store %arg7[%c0_346, %c0_347], %660 {strides = array<i32>} : memref<3x128xf32, #tpu.memory_space<vmem>>, vector<3x128xf32>,
    return
  }
  func.func @transform_0(%arg0: i32) -> (i32, i32) {
    %c0_i32 = arith.constant 0 : i32
    %c0_i32_0 = arith.constant 0 : i32
    %c0_i32_1 = arith.constant 0 : i32
    return %c0_i32, %c0_i32_0 : i32, i32
  }
  func.func @transform_1(%arg0: i32) -> (i32, i32) {
    %c0_i32 = arith.constant 0 : i32
    %c0_i32_0 = arith.constant 0 : i32
    %c0_i32_1 = arith.constant 0 : i32
    return %c0_i32, %c0_i32_0 : i32, i32
  }
  func.func @transform_2(%arg0: i32) -> (i32, i32) {
    %c0_i32 = arith.constant 0 : i32
    %c0_i32_0 = arith.constant 0 : i32
    %c0_i32_1 = arith.constant 0 : i32
    return %c0_i32, %c0_i32_0 : i32, i32
  }
  func.func @transform_3(%arg0: i32) -> (i32, i32, i32) {
    %c0_i32 = arith.constant 0 : i32
    %c0_i32_0 = arith.constant 0 : i32
    %c0_i32_1 = arith.constant 0 : i32
    %c0_i32_2 = arith.constant 0 : i32
    return %c0_i32, %c0_i32_0, %c0_i32_1 : i32, i32, i32
  }
  func.func @transform_4(%arg0: i32) -> (i32, i32) {
    %c0_i32 = arith.constant 0 : i32
    %c0_i32_0 = arith.constant 0 : i32
    return %c0_i32, %arg0 : i32, i32
  }
  func.func @transform_5(%arg0: i32) -> (i32, i32, i32) {
    %c0_i32 = arith.constant 0 : i32
    %c0_i32_0 = arith.constant 0 : i32
    %c0_i32_1 = arith.constant 0 : i32
    return %c0_i32, %c0_i32_0, %arg0 : i32, i32, i32
  }
  func.func @transform_6(%arg0: i32) -> (i32, i32) {
    %c0_i32 = arith.constant 0 : i32
    %c0_i32_0 = arith.constant 0 : i32
    return %c0_i32, %arg0 : i32, i32
  }
  func.func @transform_7(%arg0: i32) -> (i32, i32, i32) {
    %c0_i32 = arith.constant 0 : i32
    %c0_i32_0 = arith.constant 0 : i32
    %c0_i32_1 = arith.constant 0 : i32
    return %c0_i32, %c0_i32_0, %arg0 : i32, i32, i32
  }
}

</mosaic_0001>

<bundles_post_ra>
// kernel: three_ren_forward.1
= control target key start
LH: loop header
LB: loop body
LE: loop exit
PB: predicated region body
PF: predicated region fallthrough
CT: control target
= control target key end

     0   :  { %13 = vsyncpa [#allocation4], 0  ;;  %s12509_s0 = inlined_call_operand.vmem [shape: f32[3,64], index: 0, kind: input, shape index: {}]   ;;  %s12510_s1 = inlined_call_operand.vmem [shape: f32[3,8], index: 1, kind: input, shape index: {}]   ;;  %s12511_s2 = inlined_call_operand.vmem [shape: f32[3,8], index: 2, kind: input, shape index: {}]   ;;  %s12512_s3 = inlined_call_operand.vmem [shape: f32[3,66,16], index: 3, kind: input, shape index: {}]   ;;  %s12513_s4 = inlined_call_operand.vmem [shape: f32[2,128], index: 4, kind: input, shape index: {}]   ;;  %s12514_s5 = inlined_call_operand.vmem [shape: f32[3,16,128], index: 5, kind: input, shape index: {}]   ;;  %s12515_s6 = inlined_call_operand.hbm [shape: f32[3,128], index: 6, kind: output, shape index: {0}]   ;;  %s12516_s7 = inlined_call_operand.vmem [shape: f32[3,8,128], index: 7, kind: output, shape index: {1}]  }
   0x1   :  { %14 = vsyncpa [#allocation6], 0  ;;  %s32_s26 = sshll.u32 %s12510_s1, 4  ;;  %s33_s26 = int_to_ptr.vmem [resolvable:$true] %s32_s26 }
   0x2   :  { %15 = vsyncpa [#allocation3], 0  ;;  %s22_s29 = sshll.u32 %s12509_s0, 4  ;;  %s10874_s30 = scalar_lea.vmem %s33_s26, 64  ;;  %s23_s29 = int_to_ptr.vmem [resolvable:$true] %s22_s29 }
   0x3   :  { %p10875_p0 = scmp.ne.s32.totalorder %s33_s26, %s10874_s30  ;;  %p10879_p1 = scmp.lt.s32.totalorder %s33_s26, %s33_s26 }
   0x4   :  { %p10880_p2 = scmp.lt.s32.totalorder %s10874_s30, %s10874_s30 }
   0x6   :  { %p10881_p3 = por %p10880_p2, %p10879_p1 }
   0x8   :  { %p10882_p4 = pnand %p10881_p3, %p10875_p0 }
   0xa   :  { %10885 = shalt.err (!%p10882_p4)
}
   0xb   :  { %s10936_s8 = smov [#allocation5]   ;;  %s10886_s9 = scalar_lea.vmem %s23_s29, 64 }
   0xc   :  { %35 = dma.vmem_to_smem %s33_s26, 64, %s10936_s8, [#allocation6]  }
   0xd   :  { %p10887_p5 = scmp.ne.s32.totalorder %s23_s29, %s10886_s9  ;;  %p10891_p6 = scmp.lt.s32.totalorder %s23_s29, %s23_s29 }
   0xe   :  { %p10892_p7 = scmp.lt.s32.totalorder %s10886_s9, %s10886_s9 }
  0x10   :  { %p10893_p8 = por %p10892_p7, %p10891_p6 }
  0x12   :  { %p10894_p9 = pnand %p10893_p8, %p10887_p5 }
  0x14   :  { %10897 = shalt.err (!%p10894_p9)
}
  0x15   :  { %s10937_s1 = smov [#allocation2]   ;;  %s42_s11 = sshll.u32 %s12511_s2, 4  ;;  %s43_s11 = int_to_ptr.vmem [resolvable:$true] %s42_s11 }
  0x16   :  { %25 = dma.vmem_to_smem %s23_s29, 64, %s10937_s1, [#allocation4]  }
  0x17   :  { %s10898_s12 = scalar_lea.vmem %s43_s11, 64  ;;  %p10903_p11 = scmp.lt.s32.totalorder %s43_s11, %s43_s11 }
  0x18   :  { %p10899_p10 = scmp.ne.s32.totalorder %s43_s11, %s10898_s12  ;;  %p10904_p12 = scmp.lt.s32.totalorder %s10898_s12, %s10898_s12 }
  0x1a   :  { %p10905_p13 = por %p10904_p12, %p10903_p11 }
  0x1c   :  { %p10906_p0 = pnand %p10905_p13, %p10899_p10 }
  0x1e   :  { %10909 = shalt.err (!%p10906_p0)
}
  0x1f   :  { %s10938_s13 = smov [#allocation7]  }
  0x20   :  { %45 = dma.vmem_to_smem %s43_s11, 64, %s10938_s13, [#allocation6]  }
  0x21   :  { %10930 = dma.done.wait [#allocation4], 64  }
  0x22   :  { %10931 = vsyncadd [#allocation4], 4294967232 }
  0x23   :  { %10932 = dma.done.wait [#allocation6], 128  }
  0x24   :  { %10933 = vsyncadd [#allocation6], 4294967168 }
  0x25   :  { %61 = sfence }
  0x26   :  { %v66_v0 = vld [vmem:[%s12514_s5 + $0x8] sm:$0xff]  ;;  %v65_v1 = vld [vmem:[%s12514_s5] sm:$0xff]  ;;  %vm68_vm0 = vcmask 130048   ;;  %v12517_v3 = vmov 0.0   ;;  %vm10940_vm1 = vmmov 0   ;;  %v9601_v23 = vld [vmem:[%s12514_s5 + $0x18] sm:$0xff] }
  0x27   :  { %v67_v2 = vld [vmem:[%s12512_s3] sm:$0xff]  ;;  %10112 = vmatprep.subr.mxu0 %v12517_v3  ;;  %v11001_v4 = vand.u32 4294901760, %v66_v0  ;;  %10119 = vmatprep.subr.mxu1 %v12517_v3  ;;  %v11004_v5 = vand.u32 4294901760, %v65_v1  ;;  %v9602_v20 = vld [vmem:[%s12512_s3 + $0x48] sm:$0xff]  ;;  %v11076_v24 = vand.u32 4294901760, %v9601_v23  ;;  %v9600_v26 = vld [vmem:[%s12514_s5 + $0x10] sm:$0xff] }
  0x28   :  { %v70_v6 = vsel %vm68_vm0, %v67_v2, 0  ;;  %10116 = vmatprep.mubr.msk.f32.mxu0 %vm10940_vm1, %v12517_v3  ;;  %10123 = vmatprep.mubr.msk.f32.mxu1 %vm10940_vm1, %v12517_v3  ;;  %v540_v21 = vsel %vm68_vm0, %v9602_v20, 0  ;;  %v11083_v27 = vand.u32 4294901760, %v9600_v26  ;;  %v9608_v38 = vld [vmem:[%s12512_s3 + $0x90] sm:$0xff]  ;;  %v9607_v42 = vld [vmem:[%s12514_s5 + $0x28] sm:$0xff]  ;;  %v9606_v45 = vld [vmem:[%s12514_s5 + $0x20] sm:$0xff] }
  0x29   :  { %v139_v7 = vand.u32 4294901760, %v70_v6  ;;  %10113 = vmatpush3.msra.mxu0 %v11001_v4  ;;  %v11013_v8 = vsub.f32 %v66_v0, %v11001_v4  ;;  %v11016_v9 = vsub.f32 %v65_v1, %v11004_v5  ;;  %v11071_v22 = vand.u32 4294901760, %v540_v21  ;;  %v62_v52 = vld [vmem:[%s12513_s4 + $0x1] sm:$0x1]  ;;  %v63_v53 = vld [vmem:[%s12513_s4] sm:$0x1] }
  0x2a   :  { %10114 = vmatprep.subr.mxu0 %v12517_v3  ;;  %v11086_v29 = vsub.f32 %v9601_v23, %v11076_v24  ;;  %v11094_v32 = vsub.f32 %v9600_v26, %v11083_v27  ;;  %v1010_v39 = vsel %vm68_vm0, %v9608_v38, 0  ;;  %v11126_v43 = vand.u32 4294901760, %v9607_v42  ;;  %v1770_v56 = vld [vmem:[%s12512_s3 + $0x20] sm:$0xff]  ;;  %s1474_s4 = sld [smem:[#allocation5]] }
  0x2b   :  { %v140_v10 = vsub.f32 %v70_v6, %v139_v7  ;;  %10115 = vmatpush3.msra.mxu0 %v11004_v5  ;;  %v11021_v11 = vand.u32 4294901760, %v11013_v8  ;;  %v11024_v12 = vand.u32 4294901760, %v11016_v9  ;;  %v610_v25 = vsub.f32 %v540_v21, %v11071_v22  ;;  %s9612_s11 = sld [smem:[#allocation5 + $0x1]] }
  0x2c   :  { %10126 = vmatprep.subr.mxu0 %v12517_v3  ;;  %v11091_v31 = vand.u32 4294901760, %v11086_v29  ;;  %v11100_v35 = vand.u32 4294901760, %v11094_v32  ;;  %v11117_v41 = vand.u32 4294901760, %v1010_v39  ;;  %v11137_v46 = vand.u32 4294901760, %v9606_v45  ;;  %s1478_s12 = sld [smem:[#allocation7]] }
  0x2d   :  { %v141_v13 = vand.u32 4294901760, %v140_v10  ;;  %v181_v14 = vsub.f32 %v11013_v8, %v11021_v11  ;;  %v188_v15 = vsub.f32 %v11016_v9, %v11024_v12  ;;  %v611_v28 = vand.u32 4294901760, %v610_v25  ;;  %s9613_s13 = sld [smem:[#allocation2 + $0x8]] }
  0x2e   :  { %v651_v34 = vsub.f32 %v11086_v29, %v11091_v31  ;;  %v658_v37 = vsub.f32 %v11094_v32, %v11100_v35  ;;  %v11129_v44 = vsub.f32 %v1010_v39, %v11117_v41  ;;  %v11141_v48 = vsub.f32 %v9607_v42, %v11126_v43  ;;  %s9615_s14 = sld [smem:[#allocation5 + $0x2]] }
  0x2f   :  { %v142_v16 = vsub.f32 %v140_v10, %v141_v13  ;;  %v11031_v17 = vand.u32 4294901760, %v181_v14  ;;  %v11033_v18 = vand.u32 4294901760, %v188_v15  ;;  %v612_v30 = vsub.f32 %v610_v25, %v611_v28  ;;  %s9616_s15 = sld [smem:[#allocation2 + $0x10]] }
  0x30   :  { %v11102_v36 = vand.u32 4294901760, %v651_v34  ;;  %v11115_v40 = vand.u32 4294901760, %v658_v37  ;;  %v1081_v47 = vand.u32 4294901760, %v11129_v44  ;;  %v11148_v49 = vand.u32 4294901760, %v11141_v48  ;;  %s9614_s2 = sld [smem:[#allocation7 + $0x1]] }
  0x31   :  { %v143_v19 = vand.u32 4294901760, %v142_v16  ;;  %10120 = vmatpush3.msra.mxu1 %v11031_v17  ;;  %v613_v33 = vand.u32 4294901760, %v612_v30  ;;  %v11151_v50 = vsub.f32 %v9606_v45, %v11137_v46  ;;  %v1773_v57 = vsel %vm68_vm0, %v1770_v56, 0  ;;  %s9619_s16 = sld [smem:[#allocation5 + $0x3]] }
  0x32   :  { %10121 = vmatprep.subr.mxu1 %v12517_v3  ;;  %v1082_v51 = vsub.f32 %v11129_v44, %v1081_v47  ;;  %v1121_v55 = vsub.f32 %v11141_v48, %v11148_v49  ;;  %v11180_v58 = vsub.f32 %v62_v52, %v63_v53  ;;  %v11184_v60 = vand.u32 4294901760, %v1773_v57  ;;  %s9617_s17 = sld [smem:[#allocation2 + $0x11]] }
  0x33   :  { %10117 = vmatmul.mubr.f32.vlgmr.msra.gmra.mxu0 %v143_v19  ;;  %10122 = vmatpush3.msra.mxu1 %v11033_v18  ;;  %v11169_v54 = vand.u32 4294901760, %v11151_v50  ;;  %vm1755_vm2 = vcmask 1040384   ;;  %v1475_v34 = vstv %s1474_s4  ;;  %v1483_v45 = vstv %s9612_s11  ;;  %s9620_s18 = sld [smem:[#allocation2 + $0x18]] }
  0x34   :  { %10127 = vmatpush3.msra.mxu0 %v11013_v8  ;;  %10124 = vmatmul.mubr.f32.vlgmr.msra.gmra.mxu1 %v139_v7  ;;  %v1083_v59 = vand.u32 4294901760, %v1082_v51  ;;  %v11193_v62 = vand.u32 4294901760, %v1121_v55  ;;  %v1769_v63 = vsel %vm1755_vm2, %v11180_v58, 0.0  ;;  %v11198_v0 = vsub.f32 %v1773_v57, %v11184_v60  ;;  %s9621_s19 = sld [smem:[#allocation2 + $0x19]] }
  0x35   :  { %10128 = vmatprep.subr.mxu0 %v12517_v3  ;;  %10133 = vmatprep.subr.mxu1 %v12517_v3  ;;  %v1128_v61 = vsub.f32 %v11151_v50, %v11169_v54  ;;  %v11203_v1 = vand.u32 4294901760, %v1769_v63  ;;  %v1479_v51 = vstv %s1478_s12  ;;  %v1484_v55 = vmul.f32 %v1483_v45, %v11180_v58  ;;  %s9618_s20 = sld [smem:[#allocation7 + $0x2]] }
  0x36   :  { %10129 = vmatpush3.msra.mxu0 %v11016_v9  ;;  %10130 = vmatprep.mubr.msk.f32.mxu0 %vm10940_vm1, %v12517_v3  ;;  %v1847_v6 = vand.u32 4294901760, %v11198_v0  ;;  %v1490_v57 = vstv %s9613_s13  ;;  %s9624_s21 = sld [smem:[#allocation5 + $0x4]]  ;;  %vm1757_vm3 = vcmask 1041408   ;;  %vm1759_vm4 = vcmask 1042432  }
  0x37   :  { %10134 = vmatpush3.msra.mxu1 %v11001_v4  ;;  %10131 = vmatmul.mubr.f32.vlgmr.msra.gmra.mxu0 %v140_v10  ;;  %v11208_v2 = vand.u32 4294901760, %v1128_v61  ;;  %v1486_v61 = vrot.slane %v1484_v55, 7  ;;  %s11275_s22 = sld [smem:[#allocation2 + $0x20]]  ;;  %vm1761_vm5 = vcmask 1043456   ;;  %vm1763_vm6 = vcmask 1044480  }
  0x38   :  { %10135 = vmatprep.subr.mxu1 %v12517_v3  ;;  %10140 = vmatprep.subr.mxu0 %v12517_v3  ;;  %s9622_s23 = sld [smem:[#allocation2 + $0x1a]]  ;;  %vm1765_vm7 = vcmask 1045504   ;;  %vm1767_vm8 = vcmask 1046528  }
  0x39   :  { %10136 = vmatpush3.msra.mxu1 %v11004_v5  ;;  %10137 = vmatprep.mubr.msk.f32.mxu1 %vm10940_vm1, %v12517_v3  ;;  %s11280_s24 = sld [smem:[#allocation2 + $0x21]] }
  0x3a   :  { %10141 = vmatpush3.msra.mxu0 %v11021_v11  ;;  %10138 = vmatmul.mubr.f32.vlgmr.msra.gmra.mxu1 %v141_v13  ;;  %v1848_v13 = vsub.f32 %v11198_v0, %v1847_v6  ;;  %s11283_s25 = sld [smem:[#allocation2 + $0x22]] }
  0x3b   :  { %10142 = vmatprep.subr.mxu0 %v12517_v3  ;;  %10147 = vmatprep.subr.mxu1 %v12517_v3  ;;  %s11286_s26 = sld [smem:[#allocation5 + $0x5]] }
  0x3c   :  { %10143 = vmatpush3.msra.mxu0 %v11024_v12  ;;  %10144 = vmatprep.mubr.msk.f32.mxu0 %vm10940_vm1, %v12517_v3  ;;  %v1849_v15 = vand.u32 4294901760, %v1848_v13  ;;  %s11288_s27 = sld [smem:[#allocation7 + $0x3]] }
  0x3d   :  { %10148 = vmatpush3.msra.mxu1 %v11001_v4  ;;  %10145 = vmatmul.mubr.f32.vlgmr.msra.gmra.mxu0 %v139_v7  ;;  %s11291_s28 = sld [smem:[#allocation2 + $0x28]] }
  0x3e   :  { %10149 = vmatprep.subr.mxu1 %v12517_v3  ;;  %10151 = vmatprep.mubr.msk.f32.mxu1 %vm10940_vm1, %v12517_v3  ;;  %s11297_s29 = sld [smem:[#allocation2 + $0x29]] }
  0x3f   :  { %10150 = vmatpush3.msra.mxu1 %v11004_v5  ;;  %10154 = vmatprep.subr.mxu0 %v12517_v3  ;;  %s11300_s30 = sld [smem:[#allocation2 + $0x23]] }
  0x40   :  { %10152 = vmatmul.mubr.f32.vlgmr.msra.gmra.mxu1 %v139_v7  ;;  %10158 = vmatprep.mubr.msk.f32.mxu0 %vm10940_vm1, %v12517_v3  ;;  %v11214_v7 = vsub.f32 %v1769_v63, %v11203_v1  ;;  %v1501_v63 = vstv %s9615_s14  ;;  %s11304_s5 = sld [smem:[#allocation5 + $0x6]] }
  0x41   :  { %10161 = vmatprep.subr.mxu1 %v12517_v3  ;;  %10165 = vmatprep.mubr.msk.f32.mxu1 %vm10940_vm1, %v12517_v3  ;;  %s11307_s8 = sld [smem:[#allocation2 + $0x2a]] }
  0x42   :  { %10155 = vmatpush3.msra.mxu0 %v11076_v24  ;;  %10162 = vmatpush3.msra.mxu1 %v11102_v36  ;;  %v11225_v10 = vand.u32 4294901760, %v11214_v7  ;;  %s11312_s9 = sld [smem:[#allocation2 + $0x2b]] }
  0x43   :  { %10156 = vmatprep.subr.mxu0 %v12517_v3  ;;  %10163 = vmatprep.subr.mxu1 %v12517_v3  ;;  %s11315_s1 = sld [smem:[#allocation2 + $0x30]] }
  0x44   :  { %10157 = vmatpush3.msra.mxu0 %v11083_v27  ;;  %10164 = vmatpush3.msra.mxu1 %v11115_v40  ;;  %v1897_v14 = vsub.f32 %v11214_v7, %v11225_v10  ;;  %s11317_s0 = sld [smem:[#allocation7 + $0x4]] }
  0x45   :  { %10168 = vmatprep.subr.mxu0 %v12517_v3  ;;  %10159 = vmatmul.mubr.f32.vlgmr.msra.gmra.mxu0 %v613_v33  ;;  %s11322_s10 = sld [smem:[#allocation5 + $0x7]] }
  0x46   :  { %10169 = vmatpush3.msra.mxu0 %v11086_v29  ;;  %10172 = vmatprep.mubr.msk.f32.mxu0 %vm10940_vm1, %v12517_v3  ;;  %v11251_v16 = vand.u32 4294901760, %v1897_v14  ;;  %v1508_v14 = vstv %s9616_s15  ;;  %s11326_s4 = sld [smem:[#allocation2 + $0x31]] }
  0x47   :  { %10170 = vmatprep.subr.mxu0 %v12517_v3  ;;  %10166 = vmatmul.mubr.f32.vlgmr.msra.gmra.mxu1 %v11071_v22  ;;  %s11331_s11 = sld [smem:[#allocation2 + $0x32]] }
  0x48   :  { %10171 = vmatpush3.msra.mxu0 %v11094_v32  ;;  %10175 = vmatprep.subr.mxu1 %v12517_v3  ;;  %s11334_s12 = sld [smem:[#allocation2 + $0x2c]] }
  0x49   :  { %10182 = vmatprep.subr.mxu0 %v12517_v3  ;;  %10173 = vmatmul.mubr.f32.vlgmr.msra.gmra.mxu0 %v610_v25  ;;  %s11339_s13 = sld [smem:[#allocation2 + $0x38]] }
  0x4a   :  { %10183 = vmatpush3.msra.mxu0 %v11091_v31  ;;  %10176 = vmatpush3.msra.mxu1 %v11076_v24  ;;  %s11342_s14 = sld [smem:[#allocation2 + $0x33]] }
  0x4b   :  { %10184 = vmatprep.subr.mxu0 %v12517_v3  ;;  %10177 = vmatprep.subr.mxu1 %v12517_v3  ;;  %s11348_s15 = sld [smem:[#allocation2 + $0x34]] }
  0x4c   :  { %10185 = vmatpush3.msra.mxu0 %v11100_v35  ;;  %10186 = vmatprep.mubr.msk.f32.mxu0 %vm10940_vm1, %v12517_v3 }
  0x4d   :  { %10196 = vmatprep.subr.mxu0 %v12517_v3  ;;  %10178 = vmatpush3.msra.mxu1 %v11083_v27 }
  0x4e   :  { %10179 = vmatprep.mubr.msk.f32.mxu1 %vm10940_vm1, %v12517_v3  ;;  %10187 = vmatmul.mubr.f32.vlgmr.msra.gmra.mxu0 %v11071_v22 }
  0x4f   :  { %10180 = vmatmul.mubr.f32.vlgmr.msra.gmra.mxu1 %v611_v28  ;;  %10197 = vmatpush3.msra.mxu0 %v11126_v43 }
  0x50   :  { %10189 = vmatprep.subr.mxu1 %v12517_v3  ;;  %10198 = vmatprep.subr.mxu0 %v12517_v3 }
  0x51   :  { %10190 = vmatpush3.msra.mxu1 %v11076_v24  ;;  %10199 = vmatpush3.msra.mxu0 %v11137_v46 }
  0x52   :  { %10191 = vmatprep.subr.mxu1 %v12517_v3  ;;  %10200 = vmatprep.mubr.msk.f32.mxu0 %vm10940_vm1, %v12517_v3 }
  0x53   :  { %10210 = vmatprep.subr.mxu0 %v12517_v3  ;;  %10192 = vmatpush3.msra.mxu1 %v11083_v27 }
  0x54   :  { %10193 = vmatprep.mubr.msk.f32.mxu1 %vm10940_vm1, %v12517_v3  ;;  %10201 = vmatmul.mubr.f32.vlgmr.msra.gmra.mxu0 %v1083_v59 }
  0x55   :  { %10194 = vmatmul.mubr.f32.vlgmr.msra.gmra.mxu1 %v11071_v22  ;;  %10211 = vmatpush3.msra.mxu0 %v11141_v48 }
  0x56   :  { %10203 = vmatprep.subr.mxu1 %v12517_v3  ;;  %10212 = vmatprep.subr.mxu0 %v12517_v3 }
  0x57   :  { %10204 = vmatpush3.msra.mxu1 %v11193_v62  ;;  %10213 = vmatpush3.msra.mxu0 %v11151_v50 }
  0x58   :  { %10205 = vmatprep.subr.mxu1 %v12517_v3  ;;  %10214 = vmatprep.mubr.msk.f32.mxu0 %vm10940_vm1, %v12517_v3 }
  0x59   :  { %10224 = vmatprep.subr.mxu0 %v12517_v3  ;;  %10206 = vmatpush3.msra.mxu1 %v11208_v2 }
  0x5a   :  { %10207 = vmatprep.mubr.msk.f32.mxu1 %vm10940_vm1, %v12517_v3  ;;  %10215 = vmatmul.mubr.f32.vlgmr.msra.gmra.mxu0 %v11129_v44 }
  0x5b   :  { %10208 = vmatmul.mubr.f32.vlgmr.msra.gmra.mxu1 %v11117_v41  ;;  %10225 = vmatpush3.msra.mxu0 %v11148_v49 }
  0x5c   :  { %10217 = vmatprep.subr.mxu1 %v12517_v3  ;;  %10226 = vmatprep.subr.mxu0 %v12517_v3 }
  0x5d   :  { %10218 = vmatpush3.msra.mxu1 %v11126_v43  ;;  %10227 = vmatpush3.msra.mxu0 %v11169_v54 }
  0x5e   :  { %10219 = vmatprep.subr.mxu1 %v12517_v3  ;;  %10228 = vmatprep.mubr.msk.f32.mxu0 %vm10940_vm1, %v12517_v3 }
  0x5f   :  { %10238 = vmatprep.subr.mxu0 %v11203_v1  ;;  %10220 = vmatpush3.msra.mxu1 %v11137_v46 }
  0x60   :  { %10221 = vmatprep.mubr.msk.f32.mxu1 %vm10940_vm1, %v12517_v3  ;;  %10229 = vmatmul.mubr.f32.vlgmr.msra.gmra.mxu0 %v11117_v41 }
  0x61   :  { %10222 = vmatmul.mubr.f32.vlgmr.msra.gmra.mxu1 %v1081_v47  ;;  %10239 = vmatpush3.msra.mxu0 %v11203_v1 }
  0x62   :  { %10231 = vmatprep.subr.mxu1 %v12517_v3  ;;  %10242 = vmatprep.mubr.f32.mxu0 %v1849_v15 }
  0x63   :  { %10232 = vmatpush3.msra.mxu1 %v11126_v43  ;;  %10235 = vmatprep.mubr.msk.f32.mxu1 %vm10940_vm1, %v12517_v3 }
  0x64   :  { %10233 = vmatprep.subr.mxu1 %v12517_v3 }
  0x65   :  { %10234 = vmatpush3.msra.mxu1 %v11137_v46 }
  0x66   :  { %10236 = vmatmul.mubr.f32.vlgmr.msra.gmra.mxu1 %v11117_v41  ;;  %10245 = vmatprep.subr.mxu1 %v11251_v16  ;;  %v1476_v41 = vmul.f32 %v1475_v34, %v11180_v58 }
  0x67   :  { %10246 = vmatpush3.msra.mxu1 %v11251_v16  ;;  %10249 = vmatprep.mubr.f32.mxu1 %v11184_v60 }
  0xf3   :  { %v145_v19 = vpop.f32.mrf.mxu0 }
  0xf4   :  { %v226_v21 = vpop.f32.mrf.mxu1 }
  0xf5   :  { %v10118_v20 = vpop.f32.mrf.mxu0  ;;  %v227_v22 = vadd.f32 %v226_v21, %v145_v19  ;;  %v1497_v21 = vstv %s9614_s2  ;;  %s11352_s2 = sld [smem:[#allocation2 + $0x39]] }
  0xf6   :  { %v10125_v23 = vpop.f32.mrf.mxu1  ;;  %v1502_v20 = vmul.f32 %v1501_v63, %v11180_v58 }
  0xf7   :  { %v302_v25 = vpop.f32.mrf.mxu0 }
  0xf8   :  { %v303_v26 = vadd.f32 %v302_v25, %v227_v22 }
  0xf9   :  { %v10132_v28 = vpop.f32.mrf.mxu0 }
  0xfa   :  { %v377_v30 = vpop.f32.mrf.mxu1  ;;  %v1515_v28 = vstv %s9617_s17  ;;  %s11361_s17 = sld [smem:[#allocation2 + $0x3a]] }
  0xfb   :  { %v378_v33 = vadd.f32 %v377_v30, %v303_v26  ;;  %v1504_v26 = vrot.slane %v1502_v20, 6  ;;  %v1526_v30 = vstv %s9619_s16  ;;  %s11354_s16 = sld [smem:[#allocation7 + $0x5]] }
  0xfc   :  { %v10139_v37 = vpop.f32.mrf.mxu1 }
  0xfd   :  { %v454_v38 = vpop.f32.mrf.mxu0  ;;  %v1533_v37 = vstv %s9620_s18  ;;  %s11366_s18 = sld [smem:[#allocation2 + $0x3b]] }
  0xfe   :  { %v455_v39 = vadd.f32 %v454_v38, %v378_v33 }
  0xff   :  { %v10146_v42 = vpop.f32.mrf.mxu0 }
 0x100   :  { %v527_v44 = vpop.f32.mrf.mxu1  ;;  %v1540_v42 = vstv %s9621_s19  ;;  %s11369_s19 = sld [smem:[#allocation2 + $0x35]] }
 0x101   :  { %v11263_v47 = vadd.f32 %v527_v44, %v455_v39 }
 0x102   :  { %v10153_v52 = vpop.f32.mrf.mxu1 }
 0x103   :  { %v1477_v53 = vadd.f32 %v1476_v41, %v11263_v47  ;;  %v1488_v15 = vadd.f32 %v1486_v61, %v11263_v47  ;;  %v1506_v38 = vadd.f32 %v1504_v26, %v11263_v47  ;;  %v1527_v41 = vmul.f32 %v1526_v30, %v11180_v58 }
 0x104   :  { %v1522_v52 = vstv %s9618_s20  ;;  %s11377_s20 = sld [smem:[#allocation2 + $0x3c]] }
 0x105   :  { %v1480_v56 = vmul.f32 %v1479_v51, %v1477_v53  ;;  %v1529_v55 = vrot.slane %v1527_v41, 5  ;;  %v1597_v41 = vstv %s11286_s26  ;;  %s9653_s26 = sld [smem:[#allocation7 + $0x7]] }
 0x107   :  { %v11267_v59 = vmax.f32 %v1480_v56, 0.0 }
 0x109   :  { %v1491_v13 = vmul.f32 %v1490_v57, %v11267_v59  ;;  %v1509_v23 = vmul.f32 %v1508_v14, %v11267_v59  ;;  %v1534_v51 = vmul.f32 %v1533_v37, %v11267_v59  ;;  %v1558_v57 = vstv %s9624_s21  ;;  %s11383_s21 = sld [smem:[#allocation2 + $0x3d]] }
 0x10a   :  { %v1565_v14 = vstv %s11275_s22  ;;  %s11386_s22 = sld [smem:[#allocation7 + $0x6]] }
 0x10b   :  { %v1493_v19 = vrot.slane %v1491_v13, 7  ;;  %v1511_v34 = vrot.slane %v1509_v23, 6  ;;  %v1536_v63 = vrot.slane %v1534_v51, 5  ;;  %v1547_v13 = vstv %s9622_s23  ;;  %s11689_s23 = sld [smem:[#allocation2 + $0x99]] }
 0x10c   :  { %v1566_v26 = vmul.f32 %v1565_v14, %v11267_v59  ;;  %v1604_v51 = vstv %s11291_s28  ;;  %s11718_s28 = sld [smem:[#allocation2 + $0xa1]] }
 0x10d   :  { %v1495_v22 = vadd.f32 %v1493_v19, %v1488_v15  ;;  %v1513_v44 = vadd.f32 %v1511_v34, %v1506_v38  ;;  %v1531_v19 = vadd.f32 %v1529_v55, %v11263_v47 }
 0x10f   :  { %v1498_v25 = vmul.f32 %v1497_v21, %v1495_v22  ;;  %v1559_v21 = vmul.f32 %v1558_v57, %v11180_v58  ;;  %v1572_v22 = vstv %s11280_s24  ;;  %v1538_v23 = vadd.f32 %v1536_v63, %v1531_v19  ;;  %s11695_s24 = sld [smem:[#allocation7 + $0x82]] }
 0x110   :  { %v1586_v57 = vstv %s11300_s30  ;;  %v1605_v19 = vmul.f32 %v1604_v51, %v11267_v59  ;;  %s11728_s30 = sld [smem:[#allocation5 + $0x85]] }
 0x111   :  { %v11273_v33 = vmax.f32 %v1498_v25, 0.0  ;;  %v1561_v37 = vrot.slane %v1559_v21, 4  ;;  %v1643_v21 = vstv %s11304_s5  ;;  %s11730_s5 = sld [smem:[#allocation7 + $0x83]] }
 0x113   :  { %v1516_v39 = vmul.f32 %v1515_v28, %v11273_v33  ;;  %v1541_v56 = vmul.f32 %v1540_v42, %v11273_v33  ;;  %v1579_v28 = vstv %s11283_s25  ;;  %v1573_v38 = vmul.f32 %v1572_v22, %v11273_v33  ;;  %s9652_s25 = sld [smem:[#allocation2 + $0x3e]] }
 0x115   :  { %v1518_v45 = vrot.slane %v1516_v39, 7  ;;  %v1543_v20 = vrot.slane %v1541_v56, 6  ;;  %v1554_v39 = vstv %s11288_s27  ;;  %v1575_v55 = vrot.slane %v1573_v38, 5  ;;  %s11710_s27 = sld [smem:[#allocation2 + $0x9a]] }
 0x116   :  { %v1598_v56 = vmul.f32 %v1597_v41, %v11180_v58  ;;  %v1644_v41 = vmul.f32 %v1643_v21, %v11180_v58 }
 0x117   :  { %v1520_v53 = vadd.f32 %v1518_v45, %v1513_v44  ;;  %v1545_v30 = vadd.f32 %v1543_v20, %v1538_v23  ;;  %v1568_v44 = vrot.slane %v1566_v26, 4  ;;  %v1618_v20 = vstv %s11307_s8  ;;  %s11735_s8 = sld [smem:[#allocation2 + $0xa8]] }
 0x119   :  { %v1523_v61 = vmul.f32 %v1522_v52, %v1520_v53  ;;  %v1563_v53 = vadd.f32 %v1561_v37, %v11263_v47  ;;  %v1607_v37 = vrot.slane %v1605_v19, 3  ;;  %v1664_v19 = vstv %s11331_s11  ;;  %s11760_s11 = sld [smem:[#allocation2 + $0xab]] }
 0x11b   :  { %v11293_v15 = vmax.f32 %v1523_v61, 0.0  ;;  %v1611_v61 = vstv %s11297_s29  ;;  %s11725_s29 = sld [smem:[#allocation2 + $0xa2]] }
 0x11c   :  { %v1612_v26 = vmul.f32 %v1611_v61, %v11273_v33 }
 0x11d   :  { %v1548_v25 = vmul.f32 %v1547_v13, %v11293_v15  ;;  %v1580_v45 = vmul.f32 %v1579_v28, %v11293_v15  ;;  %v1570_v13 = vadd.f32 %v1568_v44, %v1563_v53  ;;  %v1625_v28 = vstv %s11312_s9  ;;  %s11741_s9 = sld [smem:[#allocation2 + $0xa9]] }
 0x11e   :  { %v1619_v38 = vmul.f32 %v1618_v20, %v11293_v15  ;;  %v1614_v51 = vrot.slane %v1612_v26, 4  ;;  %v1657_v53 = vstv %s11326_s4  ;;  %v1696_v20 = vstv %s11322_s10  ;;  %s11751_s10 = sld [smem:[#allocation2 + $0xaa]] }
 0x11f   :  { %v1550_v34 = vrot.slane %v1548_v25, 7  ;;  %v1582_v14 = vrot.slane %v1580_v45, 6  ;;  %v1577_v22 = vadd.f32 %v1575_v55, %v1570_v13  ;;  %v1600_v25 = vrot.slane %v1598_v56, 3  ;;  %s11756_s4 = sld [smem:[#allocation2 + $0xb0]] }
 0x120   :  { %v1632_v13 = vstv %s11334_s12  ;;  %v1671_v26 = vstv %s11342_s14  ;;  %s9654_s14 = sld [smem:[#allocation5 + $0x80]] }
 0x121   :  { %v1552_v42 = vadd.f32 %v1550_v34, %v1545_v30  ;;  %v1584_v30 = vadd.f32 %v1582_v14, %v1577_v22  ;;  %v1602_v45 = vadd.f32 %v1600_v25, %v11263_v47  ;;  %v1646_v14 = vrot.slane %v1644_v41, 2  ;;  %s11763_s12 = sld [smem:[#allocation7 + $0x84]] }
 0x122   :  { %v1658_v25 = vmul.f32 %v1657_v53, %v11273_v33  ;;  %v1678_v41 = vstv %s11348_s15  ;;  %v1639_v53 = vstv %s11354_s16  ;;  %s9656_s15 = sld [smem:[#allocation5 + $0x81]] }
 0x123   :  { %v1555_v52 = vmul.f32 %v1554_v39, %v1552_v42  ;;  %v1593_v39 = vstv %s11317_s0  ;;  %v1650_v42 = vstv %s11315_s1  ;;  %v1609_v56 = vadd.f32 %v1607_v37, %v1602_v45  ;;  %s9657_s16 = sld [smem:[#allocation2 + $0x88]] }
 0x124   :  { %v1651_v61 = vmul.f32 %v1650_v42, %v11267_v59  ;;  %v1697_v42 = vmul.f32 %v1696_v20, %v11180_v58  ;;  %s11744_s1 = sld [smem:[#allocation2 + $0xa3]] }
 0x125   :  { %v11328_v63 = vmax.f32 %v1555_v52, 0.0  ;;  %v1616_v22 = vadd.f32 %v1614_v51, %v1609_v56  ;;  %v1660_v51 = vrot.slane %v1658_v25, 3  ;;  %v1710_v56 = vstv %s11352_s2  ;;  %s9655_s2 = sld [smem:[#allocation7 + $0x80]] }
 0x126   :  { %v1653_v37 = vrot.slane %v1651_v61, 2  ;;  %v1711_v25 = vmul.f32 %v1710_v56, %v11273_v33  ;;  %v1738_v56 = vstv %s11383_s21  ;;  %s11675_s21 = sld [smem:[#allocation2 + $0x91]] }
 0x127   :  { %v1587_v23 = vmul.f32 %v1586_v57, %v11328_v63  ;;  %v1626_v52 = vmul.f32 %v1625_v28, %v11328_v63  ;;  %v1621_v57 = vrot.slane %v1619_v38, 5  ;;  %v1703_v28 = vstv %s11339_s13  ;;  %s11748_s0 = sld [smem:[#allocation5 + $0x86]] }
 0x128   :  { %v1665_v38 = vmul.f32 %v1664_v19, %v11293_v15  ;;  %v1717_v19 = vstv %s11361_s17  ;;  %s9659_s17 = sld [smem:[#allocation5 + $0x82]] }
 0x129   :  { %v1589_v34 = vrot.slane %v1587_v23, 7  ;;  %v1628_v23 = vrot.slane %v1626_v52, 6  ;;  %v1672_v52 = vmul.f32 %v1671_v26, %v11328_v63  ;;  %v1685_v26 = vstv %s11369_s19  ;;  %s9658_s19 = sld [smem:[#allocation7 + $0x81]] }
 0x12a   :  { %s11768_s13 = sld [smem:[#allocation5 + $0x87]] }
 0x12b   :  { %v1591_v44 = vadd.f32 %v1589_v34, %v1584_v30  ;;  %v1623_v30 = vadd.f32 %v1621_v57, %v1616_v22 }
 0x12d   :  { %v1594_v55 = vmul.f32 %v1593_v39, %v1591_v44  ;;  %v1648_v39 = vadd.f32 %v1646_v14, %v11263_v47  ;;  %v1630_v44 = vadd.f32 %v1628_v23, %v1623_v30  ;;  %v1699_v14 = vrot.slane %v1697_v42, 1 }
 0x12e   :  { %v1674_v23 = vrot.slane %v1672_v52, 5  ;;  %v1724_v30 = vstv %s11366_s18  ;;  %v1731_v42 = vstv %s11377_s20  ;;  %v1713_v52 = vrot.slane %v1711_v25, 2  ;;  %s9660_s18 = sld [smem:[#allocation2 + $0x90]] }
 0x12f   :  { %v11363_v21 = vmax.f32 %v1594_v55, 0.0  ;;  %v1704_v55 = vmul.f32 %v1703_v28, %v11267_v59  ;;  %v1655_v61 = vadd.f32 %v1653_v37, %v1648_v39  ;;  %v1771_v39 = vld [vmem:[%s12512_s3 + $0x28] sm:$0xff]  ;;  %s11671_s20 = sld [smem:[#allocation5 + $0x83]] }
 0x131   :  { %v1633_v34 = vmul.f32 %v1632_v13, %v11363_v21  ;;  %v1667_v13 = vrot.slane %v1665_v38, 4  ;;  %v1679_v58 = vmul.f32 %v1678_v41, %v11363_v21  ;;  %v1662_v22 = vadd.f32 %v1660_v51, %v1655_v61 }
 0x132   :  { %v1706_v28 = vrot.slane %v1704_v55, 1  ;;  %v1718_v38 = vmul.f32 %v1717_v19, %v11293_v15  ;;  %v1701_v41 = vadd.f32 %v1699_v14, %v11263_v47  ;;  %v1732_v19 = vmul.f32 %v1731_v42, %v11363_v21 }
 0x133   :  { %v1635_v45 = vrot.slane %v1633_v34, 7  ;;  %v1681_v37 = vrot.slane %v1679_v58, 6 }
 0x134   :  { %v1708_v55 = vadd.f32 %v1706_v28, %v1701_v41  ;;  %v1720_v58 = vrot.slane %v1718_v38, 3  ;;  %v1745_v28 = vstv %s9652_s25  ;;  %s11701_s25 = sld [smem:[#allocation5 + $0x84]] }
 0x135   :  { %v1637_v57 = vadd.f32 %v1635_v45, %v1630_v44  ;;  %v1669_v44 = vadd.f32 %v1667_v13, %v1662_v22 }
 0x136   :  { %v1715_v3 = vadd.f32 %v1713_v52, %v1708_v55  ;;  %v1752_v52 = vstv %s9653_s26  ;;  %s11707_s26 = sld [smem:[#allocation2 + $0xa0]] }
 0x137   :  { %v1640_v20 = vmul.f32 %v1639_v53, %v1637_v57  ;;  %v1676_v45 = vadd.f32 %v1674_v23, %v1669_v44  ;;  %v1725_v53 = vmul.f32 %v1724_v30, %v11328_v63  ;;  %v1776_v57 = vsel %vm68_vm0, %v1771_v39, 0 }
 0x138   :  { %v11403_v23 = vand.u32 4294901760, %v1776_v57  ;;  %v1734_v30 = vrot.slane %v1732_v19, 5 }
 0x139   :  { %v1641_v34 = vmax.f32 %v1640_v20, 0.0  ;;  %v1683_v61 = vadd.f32 %v1681_v37, %v1676_v45  ;;  %v1692_v20 = vstv %s11386_s22  ;;  %v1727_v47 = vrot.slane %v1725_v53, 4  ;;  %s11680_s22 = sld [smem:[#allocation2 + $0x98]] }
 0x13a   :  { %v11406_v37 = vsub.f32 %v1776_v57, %v11403_v23  ;;  %v531_v57 = vld [vmem:[%s12512_s3 + $0x10] sm:$0xff] }
 0x13b   :  { %v1686_v51 = vmul.f32 %v1685_v26, %v1641_v34  ;;  %v1739_v14 = vmul.f32 %v1738_v56, %v1641_v34  ;;  %v1722_v26 = vadd.f32 %v1720_v58, %v1715_v3  ;;  %v1756_v3 = vsel %vm1755_vm2, %v11267_v59, %v11273_v33  ;;  %v532_v58 = vld [vmem:[%s12512_s3 + $0x18] sm:$0xff] }
 0x13c   :  { %v1857_v53 = vand.u32 4294901760, %v11406_v37  ;;  %v1758_v56 = vsel %vm1757_vm3, %v1756_v3, %v11293_v15 }
 0x13d   :  { %v1688_v13 = vrot.slane %v1686_v51, 7  ;;  %v1729_v41 = vadd.f32 %v1727_v47, %v1722_v26  ;;  %v1741_v39 = vrot.slane %v1739_v14, 6 }
 0x13e   :  { %v1858_v33 = vsub.f32 %v11406_v37, %v1857_v53 }
 0x13f   :  { %v1690_v22 = vadd.f32 %v1688_v13, %v1683_v61  ;;  %v1736_v38 = vadd.f32 %v1734_v30, %v1729_v41  ;;  %v1760_v13 = vsel %vm1759_vm4, %v1758_v56, %v11328_v63  ;;  %v2284_v63 = vsel %vm68_vm0, %v532_v58, 0 }
 0x140   :  { %v1762_v59 = vsel %vm1761_vm5, %v1760_v13, %v11363_v21  ;;  %v11434_v21 = vand.u32 4294901760, %v2284_v63 }
 0x141   :  { %v1693_v25 = vmul.f32 %v1692_v20, %v1690_v22  ;;  %v1743_v45 = vadd.f32 %v1741_v39, %v1736_v38  ;;  %v1764_v19 = vsel %vm1763_vm6, %v1762_v59, %v1641_v34  ;;  %v2281_v20 = vsel %vm68_vm0, %v531_v57, 0 }
 0x142   :  { %v11432_v26 = vand.u32 4294901760, %v2281_v20 }
 0x143   :  { %v1694_v44 = vmax.f32 %v1693_v25, 0.0  ;;  %v1859_v25 = vand.u32 4294901760, %v1858_v33 }
 0x145   :  { %v1746_v42 = vmul.f32 %v1745_v28, %v1694_v44  ;;  %v1766_v22 = vsel %vm1765_vm7, %v1764_v19, %v1694_v44  ;;  %v2354_v28 = vsub.f32 %v2281_v20, %v11432_v26  ;;  %v2364_v44 = vsub.f32 %v2284_v63, %v11434_v21 }
 0x147   :  { %v1748_v51 = vrot.slane %v1746_v42, 7  ;;  %v2355_v38 = vand.u32 4294901760, %v2354_v28  ;;  %v2365_v42 = vand.u32 4294901760, %v2364_v44 }
 0x149   :  { %v1750_v55 = vadd.f32 %v1748_v51, %v1743_v45  ;;  %v2366_v45 = vsub.f32 %v2364_v44, %v2365_v42 }
 0x14b   :  { %v1753_v61 = vmul.f32 %v1752_v52, %v1750_v55  ;;  %v2367_v52 = vand.u32 4294901760, %v2366_v45 }
 0x14d   :  { %v1754_v15 = vmax.f32 %v1753_v61, 0.0 }
 0x14f   :  { %v1768_v47 = vsel %vm1767_vm8, %v1766_v22, %v1754_v15 }
 0x150   :  { %v11430_v14 = vand.u32 4294901760, %v1768_v47 }
 0x152   :  { %10240 = vmatprep.subr.mxu0 %v11430_v14  ;;  %v11438_v30 = vsub.f32 %v1768_v47, %v11430_v14 }
 0x153   :  { %10241 = vmatpush3.msra.mxu0 %v11430_v14 }
 0x154   :  { %10252 = vmatprep.subr.mxu0 %v11214_v7  ;;  %10243 = vmatmul.mubr.f32.vlgmr.msra.gmra.mxu0 %v1859_v25  ;;  %v11443_v34 = vand.u32 4294901760, %v11438_v30 }
 0x155   :  { %10253 = vmatpush3.msra.mxu0 %v11214_v7  ;;  %10256 = vmatprep.mubr.f32.mxu0 %v11198_v0  ;;  %v615_v0 = vpop.f32.mrf.mxu0 }
 0x156   :  { %10254 = vmatprep.subr.mxu0 %v11438_v30  ;;  %v1904_v41 = vsub.f32 %v11438_v30, %v11443_v34 }
 0x157   :  { %10255 = vmatpush3.msra.mxu0 %v11438_v30 }
 0x158   :  { %10266 = vmatprep.subr.mxu0 %v11225_v10  ;;  %10257 = vmatmul.mubr.f32.vlgmr.msra.gmra.mxu0 %v11406_v37  ;;  %v11455_v39 = vand.u32 4294901760, %v1904_v41  ;;  %v2356_v37 = vsub.f32 %v2354_v28, %v2355_v38 }
 0x159   :  { %10267 = vmatpush3.msra.mxu0 %v11225_v10  ;;  %10270 = vmatprep.mubr.f32.mxu0 %v11184_v60 }
 0x15a   :  { %10247 = vmatprep.subr.mxu1 %v11455_v39  ;;  %10268 = vmatprep.subr.mxu0 %v11443_v34  ;;  %v2357_v51 = vand.u32 4294901760, %v2356_v37 }
 0x15b   :  { %10248 = vmatpush3.msra.mxu1 %v11455_v39  ;;  %10269 = vmatpush3.msra.mxu0 %v11443_v34 }
 0x15c   :  { %10250 = vmatmul.mubr.f32.vlgmr.msra.gmra.mxu1 %v11403_v23  ;;  %10259 = vmatprep.subr.mxu1 %v11203_v1 }
 0x15d   :  { %10260 = vmatpush3.msra.mxu1 %v11203_v1  ;;  %10263 = vmatprep.mubr.f32.mxu1 %v1847_v6  ;;  %v10160_v6 = vpop.f32.mrf.mxu0 }
 0x15e   :  { %10261 = vmatprep.subr.mxu1 %v11430_v14  ;;  %10271 = vmatmul.mubr.f32.vlgmr.msra.gmra.mxu0 %v11403_v23 }
 0x15f   :  { %10262 = vmatpush3.msra.mxu1 %v11430_v14  ;;  %10280 = vmatprep.subr.mxu0 %v11001_v4 }
 0x160   :  { %10264 = vmatmul.mubr.f32.vlgmr.msra.gmra.mxu1 %v1857_v53  ;;  %10273 = vmatprep.subr.mxu1 %v11203_v1  ;;  %v772_v53 = vpop.f32.mrf.mxu0 }
 0x161   :  { %10274 = vmatpush3.msra.mxu1 %v11203_v1  ;;  %10281 = vmatpush3.msra.mxu0 %v11001_v4 }
 0x162   :  { %10275 = vmatprep.subr.mxu1 %v11430_v14  ;;  %10282 = vmatprep.subr.mxu0 %v11004_v5  ;;  %v10174_v56 = vpop.f32.mrf.mxu0 }
 0x163   :  { %10276 = vmatpush3.msra.mxu1 %v11430_v14  ;;  %10277 = vmatprep.mubr.f32.mxu1 %v11184_v60  ;;  %v12519_v60 = vmov 0.0  }
 0x164   :  { %10283 = vmatpush3.msra.mxu0 %v11004_v5  ;;  %10284 = vmatprep.mubr.f32.mxu0 %v2357_v51  ;;  %v924_v13 = vpop.f32.mrf.mxu0 }
 0x165   :  { %10278 = vmatmul.mubr.f32.vlgmr.msra.gmra.mxu1 %v11403_v23  ;;  %10285 = vmatmul.mubr.f32.vlgmr.msra.gmra.mxu0 %v2367_v52  ;;  %v696_v23 = vpop.f32.mrf.mxu1 }
 0x166   :  { %10287 = vmatprep.subr.mxu1 %v11031_v17  ;;  %10294 = vmatprep.subr.mxu0 %v11013_v8  ;;  %v697_v55 = vadd.f32 %v696_v23, %v615_v0  ;;  %v10188_v33 = vpop.f32.mrf.mxu0 }
 0x167   :  { %10288 = vmatpush3.msra.mxu1 %v11031_v17  ;;  %10295 = vmatpush3.msra.mxu0 %v11013_v8  ;;  %v10167_v3 = vpop.f32.mrf.mxu1 }
 0x168   :  { %10289 = vmatprep.subr.mxu1 %v11033_v18  ;;  %10296 = vmatprep.subr.mxu0 %v11016_v9  ;;  %v773_v57 = vadd.f32 %v772_v53, %v697_v55  ;;  %v1085_v20 = vpop.f32.mrf.mxu0 }
 0x169   :  { %10290 = vmatpush3.msra.mxu1 %v11033_v18  ;;  %10291 = vmatprep.mubr.f32.mxu1 %v11432_v26  ;;  %v847_v61 = vpop.f32.mrf.mxu1 }
 0x16a   :  { %10297 = vmatpush3.msra.mxu0 %v11016_v9  ;;  %10298 = vmatprep.mubr.f32.mxu0 %v2354_v28  ;;  %v848_v58 = vadd.f32 %v847_v61, %v773_v57  ;;  %v10202_v47 = vpop.f32.mrf.mxu0 }
 0x16b   :  { %10292 = vmatmul.mubr.f32.vlgmr.msra.gmra.mxu1 %v11434_v21  ;;  %10299 = vmatmul.mubr.f32.vlgmr.msra.gmra.mxu0 %v2364_v44  ;;  %v10181_v59 = vpop.f32.mrf.mxu1 }
 0x16c   :  { %10301 = vmatprep.subr.mxu1 %v11001_v4  ;;  %10308 = vmatprep.subr.mxu0 %v11021_v11  ;;  %v925_v15 = vadd.f32 %v924_v13, %v848_v58 }
 0x16d   :  { %10302 = vmatpush3.msra.mxu1 %v11001_v4  ;;  %10309 = vmatpush3.msra.mxu0 %v11021_v11  ;;  %v997_v19 = vpop.f32.mrf.mxu1 }
 0x16e   :  { %10303 = vmatprep.subr.mxu1 %v11004_v5  ;;  %10310 = vmatprep.subr.mxu0 %v11024_v12  ;;  %v11513_v22 = vadd.f32 %v997_v19, %v925_v15 }
 0x16f   :  { %10304 = vmatpush3.msra.mxu1 %v11004_v5  ;;  %10305 = vmatprep.mubr.f32.mxu1 %v2355_v38  ;;  %v10195_v63 = vpop.f32.mrf.mxu1 }
 0x170   :  { %10311 = vmatpush3.msra.mxu0 %v11024_v12  ;;  %10312 = vmatprep.mubr.f32.mxu0 %v11432_v26 }
 0x171   :  { %10306 = vmatmul.mubr.f32.vlgmr.msra.gmra.mxu1 %v2365_v42  ;;  %10313 = vmatmul.mubr.f32.vlgmr.msra.gmra.mxu0 %v11434_v21  ;;  %v1166_v25 = vpop.f32.mrf.mxu1 }
 0x172   :  { %10315 = vmatprep.subr.mxu1 %v11001_v4  ;;  %10319 = vmatprep.mubr.f32.mxu1 %v11432_v26  ;;  %v1242_v26 = vpop.f32.mrf.mxu0 }
 0x173   :  { %10316 = vmatpush3.msra.mxu1 %v11001_v4  ;;  %10322 = vmatprep.subr.mxu0 %v12519_v60  ;;  %v10209_v28 = vpop.f32.mrf.mxu1 }
 0x174   :  { %10317 = vmatprep.subr.mxu1 %v11004_v5  ;;  %10326 = vmatprep.mubr.msk.f32.mxu0 %vm10940_vm1, %v12519_v60  ;;  %v10216_v44 = vpop.f32.mrf.mxu0 }
 0x175   :  { %10318 = vmatpush3.msra.mxu1 %v11004_v5  ;;  %v1317_v38 = vpop.f32.mrf.mxu1 }
 0x176   :  { %10320 = vmatmul.mubr.f32.vlgmr.msra.gmra.mxu1 %v11434_v21  ;;  %10329 = vmatprep.subr.mxu1 %v12519_v60  ;;  %v1167_v21 = vadd.f32 %v1166_v25, %v1085_v20  ;;  %v1394_v42 = vpop.f32.mrf.mxu0 }
 0x177   :  { %10333 = vmatprep.mubr.msk.f32.mxu1 %vm10940_vm1, %v12519_v60  ;;  %v10223_v45 = vpop.f32.mrf.mxu1 }
 0x178   :  { %v1243_v41 = vadd.f32 %v1242_v26, %v1167_v21  ;;  %v10230_v51 = vpop.f32.mrf.mxu0  ;;  %v2788_v21 = vld [vmem:[%s12512_s3 + $0x30] sm:$0xff] }
 0x179   :  { %v1467_v0 = vpop.f32.mrf.mxu1  ;;  %v2790_v45 = vsel %vm68_vm0, %v2788_v21, 0 }
 0x17a   :  { %v1318_v37 = vadd.f32 %v1317_v38, %v1243_v41 }
 0x17b   :  { %v10237_v23 = vpop.f32.mrf.mxu1 }
 0x17c   :  { %v1395_v52 = vadd.f32 %v1394_v42, %v1318_v37  ;;  %v11521_v23 = vand.u32 4294901760, %v2790_v45 }
 0x17e   :  { %v11515_v6 = vadd.f32 %v1467_v0, %v1395_v52 }
 0x214   :  { %v10244_v53 = vpop.f32.mrf.mxu0 }
 0x216   :  { %v1851_v55 = vpop.f32.mrf.mxu0 }
 0x218   :  { %v10258_v3 = vpop.f32.mrf.mxu0 }
 0x21a   :  { %v2024_v56 = vpop.f32.mrf.mxu0 }
 0x21c   :  { %v10251_v57 = vpop.f32.mrf.mxu1 }
 0x21d   :  { %v1949_v61 = vadd.f32 %v10251_v57, %v10244_v53 }
 0x21e   :  { %v1942_v13 = vpop.f32.mrf.mxu1  ;;  %v10272_v58 = vpop.f32.mrf.mxu0 }
 0x21f   :  { %v2032_v59 = vadd.f32 %v10258_v3, %v1949_v61  ;;  %v1943_v33 = vadd.f32 %v1942_v13, %v1851_v55 }
 0x220   :  { %v10265_v15 = vpop.f32.mrf.mxu1  ;;  %v2191_v63 = vpop.f32.mrf.mxu0 }
 0x221   :  { %v2025_v19 = vadd.f32 %v2024_v56, %v1943_v33  ;;  %v2115_v20 = vadd.f32 %v10265_v15, %v2032_v59 }
 0x222   :  { %v2106_v47 = vpop.f32.mrf.mxu1 }
 0x223   :  { %v2198_v25 = vadd.f32 %v10272_v58, %v2115_v20  ;;  %v2107_v26 = vadd.f32 %v2106_v47, %v2025_v19  ;;  %v11524_v58 = vsub.f32 %v2790_v45, %v11521_v23 }
 0x225   :  { %v2192_v28 = vadd.f32 %v2191_v63, %v2107_v26  ;;  %v10279_v44 = vpop.f32.mrf.mxu1  ;;  %v10286_v41 = vpop.f32.mrf.mxu0  ;;  %v2861_v20 = vand.u32 4294901760, %v11524_v58  ;;  %v3251_v26 = vld [vmem:[%s12512_s3 + $0x41] sm:$0x1] }
 0x226   :  { %v2277_v38 = vadd.f32 %v10279_v44, %v2198_v25 }
 0x227   :  { %v2270_v42 = vpop.f32.mrf.mxu1  ;;  %v2359_v37 = vpop.f32.mrf.mxu0 }
 0x228   :  { %v2370_v51 = vadd.f32 %v10286_v41, %v2277_v38  ;;  %v2271_v52 = vadd.f32 %v2270_v42, %v2192_v28  ;;  %v2862_v41 = vsub.f32 %v11524_v58, %v2861_v20  ;;  %v3253_v42 = vsel %vm68_vm0, %v3251_v26, 0 }
 0x22a   :  { %v2360_v0 = vadd.f32 %v2359_v37, %v2271_v52  ;;  %v2863_v52 = vand.u32 4294901760, %v2862_v41 }
 0x22b   :  { %v10293_v53 = vpop.f32.mrf.mxu1  ;;  %v10300_v55 = vpop.f32.mrf.mxu0 }
 0x22c   :  { %v2457_v3 = vadd.f32 %v10293_v53, %v2370_v51 }
 0x22d   :  { %v2450_v56 = vpop.f32.mrf.mxu1  ;;  %v2532_v57 = vpop.f32.mrf.mxu0 }
 0x22e   :  { %v2540_v61 = vadd.f32 %v10300_v55, %v2457_v3  ;;  %v2451_v13 = vadd.f32 %v2450_v56, %v2360_v0  ;;  %v11532_v0 = vand.u32 4294901760, %v3253_v42 }
 0x230   :  { %v2533_v59 = vadd.f32 %v2532_v57, %v2451_v13  ;;  %v11537_v57 = vsub.f32 %v3253_v42, %v11532_v0 }
 0x231   :  { %v10307_v33 = vpop.f32.mrf.mxu1  ;;  %v10314_v15 = vpop.f32.mrf.mxu0 }
 0x232   :  { %v2623_v19 = vadd.f32 %v10307_v33, %v2540_v61 }
 0x233   :  { %v2614_v63 = vpop.f32.mrf.mxu1  ;;  %v2699_v21 = vpop.f32.mrf.mxu0 }
 0x234   :  { %v2706_v47 = vadd.f32 %v10314_v15, %v2623_v19  ;;  %v2615_v25 = vadd.f32 %v2614_v63, %v2533_v59  ;;  %v3324_v15 = vand.u32 4294901760, %v11537_v57 }
 0x236   :  { %v2700_v28 = vadd.f32 %v2699_v21, %v2615_v25  ;;  %v10321_v44 = vpop.f32.mrf.mxu1  ;;  %v3325_v63 = vsub.f32 %v11537_v57, %v3324_v15 }
 0x237   :  { %v2785_v38 = vadd.f32 %v10321_v44, %v2706_v47 }
 0x238   :  { %v2778_v37 = vpop.f32.mrf.mxu1  ;;  %v3326_v47 = vand.u32 4294901760, %v3325_v63 }
 0x239   :  { %v2821_v45 = vand.u32 4294901760, %v2785_v38  ;;  %v2779_v51 = vadd.f32 %v2778_v37, %v2700_v28 }
 0x23b   :  { %v2899_v53 = vsub.f32 %v2785_v38, %v2821_v45  ;;  %v2824_v55 = vand.u32 4294901760, %v2779_v51  ;;  %10323 = vmatpush3.msra.mxu0 %v2821_v45 }
 0x23c   :  { %10324 = vmatprep.subr.mxu0 %v12519_v60 }
 0x23d   :  { %v2900_v3 = vand.u32 4294901760, %v2899_v53  ;;  %v2906_v56 = vsub.f32 %v2779_v51, %v2824_v55  ;;  %10325 = vmatpush3.msra.mxu0 %v2824_v55 }
 0x23e   :  { %10336 = vmatprep.subr.mxu0 %v12519_v60  ;;  %10327 = vmatmul.mubr.f32.vlgmr.msra.gmra.mxu0 %v2863_v52 }
 0x23f   :  { %v2901_v61 = vsub.f32 %v2899_v53, %v2900_v3  ;;  %v2907_v13 = vand.u32 4294901760, %v2906_v56  ;;  %10337 = vmatpush3.msra.mxu0 %v2899_v53  ;;  %10340 = vmatprep.mubr.msk.f32.mxu0 %vm10940_vm1, %v12519_v60 }
 0x240   :  { %10338 = vmatprep.subr.mxu0 %v12519_v60 }
 0x241   :  { %v2908_v59 = vsub.f32 %v2906_v56, %v2907_v13  ;;  %10339 = vmatpush3.msra.mxu0 %v2906_v56  ;;  %v2902_v33 = vand.u32 4294901760, %v2901_v61 }
 0x242   :  { %10350 = vmatprep.subr.mxu0 %v12519_v60  ;;  %10341 = vmatmul.mubr.f32.vlgmr.msra.gmra.mxu0 %v11524_v58  ;;  %v533_v58 = vld [vmem:[%s12512_s3 + $0x40] sm:$0x1] }
 0x243   :  { %10330 = vmatpush3.msra.mxu1 %v2902_v33  ;;  %10351 = vmatpush3.msra.mxu0 %v2900_v3  ;;  %v2909_v19 = vand.u32 4294901760, %v2908_v59  ;;  %v3715_v25 = vsel %vm68_vm0, %v533_v58, 0 }
 0x244   :  { %10331 = vmatprep.subr.mxu1 %v12519_v60  ;;  %10352 = vmatprep.subr.mxu0 %v12519_v60  ;;  %v11568_v26 = vand.u32 4294901760, %v3715_v25 }
 0x245   :  { %10332 = vmatpush3.msra.mxu1 %v2909_v19  ;;  %10353 = vmatpush3.msra.mxu0 %v2907_v13 }
 0x246   :  { %10334 = vmatmul.mubr.f32.vlgmr.msra.gmra.mxu1 %v11521_v23  ;;  %10343 = vmatprep.subr.mxu1 %v12519_v60 }
 0x247   :  { %10354 = vmatprep.mubr.msk.f32.mxu0 %vm10940_vm1, %v12519_v60  ;;  %10364 = vmatprep.subr.mxu0 %v12519_v60 }
 0x248   :  { %10344 = vmatpush3.msra.mxu1 %v2821_v45  ;;  %10355 = vmatmul.mubr.f32.vlgmr.msra.gmra.mxu0 %v11521_v23 }
 0x249   :  { %10365 = vmatpush3.msra.mxu0 %v11203_v1  ;;  %10345 = vmatprep.subr.mxu1 %v12519_v60 }
 0x24a   :  { %10366 = vmatprep.subr.mxu0 %v12519_v60  ;;  %10346 = vmatpush3.msra.mxu1 %v2824_v55 }
 0x24b   :  { %10347 = vmatprep.mubr.msk.f32.mxu1 %vm10940_vm1, %v12519_v60  ;;  %10367 = vmatpush3.msra.mxu0 %v11430_v14 }
 0x24c   :  { %10348 = vmatmul.mubr.f32.vlgmr.msra.gmra.mxu1 %v2861_v20  ;;  %10357 = vmatprep.subr.mxu1 %v12519_v60  ;;  %v3785_v20 = vsub.f32 %v3715_v25, %v11568_v26 }
 0x24d   :  { %10368 = vmatprep.mubr.msk.f32.mxu0 %vm10940_vm1, %v12519_v60  ;;  %10378 = vmatprep.subr.mxu0 %v12519_v60 }
 0x24e   :  { %10358 = vmatpush3.msra.mxu1 %v2821_v45  ;;  %10369 = vmatmul.mubr.f32.vlgmr.msra.gmra.mxu0 %v3326_v47 }
 0x24f   :  { %10379 = vmatpush3.msra.mxu0 %v11214_v7  ;;  %10359 = vmatprep.subr.mxu1 %v12519_v60  ;;  %v3786_v7 = vand.u32 4294901760, %v3785_v20 }
 0x250   :  { %10380 = vmatprep.subr.mxu0 %v12519_v60  ;;  %10360 = vmatpush3.msra.mxu1 %v2824_v55 }
 0x251   :  { %10361 = vmatprep.mubr.msk.f32.mxu1 %vm10940_vm1, %v12519_v60  ;;  %10381 = vmatpush3.msra.mxu0 %v11438_v30 }
 0x252   :  { %10362 = vmatmul.mubr.f32.vlgmr.msra.gmra.mxu1 %v11521_v23  ;;  %10371 = vmatprep.subr.mxu1 %v12519_v60 }
 0x253   :  { %10382 = vmatprep.mubr.msk.f32.mxu0 %vm10940_vm1, %v12519_v60  ;;  %10392 = vmatprep.subr.mxu0 %v12519_v60 }
 0x254   :  { %10372 = vmatpush3.msra.mxu1 %v11251_v16  ;;  %10383 = vmatmul.mubr.f32.vlgmr.msra.gmra.mxu0 %v11537_v57 }
 0x255   :  { %10393 = vmatpush3.msra.mxu0 %v11225_v10  ;;  %10373 = vmatprep.subr.mxu1 %v12519_v60  ;;  %v3787_v10 = vsub.f32 %v3785_v20, %v3786_v7 }
 0x256   :  { %10394 = vmatprep.subr.mxu0 %v12519_v60  ;;  %10374 = vmatpush3.msra.mxu1 %v11455_v39 }
 0x257   :  { %10375 = vmatprep.mubr.msk.f32.mxu1 %vm10940_vm1, %v12519_v60  ;;  %10395 = vmatpush3.msra.mxu0 %v11443_v34  ;;  %v3788_v16 = vand.u32 4294901760, %v3787_v10 }
 0x258   :  { %10376 = vmatmul.mubr.f32.vlgmr.msra.gmra.mxu1 %v11532_v0  ;;  %10385 = vmatprep.subr.mxu1 %v12519_v60 }
 0x259   :  { %10386 = vmatpush3.msra.mxu1 %v11203_v1  ;;  %10389 = vmatprep.mubr.msk.f32.mxu1 %vm10940_vm1, %v12519_v60 }
 0x25a   :  { %10387 = vmatprep.subr.mxu1 %v12519_v60  ;;  %10396 = vmatprep.mubr.msk.f32.mxu0 %vm10940_vm1, %v12519_v60 }
 0x25b   :  { %10388 = vmatpush3.msra.mxu1 %v11430_v14  ;;  %10397 = vmatmul.mubr.f32.vlgmr.msra.gmra.mxu0 %v11532_v0 }
 0x25c   :  { %10390 = vmatmul.mubr.f32.vlgmr.msra.gmra.mxu1 %v3324_v15  ;;  %10399 = vmatprep.subr.mxu1 %v12519_v60 }
 0x25d   :  { %10406 = vmatprep.subr.mxu0 %v12519_v60  ;;  %10400 = vmatpush3.msra.mxu1 %v11203_v1 }
 0x25e   :  { %10407 = vmatpush3.msra.mxu0 %v11001_v4  ;;  %10401 = vmatprep.subr.mxu1 %v12519_v60 }
 0x25f   :  { %10408 = vmatprep.subr.mxu0 %v12519_v60  ;;  %10402 = vmatpush3.msra.mxu1 %v11430_v14 }
 0x260   :  { %10403 = vmatprep.mubr.msk.f32.mxu1 %vm10940_vm1, %v12519_v60  ;;  %10409 = vmatpush3.msra.mxu0 %v11004_v5 }
 0x261   :  { %10410 = vmatprep.mubr.msk.f32.mxu0 %vm10940_vm1, %v12519_v60  ;;  %10404 = vmatmul.mubr.f32.vlgmr.msra.gmra.mxu1 %v11532_v0 }
 0x262   :  { %10411 = vmatmul.mubr.f32.vlgmr.msra.gmra.mxu0 %v3788_v16  ;;  %10413 = vmatprep.subr.mxu1 %v12519_v60 }
 0x263   :  { %10420 = vmatprep.subr.mxu0 %v12519_v60  ;;  %10414 = vmatpush3.msra.mxu1 %v11031_v17 }
 0x264   :  { %10421 = vmatpush3.msra.mxu0 %v11013_v8  ;;  %10415 = vmatprep.subr.mxu1 %v12519_v60 }
 0x265   :  { %10422 = vmatprep.subr.mxu0 %v12519_v60  ;;  %10416 = vmatpush3.msra.mxu1 %v11033_v18 }
 0x266   :  { %10417 = vmatprep.mubr.msk.f32.mxu1 %vm10940_vm1, %v12519_v60  ;;  %10423 = vmatpush3.msra.mxu0 %v11016_v9 }
 0x267   :  { %10424 = vmatprep.mubr.msk.f32.mxu0 %vm10940_vm1, %v12519_v60  ;;  %10418 = vmatmul.mubr.f32.vlgmr.msra.gmra.mxu1 %v11568_v26 }
 0x268   :  { %10425 = vmatmul.mubr.f32.vlgmr.msra.gmra.mxu0 %v3785_v20  ;;  %10427 = vmatprep.subr.mxu1 %v12519_v60 }
 0x269   :  { %10434 = vmatprep.subr.mxu0 %v12519_v60  ;;  %10428 = vmatpush3.msra.mxu1 %v11001_v4 }
 0x26a   :  { %10435 = vmatpush3.msra.mxu0 %v11021_v11  ;;  %10429 = vmatprep.subr.mxu1 %v12519_v60 }
 0x26b   :  { %10436 = vmatprep.subr.mxu0 %v12519_v60  ;;  %10430 = vmatpush3.msra.mxu1 %v11004_v5 }
 0x26c   :  { %10431 = vmatprep.mubr.msk.f32.mxu1 %vm10940_vm1, %v12519_v60  ;;  %10437 = vmatpush3.msra.mxu0 %v11024_v12  ;;  %v9698_v12 = vld [vmem:[%s12512_s3 + $0x68] sm:$0xff] }
 0x26d   :  { %10438 = vmatprep.mubr.msk.f32.mxu0 %vm10940_vm1, %v12519_v60  ;;  %10432 = vmatmul.mubr.f32.vlgmr.msra.gmra.mxu1 %v3786_v7  ;;  %v4469_v17 = vsel %vm68_vm0, %v9698_v12, 0 }
 0x26e   :  { %10439 = vmatmul.mubr.f32.vlgmr.msra.gmra.mxu0 %v11568_v26  ;;  %10441 = vmatprep.subr.mxu1 %v12519_v60 }
 0x26f   :  { %10442 = vmatpush3.msra.mxu1 %v11001_v4  ;;  %10445 = vmatprep.mubr.msk.f32.mxu1 %vm10940_vm1, %v12519_v60  ;;  %v11651_v4 = vand.u32 4294901760, %v4469_v17 }
 0x270   :  { %10443 = vmatprep.subr.mxu1 %v12519_v60 }
 0x271   :  { %10444 = vmatpush3.msra.mxu1 %v11004_v5  ;;  %v11654_v14 = vsub.f32 %v4469_v17, %v11651_v4 }
 0x272   :  { %10446 = vmatmul.mubr.f32.vlgmr.msra.gmra.mxu1 %v11568_v26 }
 0x273   :  { %10459 = vmatprep.mubr.f32.mxu1 %v11651_v4  ;;  %v4543_v39 = vand.u32 4294901760, %v11654_v14 }
 0x275   :  { %v4544_v28 = vsub.f32 %v11654_v14, %v4543_v39 }
 0x277   :  { %v4545_v41 = vand.u32 4294901760, %v4544_v28  ;;  %v4178_v28 = vstv %s9654_s14  ;;  %s11772_s14 = sld [smem:[#allocation2 + $0xb1]] }
 0x279   :  { %10452 = vmatprep.mubr.f32.mxu0 %v4545_v41  ;;  %v4186_v41 = vstv %s9656_s15  ;;  %s11777_s15 = sld [smem:[#allocation2 + $0xb2]] }
 0x2fe   :  { %v2865_v8 = vpop.f32.mrf.mxu0 }
 0x300   :  { %v10328_v9 = vpop.f32.mrf.mxu0 }
 0x302   :  { %v3022_v11 = vpop.f32.mrf.mxu0 }
 0x304   :  { %v10342_v18 = vpop.f32.mrf.mxu0 }
 0x306   :  { %v2946_v1 = vpop.f32.mrf.mxu1 }
 0x307   :  { %v2947_v5 = vadd.f32 %v2946_v1, %v2865_v8 }
 0x308   :  { %v10335_v30 = vpop.f32.mrf.mxu1  ;;  %v3174_v34 = vpop.f32.mrf.mxu0 }
 0x309   :  { %v3023_v23 = vadd.f32 %v3022_v11, %v2947_v5 }
 0x30a   :  { %v10356_v21 = vpop.f32.mrf.mxu0 }
 0x30c   :  { %v3097_v44 = vpop.f32.mrf.mxu1 }
 0x30d   :  { %v3098_v38 = vadd.f32 %v3097_v44, %v3023_v23 }
 0x30e   :  { %v10349_v42 = vpop.f32.mrf.mxu1  ;;  %v3328_v37 = vpop.f32.mrf.mxu0 }
 0x30f   :  { %v3175_v45 = vadd.f32 %v3174_v34, %v3098_v38 }
 0x310   :  { %v10370_v51 = vpop.f32.mrf.mxu0 }
 0x312   :  { %v3247_v52 = vpop.f32.mrf.mxu1 }
 0x313   :  { %v3248_v0 = vadd.f32 %v3247_v52, %v3175_v45 }
 0x314   :  { %v10363_v53 = vpop.f32.mrf.mxu1  ;;  %v3485_v55 = vpop.f32.mrf.mxu0 }
 0x315   :  { %4176 = vst [vmem:[%s12516_s7] sm:$0xff] %v3248_v0  ;;  %v4193_v0 = vstv %s9657_s16  ;;  %s11785_s16 = sld [smem:[#allocation2 + $0xb8]] }
 0x316   :  { %v10384_v3 = vpop.f32.mrf.mxu0 }
 0x318   :  { %v3409_v56 = vpop.f32.mrf.mxu1 }
 0x319   :  { %v3410_v57 = vadd.f32 %v3409_v56, %v3328_v37  ;;  %v4182_v37 = vstv %s9655_s2  ;;  %v4204_v56 = vstv %s9659_s17  ;;  %s11781_s2 = sld [smem:[#allocation2 + $0xac]] }
 0x31a   :  { %v10377_v61 = vpop.f32.mrf.mxu1  ;;  %s11789_s17 = sld [smem:[#allocation2 + $0xb3]] }
 0x31b   :  { %v3486_v13 = vadd.f32 %v3485_v55, %v3410_v57  ;;  %v3637_v59 = vpop.f32.mrf.mxu0 }
 0x31c   :  { %v3560_v33 = vpop.f32.mrf.mxu1 }
 0x31d   :  { %v3561_v15 = vadd.f32 %v3560_v33, %v3486_v13  ;;  %v10398_v19 = vpop.f32.mrf.mxu0  ;;  %v4211_v13 = vstv %s9660_s18  ;;  %s11794_s18 = sld [smem:[#allocation2 + $0xb9]] }
 0x31e   :  { %v10391_v63 = vpop.f32.mrf.mxu1 }
 0x31f   :  { %v3638_v58 = vadd.f32 %v3637_v59, %v3561_v15  ;;  %v4200_v63 = vstv %s9658_s19  ;;  %s11798_s19 = sld [smem:[#allocation2 + $0xb4]] }
 0x321   :  { %v3710_v47 = vpop.f32.mrf.mxu1 }
 0x322   :  { %v3711_v25 = vadd.f32 %v3710_v47, %v3638_v58  ;;  %v3790_v26 = vpop.f32.mrf.mxu0 }
 0x323   :  { %v10405_v20 = vpop.f32.mrf.mxu1 }
 0x324   :  { %v3791_v7 = vadd.f32 %v3790_v26, %v3711_v25  ;;  %v10412_v10 = vpop.f32.mrf.mxu0 }
 0x325   :  { %v4218_v10 = vstv %s11675_s21  ;;  %s11808_s21 = sld [smem:[#allocation2 + $0xba]] }
 0x327   :  { %v3871_v16 = vpop.f32.mrf.mxu1 }
 0x328   :  { %v3872_v8 = vadd.f32 %v3871_v16, %v3791_v7  ;;  %v3947_v9 = vpop.f32.mrf.mxu0  ;;  %v4229_v16 = vstv %s11671_s20  ;;  %s11804_s20 = sld [smem:[#allocation7 + $0x85]] }
 0x329   :  { %v10419_v11 = vpop.f32.mrf.mxu1 }
 0x32a   :  { %v3948_v12 = vadd.f32 %v3947_v9, %v3872_v8  ;;  %v10426_v17 = vpop.f32.mrf.mxu0 }
 0x32d   :  { %v4022_v18 = vpop.f32.mrf.mxu1 }
 0x32e   :  { %v4023_v1 = vadd.f32 %v4022_v18, %v3948_v12  ;;  %v4099_v5 = vpop.f32.mrf.mxu0  ;;  %v4236_v12 = vstv %s11680_s22  ;;  %s11812_s22 = sld [smem:[#allocation2 + $0xbb]] }
 0x32f   :  { %v10433_v30 = vpop.f32.mrf.mxu1 }
 0x330   :  { %v4100_v34 = vadd.f32 %v4099_v5, %v4023_v1  ;;  %v10440_v23 = vpop.f32.mrf.mxu0  ;;  %v4243_v5 = vstv %s11689_s23  ;;  %s11816_s23 = sld [smem:[#allocation2 + $0xb5]] }
 0x332   :  { %v4172_v21 = vpop.f32.mrf.mxu1 }
 0x333   :  { %v11664_v44 = vadd.f32 %v4172_v21, %v4100_v34 }
 0x334   :  { %v10447_v38 = vpop.f32.mrf.mxu1 }
 0x335   :  { %v4179_v42 = vmul.f32 %v4178_v28, %v11664_v44  ;;  %v4187_v51 = vmul.f32 %v4186_v41, %v11664_v44  ;;  %v4465_v3 = vsel %vm1755_vm2, %v11664_v44, 0.0  ;;  %v4205_v19 = vmul.f32 %v4204_v56, %v11664_v44 }
 0x336   :  { %v11677_v57 = vand.u32 4294901760, %v4465_v3  ;;  %v4230_v1 = vmul.f32 %v4229_v16, %v11664_v44  ;;  %v4225_v28 = vstv %s11695_s24  ;;  %v4300_v16 = vstv %s11728_s30  ;;  %s11824_s24 = sld [smem:[#allocation2 + $0xbc]] }
 0x337   :  { %v4180_v45 = vadd.f32 %v4179_v42, %v11513_v22  ;;  %v4189_v55 = vrot.slane %v4187_v51, 7  ;;  %v4207_v7 = vrot.slane %v4205_v19, 6  ;;  %s9697_s30 = sld [smem:[#allocation7 + $0x87]] }
 0x338   :  { %10448 = vmatprep.subr.mxu0 %v11677_v57  ;;  %v11684_v59 = vsub.f32 %v4465_v3, %v11677_v57  ;;  %v4232_v38 = vrot.slane %v4230_v1, 5 }
 0x339   :  { %v4183_v52 = vmul.f32 %v4182_v37, %v4180_v45  ;;  %v4191_v33 = vadd.f32 %v4189_v55, %v11513_v22  ;;  %10449 = vmatpush3.msra.mxu0 %v11677_v57  ;;  %v4209_v17 = vadd.f32 %v4207_v7, %v11513_v22  ;;  %v4261_v37 = vstv %s11701_s25  ;;  %s11829_s25 = sld [smem:[#allocation2 + $0xbd]] }
 0x33a   :  { %v11692_v58 = vand.u32 4294901760, %v11684_v59  ;;  %v4234_v3 = vadd.f32 %v4232_v38, %v11513_v22 }
 0x33b   :  { %v11669_v53 = vmax.f32 %v4183_v52, 0.0  ;;  %v4250_v52 = vstv %s11710_s27  ;;  %s12115_s27 = sld [smem:[#allocation2 + $0x119]] }
 0x33c   :  { %v4593_v26 = vsub.f32 %v11684_v59, %v11692_v58 }
 0x33d   :  { %v4194_v61 = vmul.f32 %v4193_v0, %v11669_v53  ;;  %v4212_v25 = vmul.f32 %v4211_v13, %v11669_v53  ;;  %v4237_v21 = vmul.f32 %v4236_v12, %v11669_v53  ;;  %v4268_v0 = vstv %s11707_s26  ;;  %s11833_s26 = sld [smem:[#allocation7 + $0x86]] }
 0x33e   :  { %v11703_v8 = vand.u32 4294901760, %v4593_v26  ;;  %v4275_v13 = vstv %s11718_s28  ;;  %v4269_v19 = vmul.f32 %v4268_v0, %v11669_v53  ;;  %s12121_s28 = sld [smem:[#allocation7 + $0x102]] }
 0x33f   :  { %v4196_v15 = vrot.slane %v4194_v61, 7  ;;  %v4214_v11 = vrot.slane %v4212_v25, 6  ;;  %v4239_v51 = vrot.slane %v4237_v21, 5  ;;  %v4262_v61 = vmul.f32 %v4261_v37, %v11664_v44 }
 0x340   :  { %10455 = vmatprep.subr.mxu1 %v11703_v8  ;;  %v4271_v12 = vrot.slane %v4269_v19, 4  ;;  %v4314_v21 = vstv %s11741_s9  ;;  %v4321_v37 = vstv %s11751_s10  ;;  %s12151_s9 = sld [smem:[#allocation2 + $0x122]] }
 0x341   :  { %v4198_v47 = vadd.f32 %v4196_v15, %v4191_v33  ;;  %10456 = vmatpush3.msra.mxu1 %v11703_v8  ;;  %v4216_v34 = vadd.f32 %v4214_v11, %v4209_v17  ;;  %v4241_v33 = vadd.f32 %v4239_v51, %v4234_v3  ;;  %s12161_s10 = sld [smem:[#allocation2 + $0x128]] }
 0x343   :  { %v4201_v20 = vmul.f32 %v4200_v63, %v4198_v47  ;;  %v4282_v63 = vstv %s11725_s29  ;;  %s9696_s29 = sld [smem:[#allocation2 + $0xbe]] }
 0x345   :  { %v11705_v9 = vmax.f32 %v4201_v20, 0.0  ;;  %v4264_v20 = vrot.slane %v4262_v61, 4  ;;  %v4353_v61 = vstv %s11756_s4  ;;  %s12167_s4 = sld [smem:[#allocation2 + $0x129]] }
 0x347   :  { %v4219_v18 = vmul.f32 %v4218_v10, %v11705_v9  ;;  %v4458_v30 = vsel %vm1755_vm2, %v11669_v53, %v11705_v9  ;;  %v4244_v42 = vmul.f32 %v4243_v5, %v11705_v9  ;;  %v4276_v7 = vmul.f32 %v4275_v13, %v11705_v9 }
 0x348   :  { %v4257_v10 = vstv %s11730_s5  ;;  %v4266_v5 = vadd.f32 %v4264_v20, %v11513_v22  ;;  %v4315_v3 = vmul.f32 %v4314_v21, %v11705_v9  ;;  %s12136_s5 = sld [smem:[#allocation2 + $0x11a]] }
 0x349   :  { %v4221_v23 = vrot.slane %v4219_v18, 7  ;;  %v4246_v56 = vrot.slane %v4244_v42, 6  ;;  %v4307_v18 = vstv %s11735_s8  ;;  %s12144_s8 = sld [smem:[#allocation2 + $0x121]] }
 0x34a   :  { %v4308_v42 = vmul.f32 %v4307_v18, %v11669_v53 }
 0x34b   :  { %v4223_v41 = vadd.f32 %v4221_v23, %v4216_v34  ;;  %v4248_v25 = vadd.f32 %v4246_v56, %v4241_v33  ;;  %v4301_v34 = vmul.f32 %v4300_v16, %v11664_v44  ;;  %v4289_v23 = vstv %s11744_s1  ;;  %s12154_s1 = sld [smem:[#allocation5 + $0x105]] }
 0x34c   :  { %v4328_v56 = vstv %s11760_s11  ;;  %v4310_v19 = vrot.slane %v4308_v42, 3  ;;  %v4354_v16 = vmul.f32 %v4353_v61, %v11669_v53  ;;  %s12170_s11 = sld [smem:[#allocation2 + $0x123]] }
 0x34d   :  { %v4226_v45 = vmul.f32 %v4225_v28, %v4223_v41  ;;  %v4273_v41 = vadd.f32 %v4271_v12, %v4266_v5  ;;  %v4303_v0 = vrot.slane %v4301_v34, 3  ;;  %v4367_v5 = vstv %s11777_s15  ;;  %s12186_s15 = sld [smem:[#allocation2 + $0x12b]] }
 0x34e   :  { %v4335_v34 = vstv %s11781_s2  ;;  %v4356_v42 = vrot.slane %v4354_v16, 2  ;;  %s12189_s2 = sld [smem:[#allocation7 + $0x104]] }
 0x34f   :  { %v11737_v55 = vmax.f32 %v4226_v45, 0.0  ;;  %v4346_v45 = vstv %s11748_s0  ;;  %s12156_s0 = sld [smem:[#allocation7 + $0x103]] }
 0x351   :  { %v4251_v15 = vmul.f32 %v4250_v52, %v11737_v55  ;;  %v4459_v47 = vsel %vm1757_vm3, %v4458_v30, %v11737_v55  ;;  %v4283_v17 = vmul.f32 %v4282_v63, %v11737_v55  ;;  %v4278_v30 = vrot.slane %v4276_v7, 5 }
 0x352   :  { %v4322_v63 = vmul.f32 %v4321_v37, %v11737_v55  ;;  %v4305_v7 = vadd.f32 %v4303_v0, %v11513_v22  ;;  %v4374_v37 = vstv %s11789_s17  ;;  %s9703_s17 = sld [smem:[#allocation5 + $0x100]] }
 0x353   :  { %v4253_v26 = vrot.slane %v4251_v15, 7  ;;  %v4285_v38 = vrot.slane %v4283_v17, 6  ;;  %v4280_v51 = vadd.f32 %v4278_v30, %v4273_v41  ;;  %v4399_v30 = vstv %s11768_s13  ;;  %s12177_s13 = sld [smem:[#allocation2 + $0x12a]] }
 0x354   :  { %v4312_v17 = vadd.f32 %v4310_v19, %v4305_v7  ;;  %v4324_v18 = vrot.slane %v4322_v63, 5  ;;  %v4400_v61 = vmul.f32 %v4399_v30, %v11664_v44  ;;  %v4342_v7 = vstv %s11804_s20  ;;  %s9706_s20 = sld [smem:[#allocation2 + $0x108]] }
 0x355   :  { %v4255_v11 = vadd.f32 %v4253_v26, %v4248_v25  ;;  %v4287_v33 = vadd.f32 %v4285_v38, %v4280_v51  ;;  %v4296_v25 = vstv %s11763_s12  ;;  %v4347_v26 = vmul.f32 %v4346_v45, %v11664_v44  ;;  %s12174_s12 = sld [smem:[#allocation5 + $0x106]] }
 0x356   :  { %v4406_v45 = vstv %s11785_s16  ;;  %s12194_s16 = sld [smem:[#allocation5 + $0x107]] }
 0x357   :  { %v4258_v1 = vmul.f32 %v4257_v10, %v4255_v11  ;;  %v4317_v10 = vrot.slane %v4315_v3, 4  ;;  %v4360_v11 = vstv %s11772_s14  ;;  %s12182_s14 = sld [smem:[#allocation2 + $0x130]] }
 0x358   :  { %v4361_v38 = vmul.f32 %v4360_v11, %v11705_v9  ;;  %v4402_v11 = vrot.slane %v4400_v61, 1 }
 0x359   :  { %v11774_v28 = vmax.f32 %v4258_v1, 0.0  ;;  %v4349_v1 = vrot.slane %v4347_v26, 2  ;;  %v4319_v21 = vadd.f32 %v4317_v10, %v4312_v17  ;;  %v4420_v17 = vstv %s11808_s21  ;;  %s9708_s21 = sld [smem:[#allocation5 + $0x102]] }
 0x35a   :  { %v4363_v63 = vrot.slane %v4361_v38, 3 }
 0x35b   :  { %v4290_v52 = vmul.f32 %v4289_v23, %v11774_v28  ;;  %v4460_v13 = vsel %vm1759_vm4, %v4459_v47, %v11774_v28  ;;  %v4329_v47 = vmul.f32 %v4328_v56, %v11774_v28  ;;  %v4326_v51 = vadd.f32 %v4324_v18, %v4319_v21 }
 0x35c   :  { %v4351_v56 = vadd.f32 %v4349_v1, %v11513_v22 }
 0x35d   :  { %v4292_v15 = vrot.slane %v4290_v52, 7  ;;  %v4331_v41 = vrot.slane %v4329_v47, 6  ;;  %v4368_v52 = vmul.f32 %v4367_v5, %v11737_v55 }
 0x35f   :  { %v4294_v20 = vadd.f32 %v4292_v15, %v4287_v33  ;;  %v4413_v33 = vstv %s11794_s18  ;;  %v4381_v15 = vstv %s11798_s19  ;;  %v4333_v19 = vadd.f32 %v4331_v41, %v4326_v51  ;;  %s9705_s18 = sld [smem:[#allocation5 + $0x101]] }
 0x360   :  { %v4370_v10 = vrot.slane %v4368_v52, 4  ;;  %v4421_v41 = vmul.f32 %v4420_v17, %v11737_v55  ;;  %v4434_v51 = vstv %s11824_s24  ;;  %v4441_v55 = vstv %s11829_s25  ;;  %s9704_s19 = sld [smem:[#allocation7 + $0x100]] }
 0x361   :  { %v4297_v12 = vmul.f32 %v4296_v25, %v4294_v20  ;;  %v4375_v25 = vmul.f32 %v4374_v37, %v11774_v28  ;;  %v4407_v20 = vmul.f32 %v4406_v45, %v11669_v53  ;;  %v4427_v53 = vstv %s11812_s22  ;;  %s9709_s22 = sld [smem:[#allocation2 + $0x110]] }
 0x362   :  { %v4404_v37 = vadd.f32 %v4402_v11, %v11513_v22  ;;  %s12097_s24 = sld [smem:[#allocation5 + $0x103]] }
 0x363   :  { %v4298_v23 = vmax.f32 %v4297_v12, 0.0  ;;  %v4414_v12 = vmul.f32 %v4413_v33, %v11705_v9  ;;  %v4377_v1 = vrot.slane %v4375_v25, 5  ;;  %v4409_v30 = vrot.slane %v4407_v20, 1  ;;  %v9699_v9 = vld [vmem:[%s12512_s3 + $0x70] sm:$0xff]  ;;  %s12101_s25 = sld [smem:[#allocation2 + $0x111]] }
 0x364   :  { %v4395_v20 = vstv %s11833_s26  ;;  %s12106_s26 = sld [smem:[#allocation2 + $0x118]] }
 0x365   :  { %v4336_v0 = vmul.f32 %v4335_v34, %v4298_v23  ;;  %v4461_v3 = vsel %vm1761_vm5, %v4460_v13, %v4298_v23  ;;  %v4358_v13 = vadd.f32 %v4356_v42, %v4351_v56  ;;  %v4382_v16 = vmul.f32 %v4381_v15, %v4298_v23 }
 0x366   :  { %v4388_v34 = vstv %s11816_s23  ;;  %v4416_v45 = vrot.slane %v4414_v12, 2  ;;  %v4411_v33 = vadd.f32 %v4409_v30, %v4404_v37  ;;  %v4472_v15 = vsel %vm68_vm0, %v9699_v9, 0  ;;  %v9604_v37 = vld [vmem:[%s12512_s3 + $0x60] sm:$0xff]  ;;  %s9707_s23 = sld [smem:[#allocation7 + $0x101]] }
 0x367   :  { %v4338_v26 = vrot.slane %v4336_v0, 7  ;;  %v4365_v18 = vadd.f32 %v4363_v63, %v4358_v13  ;;  %v4384_v42 = vrot.slane %v4382_v16, 6  ;;  %v4428_v0 = vmul.f32 %v4427_v53, %v11774_v28 }
 0x369   :  { %v4340_v47 = vadd.f32 %v4338_v26, %v4333_v19  ;;  %v4372_v21 = vadd.f32 %v4370_v10, %v4365_v18  ;;  %v4423_v19 = vrot.slane %v4421_v41, 3  ;;  %v4435_v26 = vmul.f32 %v4434_v51, %v4298_v23 }
 0x36a   :  { %v4430_v22 = vrot.slane %v4428_v0, 4  ;;  %v4980_v0 = vsel %vm68_vm0, %v9604_v37, 0 }
 0x36b   :  { %v4343_v5 = vmul.f32 %v4342_v7, %v4340_v47  ;;  %v4379_v52 = vadd.f32 %v4377_v1, %v4372_v21  ;;  %v4418_v7 = vadd.f32 %v4416_v45, %v4411_v33  ;;  %v11848_v47 = vand.u32 4294901760, %v4472_v15 }
 0x36c   :  { %v4437_v11 = vrot.slane %v4435_v26, 5  ;;  %v4455_v21 = vstv %s9697_s30  ;;  %s12133_s30 = sld [smem:[#allocation2 + $0x120]] }
 0x36d   :  { %v4344_v38 = vmax.f32 %v4343_v5, 0.0  ;;  %v4386_v63 = vadd.f32 %v4384_v42, %v4379_v52  ;;  %v4425_v28 = vadd.f32 %v4423_v19, %v4418_v7  ;;  %v4552_v1 = vsub.f32 %v4472_v15, %v11848_v47  ;;  %v9603_v42 = vld [vmem:[%s12512_s3 + $0x58] sm:$0xff] }
 0x36e   :  { %v4977_v52 = vsel %vm68_vm0, %v9603_v42, 0  ;;  %v11865_v15 = vand.u32 4294901760, %v4980_v0  ;;  %v9700_v42 = vld [vmem:[%s12512_s3 + $0x78] sm:$0xff] }
 0x36f   :  { %v4389_v56 = vmul.f32 %v4388_v34, %v4344_v38  ;;  %v4462_v61 = vsel %vm1763_vm6, %v4461_v3, %v4344_v38  ;;  %v4442_v10 = vmul.f32 %v4441_v55, %v4344_v38  ;;  %v4448_v3 = vstv %s9696_s29  ;;  %s12127_s29 = sld [smem:[#allocation5 + $0x104]] }
 0x370   :  { %v4432_v12 = vadd.f32 %v4430_v22, %v4425_v28  ;;  %v4553_v41 = vand.u32 4294901760, %v4552_v1  ;;  %v11863_v55 = vand.u32 4294901760, %v4977_v52  ;;  %v5060_v26 = vsub.f32 %v4980_v0, %v11865_v15 }
 0x371   :  { %v4391_v25 = vrot.slane %v4389_v56, 7  ;;  %v4444_v18 = vrot.slane %v4442_v10, 6 }
 0x372   :  { %v4439_v5 = vadd.f32 %v4437_v11, %v4432_v12  ;;  %v4554_v45 = vsub.f32 %v4552_v1, %v4553_v41 }
 0x373   :  { %v4393_v13 = vadd.f32 %v4391_v25, %v4386_v63  ;;  %v5050_v25 = vsub.f32 %v4977_v52, %v11863_v55 }
 0x374   :  { %v4446_v53 = vadd.f32 %v4444_v18, %v4439_v5  ;;  %v4555_v33 = vand.u32 4294901760, %v4554_v45 }
 0x375   :  { %v4396_v16 = vmul.f32 %v4395_v20, %v4393_v13  ;;  %v5051_v22 = vand.u32 4294901760, %v5050_v25  ;;  %v5061_v13 = vand.u32 4294901760, %v5060_v26 }
 0x377   :  { %v4397_v17 = vmax.f32 %v4396_v16, 0.0  ;;  %v5052_v10 = vsub.f32 %v5050_v25, %v5051_v22  ;;  %v5062_v28 = vsub.f32 %v5060_v26, %v5061_v13 }
 0x379   :  { %v4449_v30 = vmul.f32 %v4448_v3, %v4397_v17  ;;  %v4463_v23 = vsel %vm1765_vm7, %v4462_v61, %v4397_v17  ;;  %v5053_v16 = vand.u32 4294901760, %v5052_v10  ;;  %v5063_v11 = vand.u32 4294901760, %v5062_v28 }
 0x37b   :  { %v4451_v34 = vrot.slane %v4449_v30, 7 }
 0x37d   :  { %v4453_v38 = vadd.f32 %v4451_v34, %v4446_v53 }
 0x37f   :  { %v4456_v9 = vmul.f32 %v4455_v21, %v4453_v38 }
 0x381   :  { %v4457_v51 = vmax.f32 %v4456_v9, 0.0 }
 0x383   :  { %v4464_v56 = vsel %vm1767_vm8, %v4463_v23, %v4457_v51 }
 0x384   :  { %v11861_v61 = vand.u32 4294901760, %v4464_v56 }
 0x386   :  { %10450 = vmatprep.subr.mxu0 %v11861_v61  ;;  %v11869_v19 = vsub.f32 %v4464_v56, %v11861_v61  ;;  %v5486_v56 = vsel %vm68_vm0, %v9700_v42, 0 }
 0x387   :  { %10451 = vmatpush3.msra.mxu0 %v11861_v61 }
 0x388   :  { %10462 = vmatprep.subr.mxu0 %v11684_v59  ;;  %10453 = vmatmul.mubr.f32.vlgmr.msra.gmra.mxu0 %v4555_v33  ;;  %v11874_v63 = vand.u32 4294901760, %v11869_v19 }
 0x389   :  { %10463 = vmatpush3.msra.mxu0 %v11684_v59  ;;  %10466 = vmatprep.mubr.f32.mxu0 %v11654_v14 }
 0x38a   :  { %10464 = vmatprep.subr.mxu0 %v11869_v19  ;;  %v4600_v20 = vsub.f32 %v11869_v19, %v11874_v63 }
 0x38b   :  { %10465 = vmatpush3.msra.mxu0 %v11869_v19 }
 0x38c   :  { %10476 = vmatprep.subr.mxu0 %v11692_v58  ;;  %10467 = vmatmul.mubr.f32.vlgmr.msra.gmra.mxu0 %v4552_v1  ;;  %v11885_v7 = vand.u32 4294901760, %v4600_v20 }
 0x38d   :  { %10477 = vmatpush3.msra.mxu0 %v11692_v58  ;;  %10480 = vmatprep.mubr.f32.mxu0 %v11651_v4 }
 0x38e   :  { %10457 = vmatprep.subr.mxu1 %v11885_v7  ;;  %10478 = vmatprep.subr.mxu0 %v11874_v63 }
 0x38f   :  { %10458 = vmatpush3.msra.mxu1 %v11885_v7  ;;  %10479 = vmatpush3.msra.mxu0 %v11874_v63 }
 0x390   :  { %10460 = vmatmul.mubr.f32.vlgmr.msra.gmra.mxu1 %v11848_v47  ;;  %10469 = vmatprep.subr.mxu1 %v11677_v57 }
 0x391   :  { %10470 = vmatpush3.msra.mxu1 %v11677_v57  ;;  %10473 = vmatprep.mubr.f32.mxu1 %v4543_v39 }
 0x392   :  { %10471 = vmatprep.subr.mxu1 %v11861_v61  ;;  %10481 = vmatmul.mubr.f32.vlgmr.msra.gmra.mxu0 %v11848_v47 }
 0x393   :  { %10472 = vmatpush3.msra.mxu1 %v11861_v61  ;;  %10490 = vmatprep.subr.mxu0 %v11076_v24 }
 0x394   :  { %10474 = vmatmul.mubr.f32.vlgmr.msra.gmra.mxu1 %v4553_v41  ;;  %10483 = vmatprep.subr.mxu1 %v11677_v57 }
 0x395   :  { %10484 = vmatpush3.msra.mxu1 %v11677_v57  ;;  %10491 = vmatpush3.msra.mxu0 %v11076_v24 }
 0x396   :  { %10485 = vmatprep.subr.mxu1 %v11861_v61  ;;  %10492 = vmatprep.subr.mxu0 %v11083_v27 }
 0x397   :  { %10486 = vmatpush3.msra.mxu1 %v11861_v61  ;;  %10487 = vmatprep.mubr.f32.mxu1 %v11651_v4 }
 0x398   :  { %10493 = vmatpush3.msra.mxu0 %v11083_v27  ;;  %10494 = vmatprep.mubr.f32.mxu0 %v5053_v16 }
 0x399   :  { %10488 = vmatmul.mubr.f32.vlgmr.msra.gmra.mxu1 %v11848_v47  ;;  %10495 = vmatmul.mubr.f32.vlgmr.msra.gmra.mxu0 %v5063_v11 }
 0x39a   :  { %10497 = vmatprep.subr.mxu1 %v11102_v36  ;;  %10504 = vmatprep.subr.mxu0 %v11086_v29 }
 0x39b   :  { %10498 = vmatpush3.msra.mxu1 %v11102_v36  ;;  %10505 = vmatpush3.msra.mxu0 %v11086_v29 }
 0x39c   :  { %10499 = vmatprep.subr.mxu1 %v11115_v40  ;;  %10506 = vmatprep.subr.mxu0 %v11094_v32 }
 0x39d   :  { %10500 = vmatpush3.msra.mxu1 %v11115_v40  ;;  %10501 = vmatprep.mubr.f32.mxu1 %v11863_v55 }
 0x39e   :  { %10507 = vmatpush3.msra.mxu0 %v11094_v32  ;;  %10508 = vmatprep.mubr.f32.mxu0 %v5050_v25  ;;  %v11947_v25 = vand.u32 4294901760, %v5486_v56 }
 0x39f   :  { %10502 = vmatmul.mubr.f32.vlgmr.msra.gmra.mxu1 %v11865_v15  ;;  %10509 = vmatmul.mubr.f32.vlgmr.msra.gmra.mxu0 %v5060_v26 }
 0x3a0   :  { %10511 = vmatprep.subr.mxu1 %v11076_v24  ;;  %10518 = vmatprep.subr.mxu0 %v11091_v31  ;;  %v11950_v11 = vsub.f32 %v5486_v56, %v11947_v25 }
 0x3a1   :  { %10512 = vmatpush3.msra.mxu1 %v11076_v24  ;;  %10519 = vmatpush3.msra.mxu0 %v11091_v31 }
 0x3a2   :  { %10513 = vmatprep.subr.mxu1 %v11083_v27  ;;  %10520 = vmatprep.subr.mxu0 %v11100_v35 }
 0x3a3   :  { %10514 = vmatpush3.msra.mxu1 %v11083_v27  ;;  %10515 = vmatprep.mubr.f32.mxu1 %v5051_v22 }
 0x3a4   :  { %10521 = vmatpush3.msra.mxu0 %v11100_v35  ;;  %10522 = vmatprep.mubr.f32.mxu0 %v11863_v55 }
 0x3a5   :  { %10516 = vmatmul.mubr.f32.vlgmr.msra.gmra.mxu1 %v5061_v13  ;;  %10523 = vmatmul.mubr.f32.vlgmr.msra.gmra.mxu0 %v11865_v15 }
 0x3a6   :  { %10525 = vmatprep.subr.mxu1 %v11076_v24  ;;  %10529 = vmatprep.mubr.f32.mxu1 %v11863_v55 }
 0x3a7   :  { %10526 = vmatpush3.msra.mxu1 %v11076_v24  ;;  %10532 = vmatprep.subr.mxu0 %v12519_v60 }
 0x3a8   :  { %10527 = vmatprep.subr.mxu1 %v11083_v27  ;;  %10536 = vmatprep.mubr.msk.f32.mxu0 %vm10940_vm1, %v12519_v60 }
 0x3a9   :  { %10528 = vmatpush3.msra.mxu1 %v11083_v27 }
 0x3aa   :  { %10530 = vmatmul.mubr.f32.vlgmr.msra.gmra.mxu1 %v11865_v15  ;;  %10539 = vmatprep.subr.mxu1 %v12519_v60 }
 0x3ab   :  { %10543 = vmatprep.mubr.msk.f32.mxu1 %vm10940_vm1, %v12519_v60 }
 0x448   :  { %v10454_v4 = vpop.f32.mrf.mxu0 }
 0x44a   :  { %v4547_v14 = vpop.f32.mrf.mxu0 }
 0x44c   :  { %v10468_v39 = vpop.f32.mrf.mxu0 }
 0x44e   :  { %v4720_v47 = vpop.f32.mrf.mxu0 }
 0x450   :  { %v10461_v3 = vpop.f32.mrf.mxu1 }
 0x451   :  { %v4645_v12 = vadd.f32 %v10461_v3, %v10454_v4  ;;  %v5557_v3 = vand.u32 4294901760, %v11950_v11 }
 0x452   :  { %v4638_v17 = vpop.f32.mrf.mxu1  ;;  %v10482_v18 = vpop.f32.mrf.mxu0 }
 0x453   :  { %v4728_v1 = vadd.f32 %v10468_v39, %v4645_v12  ;;  %v4639_v5 = vadd.f32 %v4638_v17, %v4547_v14 }
 0x454   :  { %v10475_v30 = vpop.f32.mrf.mxu1  ;;  %v4887_v34 = vpop.f32.mrf.mxu0 }
 0x455   :  { %v4721_v23 = vadd.f32 %v4720_v47, %v4639_v5  ;;  %v4811_v53 = vadd.f32 %v10475_v30, %v4728_v1  ;;  %v9701_v1 = vld [vmem:[%s12512_s3 + $0x89] sm:$0x1] }
 0x456   :  { %v4802_v21 = vpop.f32.mrf.mxu1 }
 0x457   :  { %v4894_v41 = vadd.f32 %v10482_v18, %v4811_v53  ;;  %v4803_v38 = vadd.f32 %v4802_v21, %v4721_v23  ;;  %v5558_v53 = vsub.f32 %v11950_v11, %v5557_v3  ;;  %v5949_v21 = vsel %vm68_vm0, %v9701_v1, 0 }
 0x459   :  { %v4888_v9 = vadd.f32 %v4887_v34, %v4803_v38  ;;  %v10489_v37 = vpop.f32.mrf.mxu1  ;;  %v10496_v45 = vpop.f32.mrf.mxu0 }
 0x45a   :  { %v4973_v51 = vadd.f32 %v10489_v37, %v4894_v41  ;;  %v11958_v37 = vand.u32 4294901760, %v5949_v21 }
 0x45b   :  { %v4966_v52 = vpop.f32.mrf.mxu1  ;;  %v5055_v0 = vpop.f32.mrf.mxu0 }
 0x45c   :  { %v5066_v33 = vadd.f32 %v10496_v45, %v4973_v51  ;;  %v4967_v55 = vadd.f32 %v4966_v52, %v4888_v9  ;;  %v5559_v9 = vand.u32 4294901760, %v5558_v53  ;;  %v11963_v56 = vsub.f32 %v5949_v21, %v11958_v37 }
 0x45e   :  { %v5056_v15 = vadd.f32 %v5055_v0, %v4967_v55 }
 0x45f   :  { %v10503_v26 = vpop.f32.mrf.mxu1  ;;  %v10510_v20 = vpop.f32.mrf.mxu0 }
 0x460   :  { %v5153_v22 = vadd.f32 %v10503_v26, %v5066_v33 }
 0x461   :  { %v5146_v13 = vpop.f32.mrf.mxu1  ;;  %v5228_v10 = vpop.f32.mrf.mxu0 }
 0x462   :  { %v5236_v28 = vadd.f32 %v10510_v20, %v5153_v22  ;;  %v5147_v16 = vadd.f32 %v5146_v13, %v5056_v15  ;;  %v6020_v20 = vand.u32 4294901760, %v11963_v56 }
 0x464   :  { %v5229_v4 = vadd.f32 %v5228_v10, %v5147_v16  ;;  %v6021_v13 = vsub.f32 %v11963_v56, %v6020_v20  ;;  %v9605_v10 = vld [vmem:[%s12512_s3 + $0x88] sm:$0x1] }
 0x465   :  { %v10517_v14 = vpop.f32.mrf.mxu1  ;;  %v10524_v39 = vpop.f32.mrf.mxu0  ;;  %v6411_v16 = vsel %vm68_vm0, %v9605_v10, 0 }
 0x466   :  { %v5319_v47 = vadd.f32 %v10517_v14, %v5236_v28  ;;  %v6022_v28 = vand.u32 4294901760, %v6021_v13 }
 0x467   :  { %v5310_v12 = vpop.f32.mrf.mxu1  ;;  %v5395_v5 = vpop.f32.mrf.mxu0 }
 0x468   :  { %v5402_v17 = vadd.f32 %v10524_v39, %v5319_v47  ;;  %v5311_v18 = vadd.f32 %v5310_v12, %v5229_v4 }
 0x46a   :  { %v5396_v30 = vadd.f32 %v5395_v5, %v5311_v18  ;;  %v10531_v23 = vpop.f32.mrf.mxu1 }
 0x46b   :  { %v5481_v34 = vadd.f32 %v10531_v23, %v5402_v17 }
 0x46c   :  { %v5474_v41 = vpop.f32.mrf.mxu1 }
 0x46d   :  { %v5517_v38 = vand.u32 4294901760, %v5481_v34  ;;  %v5475_v42 = vadd.f32 %v5474_v41, %v5396_v30 }
 0x46f   :  { %v5595_v45 = vsub.f32 %v5481_v34, %v5517_v38  ;;  %v5520_v51 = vand.u32 4294901760, %v5475_v42  ;;  %10533 = vmatpush3.msra.mxu0 %v5517_v38 }
 0x470   :  { %10534 = vmatprep.subr.mxu0 %v12519_v60 }
 0x471   :  { %v5596_v52 = vand.u32 4294901760, %v5595_v45  ;;  %v5602_v0 = vsub.f32 %v5475_v42, %v5520_v51  ;;  %10535 = vmatpush3.msra.mxu0 %v5520_v51 }
 0x472   :  { %10546 = vmatprep.subr.mxu0 %v12519_v60  ;;  %10537 = vmatmul.mubr.f32.vlgmr.msra.gmra.mxu0 %v5559_v9 }
 0x473   :  { %v5597_v33 = vsub.f32 %v5595_v45, %v5596_v52  ;;  %v5603_v55 = vand.u32 4294901760, %v5602_v0  ;;  %10547 = vmatpush3.msra.mxu0 %v5595_v45  ;;  %10550 = vmatprep.mubr.msk.f32.mxu0 %vm10940_vm1, %v12519_v60 }
 0x474   :  { %10548 = vmatprep.subr.mxu0 %v12519_v60 }
 0x475   :  { %v5604_v15 = vsub.f32 %v5602_v0, %v5603_v55  ;;  %10549 = vmatpush3.msra.mxu0 %v5602_v0  ;;  %v5598_v26 = vand.u32 4294901760, %v5597_v33 }
 0x476   :  { %10560 = vmatprep.subr.mxu0 %v12519_v60  ;;  %10551 = vmatmul.mubr.f32.vlgmr.msra.gmra.mxu0 %v11950_v11  ;;  %v11994_v11 = vand.u32 4294901760, %v6411_v16 }
 0x477   :  { %10540 = vmatpush3.msra.mxu1 %v5598_v26  ;;  %10561 = vmatpush3.msra.mxu0 %v5596_v52  ;;  %v5605_v22 = vand.u32 4294901760, %v5604_v15 }
 0x478   :  { %10541 = vmatprep.subr.mxu1 %v12519_v60  ;;  %10562 = vmatprep.subr.mxu0 %v12519_v60  ;;  %v6481_v4 = vsub.f32 %v6411_v16, %v11994_v11 }
 0x479   :  { %10542 = vmatpush3.msra.mxu1 %v5605_v22  ;;  %10563 = vmatpush3.msra.mxu0 %v5603_v55 }
 0x47a   :  { %10544 = vmatmul.mubr.f32.vlgmr.msra.gmra.mxu1 %v11947_v25  ;;  %10553 = vmatprep.subr.mxu1 %v12519_v60 }
 0x47b   :  { %10564 = vmatprep.mubr.msk.f32.mxu0 %vm10940_vm1, %v12519_v60  ;;  %10574 = vmatprep.subr.mxu0 %v12519_v60 }
 0x47c   :  { %10554 = vmatpush3.msra.mxu1 %v5517_v38  ;;  %10565 = vmatmul.mubr.f32.vlgmr.msra.gmra.mxu0 %v11947_v25 }
 0x47d   :  { %10575 = vmatpush3.msra.mxu0 %v11677_v57  ;;  %10555 = vmatprep.subr.mxu1 %v12519_v60 }
 0x47e   :  { %10576 = vmatprep.subr.mxu0 %v12519_v60  ;;  %10556 = vmatpush3.msra.mxu1 %v5520_v51 }
 0x47f   :  { %10557 = vmatprep.mubr.msk.f32.mxu1 %vm10940_vm1, %v12519_v60  ;;  %10577 = vmatpush3.msra.mxu0 %v11861_v61 }
 0x480   :  { %10558 = vmatmul.mubr.f32.vlgmr.msra.gmra.mxu1 %v5557_v3  ;;  %10567 = vmatprep.subr.mxu1 %v12519_v60 }
 0x481   :  { %10578 = vmatprep.mubr.msk.f32.mxu0 %vm10940_vm1, %v12519_v60  ;;  %10588 = vmatprep.subr.mxu0 %v12519_v60 }
 0x482   :  { %10568 = vmatpush3.msra.mxu1 %v5517_v38  ;;  %10579 = vmatmul.mubr.f32.vlgmr.msra.gmra.mxu0 %v6022_v28 }
 0x483   :  { %10589 = vmatpush3.msra.mxu0 %v11684_v59  ;;  %10569 = vmatprep.subr.mxu1 %v12519_v60  ;;  %v6482_v59 = vand.u32 4294901760, %v6481_v4 }
 0x484   :  { %10590 = vmatprep.subr.mxu0 %v12519_v60  ;;  %10570 = vmatpush3.msra.mxu1 %v5520_v51 }
 0x485   :  { %10571 = vmatprep.mubr.msk.f32.mxu1 %vm10940_vm1, %v12519_v60  ;;  %10591 = vmatpush3.msra.mxu0 %v11869_v19 }
 0x486   :  { %10572 = vmatmul.mubr.f32.vlgmr.msra.gmra.mxu1 %v11947_v25  ;;  %10581 = vmatprep.subr.mxu1 %v12519_v60 }
 0x487   :  { %10592 = vmatprep.mubr.msk.f32.mxu0 %vm10940_vm1, %v12519_v60  ;;  %10602 = vmatprep.subr.mxu0 %v12519_v60 }
 0x488   :  { %10582 = vmatpush3.msra.mxu1 %v11703_v8  ;;  %10593 = vmatmul.mubr.f32.vlgmr.msra.gmra.mxu0 %v11963_v56 }
 0x489   :  { %10603 = vmatpush3.msra.mxu0 %v11692_v58  ;;  %10583 = vmatprep.subr.mxu1 %v12519_v60  ;;  %v6483_v58 = vsub.f32 %v6481_v4, %v6482_v59 }
 0x48a   :  { %10604 = vmatprep.subr.mxu0 %v12519_v60  ;;  %10584 = vmatpush3.msra.mxu1 %v11885_v7 }
 0x48b   :  { %10585 = vmatprep.mubr.msk.f32.mxu1 %vm10940_vm1, %v12519_v60  ;;  %10605 = vmatpush3.msra.mxu0 %v11874_v63  ;;  %v6484_v8 = vand.u32 4294901760, %v6483_v58 }
 0x48c   :  { %10586 = vmatmul.mubr.f32.vlgmr.msra.gmra.mxu1 %v11958_v37  ;;  %10595 = vmatprep.subr.mxu1 %v12519_v60 }
 0x48d   :  { %10596 = vmatpush3.msra.mxu1 %v11677_v57  ;;  %10599 = vmatprep.mubr.msk.f32.mxu1 %vm10940_vm1, %v12519_v60 }
 0x48e   :  { %10597 = vmatprep.subr.mxu1 %v12519_v60  ;;  %10606 = vmatprep.mubr.msk.f32.mxu0 %vm10940_vm1, %v12519_v60 }
 0x48f   :  { %10598 = vmatpush3.msra.mxu1 %v11861_v61  ;;  %10607 = vmatmul.mubr.f32.vlgmr.msra.gmra.mxu0 %v11958_v37 }
 0x490   :  { %10600 = vmatmul.mubr.f32.vlgmr.msra.gmra.mxu1 %v6020_v20  ;;  %10609 = vmatprep.subr.mxu1 %v12519_v60 }
 0x491   :  { %10616 = vmatprep.subr.mxu0 %v12519_v60  ;;  %10610 = vmatpush3.msra.mxu1 %v11677_v57 }
 0x492   :  { %10617 = vmatpush3.msra.mxu0 %v11076_v24  ;;  %10611 = vmatprep.subr.mxu1 %v12519_v60 }
 0x493   :  { %10618 = vmatprep.subr.mxu0 %v12519_v60  ;;  %10612 = vmatpush3.msra.mxu1 %v11861_v61 }
 0x494   :  { %10613 = vmatprep.mubr.msk.f32.mxu1 %vm10940_vm1, %v12519_v60  ;;  %10619 = vmatpush3.msra.mxu0 %v11083_v27 }
 0x495   :  { %10620 = vmatprep.mubr.msk.f32.mxu0 %vm10940_vm1, %v12519_v60  ;;  %10614 = vmatmul.mubr.f32.vlgmr.msra.gmra.mxu1 %v11958_v37 }
 0x496   :  { %10621 = vmatmul.mubr.f32.vlgmr.msra.gmra.mxu0 %v6484_v8  ;;  %10623 = vmatprep.subr.mxu1 %v12519_v60 }
 0x497   :  { %10630 = vmatprep.subr.mxu0 %v12519_v60  ;;  %10624 = vmatpush3.msra.mxu1 %v11102_v36 }
 0x498   :  { %10631 = vmatpush3.msra.mxu0 %v11086_v29  ;;  %10625 = vmatprep.subr.mxu1 %v12519_v60 }
 0x499   :  { %10632 = vmatprep.subr.mxu0 %v12519_v60  ;;  %10626 = vmatpush3.msra.mxu1 %v11115_v40 }
 0x49a   :  { %10627 = vmatprep.mubr.msk.f32.mxu1 %vm10940_vm1, %v12519_v60  ;;  %10633 = vmatpush3.msra.mxu0 %v11094_v32 }
 0x49b   :  { %10634 = vmatprep.mubr.msk.f32.mxu0 %vm10940_vm1, %v12519_v60  ;;  %10628 = vmatmul.mubr.f32.vlgmr.msra.gmra.mxu1 %v11994_v11 }
 0x49c   :  { %10635 = vmatmul.mubr.f32.vlgmr.msra.gmra.mxu0 %v6481_v4  ;;  %10637 = vmatprep.subr.mxu1 %v12519_v60 }
 0x49d   :  { %10644 = vmatprep.subr.mxu0 %v12519_v60  ;;  %10638 = vmatpush3.msra.mxu1 %v11076_v24 }
 0x49e   :  { %10645 = vmatpush3.msra.mxu0 %v11091_v31  ;;  %10639 = vmatprep.subr.mxu1 %v12519_v60 }
 0x49f   :  { %10646 = vmatprep.subr.mxu0 %v12519_v60  ;;  %10640 = vmatpush3.msra.mxu1 %v11083_v27 }
 0x4a0   :  { %10641 = vmatprep.mubr.msk.f32.mxu1 %vm10940_vm1, %v12519_v60  ;;  %10647 = vmatpush3.msra.mxu0 %v11100_v35  ;;  %v9747_v35 = vld [vmem:[%s12512_s3 + $0xb0] sm:$0xff] }
 0x4a1   :  { %10648 = vmatprep.mubr.msk.f32.mxu0 %vm10940_vm1, %v12519_v60  ;;  %10642 = vmatmul.mubr.f32.vlgmr.msra.gmra.mxu1 %v6482_v59  ;;  %v7166_v36 = vsel %vm68_vm0, %v9747_v35, 0 }
 0x4a2   :  { %10649 = vmatmul.mubr.f32.vlgmr.msra.gmra.mxu0 %v11994_v11  ;;  %10651 = vmatprep.subr.mxu1 %v12519_v60 }
 0x4a3   :  { %10652 = vmatpush3.msra.mxu1 %v11076_v24  ;;  %10655 = vmatprep.mubr.msk.f32.mxu1 %vm10940_vm1, %v12519_v60  ;;  %v12077_v24 = vand.u32 4294901760, %v7166_v36 }
 0x4a4   :  { %10653 = vmatprep.subr.mxu1 %v12519_v60 }
 0x4a5   :  { %10654 = vmatpush3.msra.mxu1 %v11083_v27  ;;  %v12080_v61 = vsub.f32 %v7166_v36, %v12077_v24  ;;  %v6875_v36 = vstv %s9703_s17  ;;  %s12198_s17 = sld [smem:[#allocation2 + $0x131]] }
 0x4a6   :  { %10656 = vmatmul.mubr.f32.vlgmr.msra.gmra.mxu1 %v11994_v11 }
 0x4a7   :  { %10669 = vmatprep.mubr.f32.mxu1 %v12077_v24  ;;  %v7240_v7 = vand.u32 4294901760, %v12080_v61 }
 0x4a9   :  { %v7241_v39 = vsub.f32 %v12080_v61, %v7240_v7 }
 0x4ab   :  { %v7242_v3 = vand.u32 4294901760, %v7241_v39 }
 0x4ad   :  { %10662 = vmatprep.mubr.f32.mxu0 %v7242_v3 }
 0x532   :  { %v5561_v29 = vpop.f32.mrf.mxu0 }
 0x534   :  { %v10538_v31 = vpop.f32.mrf.mxu0 }
 0x536   :  { %v5718_v32 = vpop.f32.mrf.mxu0 }
 0x538   :  { %v10552_v40 = vpop.f32.mrf.mxu0 }
 0x53a   :  { %v5642_v57 = vpop.f32.mrf.mxu1 }
 0x53b   :  { %v5643_v27 = vadd.f32 %v5642_v57, %v5561_v29  ;;  %v6883_v57 = vstv %s9705_s18  ;;  %s12203_s18 = sld [smem:[#allocation2 + $0x132]] }
 0x53c   :  { %v10545_v19 = vpop.f32.mrf.mxu1  ;;  %v5870_v63 = vpop.f32.mrf.mxu0 }
 0x53d   :  { %v5719_v25 = vadd.f32 %v5718_v32, %v5643_v27 }
 0x53e   :  { %v10566_v14 = vpop.f32.mrf.mxu0 }
 0x540   :  { %v5793_v47 = vpop.f32.mrf.mxu1 }
 0x541   :  { %v5794_v12 = vadd.f32 %v5793_v47, %v5719_v25  ;;  %v6890_v47 = vstv %s9706_s20  ;;  %s12211_s20 = sld [smem:[#allocation2 + $0x138]] }
 0x542   :  { %v10559_v17 = vpop.f32.mrf.mxu1  ;;  %v6024_v18 = vpop.f32.mrf.mxu0 }
 0x543   :  { %v5871_v1 = vadd.f32 %v5870_v63, %v5794_v12  ;;  %v6879_v63 = vstv %s9704_s19  ;;  %s12207_s19 = sld [smem:[#allocation2 + $0x12c]] }
 0x544   :  { %v10580_v5 = vpop.f32.mrf.mxu0 }
 0x546   :  { %v5943_v30 = vpop.f32.mrf.mxu1 }
 0x547   :  { %v5944_v23 = vadd.f32 %v5943_v30, %v5871_v1  ;;  %v6908_v30 = vstv %s9709_s22  ;;  %s12220_s22 = sld [smem:[#allocation2 + $0x139]] }
 0x548   :  { %v10573_v53 = vpop.f32.mrf.mxu1  ;;  %v6181_v34 = vpop.f32.mrf.mxu0 }
 0x549   :  { %9702 = vst [vmem:[%s12516_s7 + $0x8] sm:$0xff] %v5944_v23 }
 0x54a   :  { %v10594_v21 = vpop.f32.mrf.mxu0 }
 0x54c   :  { %v6105_v41 = vpop.f32.mrf.mxu1 }
 0x54d   :  { %v6106_v38 = vadd.f32 %v6105_v41, %v6024_v18  ;;  %v6901_v18 = vstv %s9708_s21  ;;  %v6897_v41 = vstv %s9707_s23  ;;  %s12215_s21 = sld [smem:[#allocation2 + $0x133]] }
 0x54e   :  { %v10587_v42 = vpop.f32.mrf.mxu1  ;;  %s12224_s23 = sld [smem:[#allocation2 + $0x134]] }
 0x54f   :  { %v6182_v9 = vadd.f32 %v6181_v34, %v6106_v38  ;;  %v6333_v37 = vpop.f32.mrf.mxu0 }
 0x550   :  { %v6256_v45 = vpop.f32.mrf.mxu1 }
 0x551   :  { %v6257_v51 = vadd.f32 %v6256_v45, %v6182_v9  ;;  %v10608_v52 = vpop.f32.mrf.mxu0 }
 0x552   :  { %v10601_v0 = vpop.f32.mrf.mxu1  ;;  %v6915_v52 = vstv %s12101_s25  ;;  %s12234_s25 = sld [smem:[#allocation2 + $0x13a]] }
 0x553   :  { %v6334_v56 = vadd.f32 %v6333_v37, %v6257_v51  ;;  %v6926_v0 = vstv %s12097_s24  ;;  %s12230_s24 = sld [smem:[#allocation7 + $0x105]] }
 0x555   :  { %v6406_v33 = vpop.f32.mrf.mxu1 }
 0x556   :  { %v6407_v55 = vadd.f32 %v6406_v33, %v6334_v56  ;;  %v6486_v15 = vpop.f32.mrf.mxu0 }
 0x557   :  { %v10615_v26 = vpop.f32.mrf.mxu1 }
 0x558   :  { %v6487_v20 = vadd.f32 %v6486_v15, %v6407_v55  ;;  %v10622_v22 = vpop.f32.mrf.mxu0  ;;  %v6933_v15 = vstv %s12106_s26  ;;  %s12238_s26 = sld [smem:[#allocation2 + $0x13b]] }
 0x55b   :  { %v6567_v13 = vpop.f32.mrf.mxu1 }
 0x55c   :  { %v6568_v10 = vadd.f32 %v6567_v13, %v6487_v20  ;;  %v6643_v28 = vpop.f32.mrf.mxu0  ;;  %v6940_v13 = vstv %s12115_s27  ;;  %s12242_s27 = sld [smem:[#allocation2 + $0x135]] }
 0x55d   :  { %v10629_v16 = vpop.f32.mrf.mxu1 }
 0x55e   :  { %v6644_v11 = vadd.f32 %v6643_v28, %v6568_v10  ;;  %v10636_v4 = vpop.f32.mrf.mxu0 }
 0x55f   :  { %v6922_v4 = vstv %s12121_s28  ;;  %s12250_s28 = sld [smem:[#allocation2 + $0x13c]] }
 0x561   :  { %v6718_v59 = vpop.f32.mrf.mxu1 }
 0x562   :  { %v6719_v58 = vadd.f32 %v6718_v59, %v6644_v11  ;;  %v6795_v8 = vpop.f32.mrf.mxu0 }
 0x563   :  { %v10643_v29 = vpop.f32.mrf.mxu1 }
 0x564   :  { %v6796_v31 = vadd.f32 %v6795_v8, %v6719_v58  ;;  %v10650_v32 = vpop.f32.mrf.mxu0  ;;  %v6958_v29 = vstv %s12127_s29  ;;  %s12255_s29 = sld [smem:[#allocation2 + $0x13d]] }
 0x566   :  { %v6868_v35 = vpop.f32.mrf.mxu1 }
 0x567   :  { %v12090_v40 = vadd.f32 %v6868_v35, %v6796_v31  ;;  %v6947_v35 = vstv %s12136_s5 }
 0x568   :  { %v10657_v27 = vpop.f32.mrf.mxu1 }
 0x569   :  { %v6876_v19 = vmul.f32 %v6875_v36, %v12090_v40  ;;  %v6884_v14 = vmul.f32 %v6883_v57, %v12090_v40  ;;  %v7162_v17 = vsel %vm1755_vm2, %v12090_v40, 0.0  ;;  %v6902_v21 = vmul.f32 %v6901_v18, %v12090_v40 }
 0x56a   :  { %v12103_v1 = vand.u32 4294901760, %v7162_v17  ;;  %v6927_v22 = vmul.f32 %v6926_v0, %v12090_v40  ;;  %v6965_v36 = vstv %s12133_s30  ;;  %s12259_s30 = sld [smem:[#allocation7 + $0x106]] }
 0x56b   :  { %v6877_v25 = vadd.f32 %v6876_v19, %v11515_v6  ;;  %v6886_v12 = vrot.slane %v6884_v14, 7  ;;  %v6904_v51 = vrot.slane %v6902_v21, 6  ;;  %v6997_v21 = vstv %s12154_s1  ;;  %s9746_s1 = sld [smem:[#allocation7 + $0x107]] }
 0x56c   :  { %10658 = vmatprep.subr.mxu0 %v12103_v1  ;;  %v12110_v23 = vsub.f32 %v7162_v17, %v12103_v1  ;;  %v6929_v58 = vrot.slane %v6927_v22, 5  ;;  %v6998_v0 = vmul.f32 %v6997_v21, %v12090_v40  ;;  %v7032_v21 = vstv %s12207_s19 }
 0x56d   :  { %v6880_v39 = vmul.f32 %v6879_v63, %v6877_v25  ;;  %v6888_v53 = vadd.f32 %v6886_v12, %v11515_v6  ;;  %10659 = vmatpush3.msra.mxu0 %v12103_v1  ;;  %v6906_v26 = vadd.f32 %v6904_v51, %v11515_v6  ;;  %v6959_v63 = vmul.f32 %v6958_v29, %v12090_v40 }
 0x56e   :  { %v12118_v38 = vand.u32 4294901760, %v12110_v23  ;;  %v6931_v27 = vadd.f32 %v6929_v58, %v11515_v6  ;;  %v6972_v25 = vstv %s12144_s8  ;;  %v6979_v12 = vstv %s12151_s9  ;;  %s9745_s9 = sld [smem:[#allocation2 + $0x13e]] }
 0x56f   :  { %v12095_v3 = vmax.f32 %v6880_v39, 0.0  ;;  %v7025_v58 = vstv %s12186_s15 }
 0x570   :  { %v7290_v37 = vsub.f32 %v12110_v23, %v12118_v38 }
 0x571   :  { %v6891_v5 = vmul.f32 %v6890_v47, %v12095_v3  ;;  %v6909_v9 = vmul.f32 %v6908_v30, %v12095_v3  ;;  %v6934_v11 = vmul.f32 %v6933_v15, %v12095_v3  ;;  %v6966_v47 = vmul.f32 %v6965_v36, %v12095_v3 }
 0x572   :  { %v12129_v56 = vand.u32 4294901760, %v7290_v37  ;;  %v6961_v30 = vrot.slane %v6959_v63, 4  ;;  %v7004_v37 = vstv %s12161_s10  ;;  %v7011_v15 = vstv %s12167_s4 }
 0x573   :  { %v6893_v34 = vrot.slane %v6891_v5, 7  ;;  %v6911_v55 = vrot.slane %v6909_v9, 6  ;;  %v6936_v32 = vrot.slane %v6934_v11, 5 }
 0x574   :  { %10665 = vmatprep.subr.mxu1 %v12129_v56  ;;  %v6963_v51 = vadd.f32 %v6961_v30, %v11515_v6 }
 0x575   :  { %v6895_v42 = vadd.f32 %v6893_v34, %v6888_v53  ;;  %10666 = vmatpush3.msra.mxu1 %v12129_v56  ;;  %v6913_v28 = vadd.f32 %v6911_v55, %v6906_v26  ;;  %v6938_v14 = vadd.f32 %v6936_v32, %v6931_v27  ;;  %v6954_v34 = vstv %s12156_s0 }
 0x576   :  { %v6986_v55 = vstv %s12170_s11  ;;  %v6993_v27 = vstv %s12189_s2 }
 0x577   :  { %v6898_v45 = vmul.f32 %v6897_v41, %v6895_v42  ;;  %v6968_v42 = vrot.slane %v6966_v47, 4 }
 0x579   :  { %v12131_v33 = vmax.f32 %v6898_v45, 0.0 }
 0x57b   :  { %v6916_v20 = vmul.f32 %v6915_v52, %v12131_v33  ;;  %v7155_v10 = vsel %vm1755_vm2, %v12095_v3, %v12131_v33  ;;  %v6941_v8 = vmul.f32 %v6940_v13, %v12131_v33  ;;  %v6973_v53 = vmul.f32 %v6972_v25, %v12131_v33 }
 0x57c   :  { %v7005_v13 = vmul.f32 %v7004_v37, %v12095_v3 }
 0x57d   :  { %v6918_v16 = vrot.slane %v6916_v20, 7  ;;  %v6943_v19 = vrot.slane %v6941_v8, 6  ;;  %v6975_v52 = vrot.slane %v6973_v53, 5  ;;  %v6970_v20 = vadd.f32 %v6968_v42, %v6963_v51 }
 0x57e   :  { %v7050_v8 = vstv %s12182_s14  ;;  %v7064_v53 = vstv %s12203_s18  ;;  %v7071_v51 = vstv %s12215_s21 }
 0x57f   :  { %v6920_v59 = vadd.f32 %v6918_v16, %v6913_v28  ;;  %v6945_v18 = vadd.f32 %v6943_v19, %v6938_v14  ;;  %v7043_v28 = vstv %s12174_s12  ;;  %v6977_v16 = vadd.f32 %v6975_v52, %v6970_v20 }
 0x580   :  { %v7044_v19 = vmul.f32 %v7043_v28, %v12090_v40  ;;  %v7051_v47 = vmul.f32 %v7050_v8, %v12095_v3  ;;  %v7103_v52 = vstv %s12211_s20  ;;  %v7078_v28 = vstv %s12224_s23 }
 0x581   :  { %v6923_v31 = vmul.f32 %v6922_v4, %v6920_v59  ;;  %v7000_v4 = vrot.slane %v6998_v0, 3  ;;  %v7012_v59 = vmul.f32 %v7011_v15, %v12131_v33  ;;  %v7039_v8 = vstv %s12230_s24 }
 0x582   :  { %v7046_v30 = vrot.slane %v7044_v19, 2  ;;  %v7117_v19 = vstv %s12234_s25 }
 0x583   :  { %v12163_v57 = vmax.f32 %v6923_v31, 0.0  ;;  %v7002_v25 = vadd.f32 %v7000_v4, %v11515_v6  ;;  %v7014_v14 = vrot.slane %v7012_v59, 4 }
 0x585   :  { %v6948_v39 = vmul.f32 %v6947_v35, %v12163_v57  ;;  %v7156_v17 = vsel %vm1757_vm3, %v7155_v10, %v12163_v57  ;;  %v6980_v9 = vmul.f32 %v6979_v12, %v12163_v57  ;;  %v7018_v10 = vstv %s12177_s13 }
 0x586   :  { %v7007_v35 = vrot.slane %v7005_v13, 3  ;;  %v7019_v36 = vmul.f32 %v7018_v10, %v12163_v57  ;;  %v7057_v12 = vstv %s12198_s17  ;;  %v7110_v10 = vstv %s12220_s22 }
 0x587   :  { %v6950_v5 = vrot.slane %v6948_v39, 7  ;;  %v6982_v22 = vrot.slane %v6980_v9, 6  ;;  %v7058_v37 = vmul.f32 %v7057_v12, %v12131_v33 }
 0x589   :  { %v6952_v41 = vadd.f32 %v6950_v5, %v6945_v18  ;;  %v6984_v31 = vadd.f32 %v6982_v22, %v6977_v16  ;;  %v7009_v18 = vadd.f32 %v7007_v35, %v7002_v25  ;;  %v7021_v5 = vrot.slane %v7019_v36, 5 }
 0x58a   :  { %v7048_v22 = vadd.f32 %v7046_v30, %v11515_v6 }
 0x58b   :  { %v6955_v45 = vmul.f32 %v6954_v34, %v6952_v41  ;;  %v7096_v34 = vstv %s12194_s16  ;;  %v7016_v42 = vadd.f32 %v7014_v14, %v7009_v18 }
 0x58c   :  { %v7097_v13 = vmul.f32 %v7096_v34, %v12090_v40  ;;  %v7131_v34 = vstv %s12250_s28 }
 0x58d   :  { %v12200_v26 = vmax.f32 %v6955_v45, 0.0  ;;  %v7053_v45 = vrot.slane %v7051_v47, 2  ;;  %v7023_v0 = vadd.f32 %v7021_v5, %v7016_v42  ;;  %v7085_v47 = vstv %s12242_s27 }
 0x58e   :  { %v7099_v36 = vrot.slane %v7097_v13, 1 }
 0x58f   :  { %v6987_v11 = vmul.f32 %v6986_v55, %v12200_v26  ;;  %v7157_v29 = vsel %vm1759_vm4, %v7156_v17, %v12200_v26  ;;  %v7026_v39 = vmul.f32 %v7025_v58, %v12200_v26  ;;  %v7065_v55 = vmul.f32 %v7064_v53, %v12163_v57 }
 0x590   :  { %v7072_v4 = vmul.f32 %v7071_v51, %v12200_v26  ;;  %v7104_v58 = vmul.f32 %v7103_v52, %v12095_v3  ;;  %v7124_v3 = vstv %s12238_s26  ;;  %v7101_v30 = vadd.f32 %v7099_v36, %v11515_v6 }
 0x591   :  { %v6989_v32 = vrot.slane %v6987_v11, 7  ;;  %v7028_v9 = vrot.slane %v7026_v39, 6  ;;  %v7060_v11 = vrot.slane %v7058_v37, 3  ;;  %v7125_v42 = vmul.f32 %v7124_v3, %v12200_v26 }
 0x592   :  { %v7074_v25 = vrot.slane %v7072_v4, 5  ;;  %v7106_v39 = vrot.slane %v7104_v58, 1 }
 0x593   :  { %v6991_v63 = vadd.f32 %v6989_v32, %v6984_v31  ;;  %v7030_v16 = vadd.f32 %v7028_v9, %v7023_v0  ;;  %v7067_v31 = vrot.slane %v7065_v55, 4  ;;  %v7127_v6 = vrot.slane %v7125_v42, 4 }
 0x595   :  { %v6994_v17 = vmul.f32 %v6993_v27, %v6991_v63  ;;  %v7111_v27 = vmul.f32 %v7110_v10, %v12131_v33  ;;  %v9748_v33 = vld [vmem:[%s12512_s3 + $0xb8] sm:$0xff] }
 0x596   :  { %v7169_v51 = vsel %vm68_vm0, %v9748_v33, 0 }
 0x597   :  { %v6995_v41 = vmax.f32 %v6994_v17, 0.0  ;;  %v7118_v17 = vmul.f32 %v7117_v19, %v12163_v57  ;;  %v7113_v53 = vrot.slane %v7111_v27, 2  ;;  %v7138_v57 = vstv %s12255_s29 }
 0x598   :  { %v7152_v27 = vstv %s9746_s1 }
 0x599   :  { %v7033_v15 = vmul.f32 %v7032_v21, %v6995_v41  ;;  %v7158_v20 = vsel %vm1761_vm5, %v7157_v29, %v6995_v41  ;;  %v7055_v29 = vadd.f32 %v7053_v45, %v7048_v22  ;;  %v7079_v35 = vmul.f32 %v7078_v28, %v6995_v41 }
 0x59a   :  { %v7108_v45 = vadd.f32 %v7106_v39, %v7101_v30  ;;  %v7120_v52 = vrot.slane %v7118_v17, 3  ;;  %v7092_v22 = vstv %s12259_s30  ;;  %v9610_v39 = vld [vmem:[%s12512_s3 + $0xa8] sm:$0xff] }
 0x59b   :  { %v7035_v59 = vrot.slane %v7033_v15, 7  ;;  %v7062_v63 = vadd.f32 %v7060_v11, %v7055_v29  ;;  %v7081_v5 = vrot.slane %v7079_v35, 6  ;;  %v7132_v15 = vmul.f32 %v7131_v34, %v6995_v41 }
 0x59c   :  { %v7115_v13 = vadd.f32 %v7113_v53, %v7108_v45  ;;  %v7677_v17 = vsel %vm68_vm0, %v9610_v39, 0 }
 0x59d   :  { %v7037_v32 = vadd.f32 %v7035_v59, %v7030_v16  ;;  %v7069_v12 = vadd.f32 %v7067_v31, %v7062_v63  ;;  %v12274_v16 = vand.u32 4294901760, %v7169_v51  ;;  %v7134_v4 = vrot.slane %v7132_v15, 5 }
 0x59e   :  { %v7122_v26 = vadd.f32 %v7120_v52, %v7115_v13  ;;  %v12291_v53 = vand.u32 4294901760, %v7677_v17 }
 0x59f   :  { %v7040_v14 = vmul.f32 %v7039_v8, %v7037_v32  ;;  %v7076_v21 = vadd.f32 %v7074_v25, %v7069_v12  ;;  %v7249_v29 = vsub.f32 %v7169_v51, %v12274_v16  ;;  %v9609_v25 = vld [vmem:[%s12512_s3 + $0xa0] sm:$0xff] }
 0x5a0   :  { %v7129_v59 = vadd.f32 %v7127_v6, %v7122_v26  ;;  %v7674_v12 = vsel %vm68_vm0, %v9609_v25, 0 }
 0x5a1   :  { %v7041_v18 = vmax.f32 %v7040_v14, 0.0  ;;  %v7083_v0 = vadd.f32 %v7081_v5, %v7076_v21  ;;  %v7250_v19 = vand.u32 4294901760, %v7249_v29  ;;  %v12289_v30 = vand.u32 4294901760, %v7674_v12 }
 0x5a2   :  { %v7136_v31 = vadd.f32 %v7134_v4, %v7129_v59 }
 0x5a3   :  { %v7086_v9 = vmul.f32 %v7085_v47, %v7041_v18  ;;  %v7159_v37 = vsel %vm1763_vm6, %v7158_v20, %v7041_v18  ;;  %v7139_v28 = vmul.f32 %v7138_v57, %v7041_v18  ;;  %v7145_v20 = vstv %s9745_s9 }
 0x5a4   :  { %v7251_v3 = vsub.f32 %v7249_v29, %v7250_v19  ;;  %v7747_v42 = vsub.f32 %v7674_v12, %v12289_v30 }
 0x5a5   :  { %v7088_v55 = vrot.slane %v7086_v9, 7  ;;  %v7141_v8 = vrot.slane %v7139_v28, 6  ;;  %v7757_v9 = vsub.f32 %v7677_v17, %v12291_v53 }
 0x5a6   :  { %v7252_v33 = vand.u32 4294901760, %v7251_v3  ;;  %v7748_v57 = vand.u32 4294901760, %v7747_v42 }
 0x5a7   :  { %v7090_v10 = vadd.f32 %v7088_v55, %v7083_v0  ;;  %v7143_v35 = vadd.f32 %v7141_v8, %v7136_v31  ;;  %v7758_v51 = vand.u32 4294901760, %v7757_v9  ;;  %v9749_v31 = vld [vmem:[%s12512_s3 + $0xc0] sm:$0xff] }
 0x5a8   :  { %v7749_v52 = vsub.f32 %v7747_v42, %v7748_v57 }
 0x5a9   :  { %v7093_v11 = vmul.f32 %v7092_v22, %v7090_v10  ;;  %v7759_v0 = vsub.f32 %v7757_v9, %v7758_v51 }
 0x5aa   :  { %v7750_v55 = vand.u32 4294901760, %v7749_v52 }
 0x5ab   :  { %v7094_v58 = vmax.f32 %v7093_v11, 0.0  ;;  %v7760_v15 = vand.u32 4294901760, %v7759_v0 }
 0x5ad   :  { %v7146_v32 = vmul.f32 %v7145_v20, %v7094_v58  ;;  %v7160_v41 = vsel %vm1765_vm7, %v7159_v37, %v7094_v58 }
 0x5af   :  { %v7148_v36 = vrot.slane %v7146_v32, 7 }
 0x5b1   :  { %v7150_v63 = vadd.f32 %v7148_v36, %v7143_v35 }
 0x5b3   :  { %v7153_v14 = vmul.f32 %v7152_v27, %v7150_v63  ;;  %v8183_v63 = vsel %vm68_vm0, %v9749_v31, 0 }
 0x5b4   :  { %v12373_v3 = vand.u32 4294901760, %v8183_v63 }
 0x5b5   :  { %v7154_v47 = vmax.f32 %v7153_v14, 0.0 }
 0x5b7   :  { %v7161_v18 = vsel %vm1767_vm8, %v7160_v41, %v7154_v47 }
 0x5b8   :  { %v12287_v5 = vand.u32 4294901760, %v7161_v18 }
 0x5ba   :  { %10660 = vmatprep.subr.mxu0 %v12287_v5  ;;  %v12295_v34 = vsub.f32 %v7161_v18, %v12287_v5 }
 0x5bb   :  { %10661 = vmatpush3.msra.mxu0 %v12287_v5 }
 0x5bc   :  { %10672 = vmatprep.subr.mxu0 %v12110_v23  ;;  %10663 = vmatmul.mubr.f32.vlgmr.msra.gmra.mxu0 %v7252_v33  ;;  %v12300_v21 = vand.u32 4294901760, %v12295_v34 }
 0x5bd   :  { %10673 = vmatpush3.msra.mxu0 %v12110_v23  ;;  %10676 = vmatprep.mubr.f32.mxu0 %v12080_v61 }
 0x5be   :  { %10674 = vmatprep.subr.mxu0 %v12295_v34  ;;  %v7297_v37 = vsub.f32 %v12295_v34, %v12300_v21 }
 0x5bf   :  { %10675 = vmatpush3.msra.mxu0 %v12295_v34 }
 0x5c0   :  { %10686 = vmatprep.subr.mxu0 %v12118_v38  ;;  %10677 = vmatmul.mubr.f32.vlgmr.msra.gmra.mxu0 %v7249_v29  ;;  %v12311_v45 = vand.u32 4294901760, %v7297_v37 }
 0x5c1   :  { %10687 = vmatpush3.msra.mxu0 %v12118_v38  ;;  %10690 = vmatprep.mubr.f32.mxu0 %v12077_v24 }
 0x5c2   :  { %10667 = vmatprep.subr.mxu1 %v12311_v45  ;;  %10688 = vmatprep.subr.mxu0 %v12300_v21 }
 0x5c3   :  { %10668 = vmatpush3.msra.mxu1 %v12311_v45  ;;  %10689 = vmatpush3.msra.mxu0 %v12300_v21 }
 0x5c4   :  { %10670 = vmatmul.mubr.f32.vlgmr.msra.gmra.mxu1 %v12274_v16  ;;  %10679 = vmatprep.subr.mxu1 %v12103_v1 }
 0x5c5   :  { %10680 = vmatpush3.msra.mxu1 %v12103_v1  ;;  %10683 = vmatprep.mubr.f32.mxu1 %v7240_v7 }
 0x5c6   :  { %10681 = vmatprep.subr.mxu1 %v12287_v5  ;;  %10691 = vmatmul.mubr.f32.vlgmr.msra.gmra.mxu0 %v12274_v16 }
 0x5c7   :  { %10682 = vmatpush3.msra.mxu1 %v12287_v5  ;;  %10700 = vmatprep.subr.mxu0 %v11126_v43 }
 0x5c8   :  { %10684 = vmatmul.mubr.f32.vlgmr.msra.gmra.mxu1 %v7250_v19  ;;  %10693 = vmatprep.subr.mxu1 %v12103_v1 }
 0x5c9   :  { %10694 = vmatpush3.msra.mxu1 %v12103_v1  ;;  %10701 = vmatpush3.msra.mxu0 %v11126_v43 }
 0x5ca   :  { %10695 = vmatprep.subr.mxu1 %v12287_v5  ;;  %10702 = vmatprep.subr.mxu0 %v11137_v46 }
 0x5cb   :  { %10696 = vmatpush3.msra.mxu1 %v12287_v5  ;;  %10697 = vmatprep.mubr.f32.mxu1 %v12077_v24 }
 0x5cc   :  { %10703 = vmatpush3.msra.mxu0 %v11137_v46  ;;  %10704 = vmatprep.mubr.f32.mxu0 %v7750_v55 }
 0x5cd   :  { %10698 = vmatmul.mubr.f32.vlgmr.msra.gmra.mxu1 %v12274_v16  ;;  %10705 = vmatmul.mubr.f32.vlgmr.msra.gmra.mxu0 %v7760_v15 }
 0x5ce   :  { %10707 = vmatprep.subr.mxu1 %v11193_v62  ;;  %10714 = vmatprep.subr.mxu0 %v11141_v48 }
 0x5cf   :  { %10708 = vmatpush3.msra.mxu1 %v11193_v62  ;;  %10715 = vmatpush3.msra.mxu0 %v11141_v48 }
 0x5d0   :  { %10709 = vmatprep.subr.mxu1 %v11208_v2  ;;  %10716 = vmatprep.subr.mxu0 %v11151_v50 }
 0x5d1   :  { %10710 = vmatpush3.msra.mxu1 %v11208_v2  ;;  %10711 = vmatprep.mubr.f32.mxu1 %v12289_v30 }
 0x5d2   :  { %10717 = vmatpush3.msra.mxu0 %v11151_v50  ;;  %10718 = vmatprep.mubr.f32.mxu0 %v7747_v42  ;;  %v12376_v42 = vsub.f32 %v8183_v63, %v12373_v3  ;;  %v9611_v63 = vld [vmem:[%s12512_s3 + $0xd0] sm:$0x1] }
 0x5d3   :  { %10712 = vmatmul.mubr.f32.vlgmr.msra.gmra.mxu1 %v12291_v53  ;;  %10719 = vmatmul.mubr.f32.vlgmr.msra.gmra.mxu0 %v7757_v9 }
 0x5d4   :  { %10721 = vmatprep.subr.mxu1 %v11126_v43  ;;  %10728 = vmatprep.subr.mxu0 %v11148_v49  ;;  %v8254_v52 = vand.u32 4294901760, %v12376_v42 }
 0x5d5   :  { %10722 = vmatpush3.msra.mxu1 %v11126_v43  ;;  %10729 = vmatpush3.msra.mxu0 %v11148_v49 }
 0x5d6   :  { %10723 = vmatprep.subr.mxu1 %v11137_v46  ;;  %10730 = vmatprep.subr.mxu0 %v11169_v54 }
 0x5d7   :  { %10724 = vmatpush3.msra.mxu1 %v11137_v46  ;;  %10725 = vmatprep.mubr.f32.mxu1 %v7748_v57 }
 0x5d8   :  { %10731 = vmatpush3.msra.mxu0 %v11169_v54  ;;  %10732 = vmatprep.mubr.f32.mxu0 %v12289_v30 }
 0x5d9   :  { %10726 = vmatmul.mubr.f32.vlgmr.msra.gmra.mxu1 %v7758_v51  ;;  %10733 = vmatmul.mubr.f32.vlgmr.msra.gmra.mxu0 %v12291_v53 }
 0x5da   :  { %10735 = vmatprep.subr.mxu1 %v11126_v43  ;;  %10739 = vmatprep.mubr.f32.mxu1 %v12289_v30 }
 0x5db   :  { %10736 = vmatpush3.msra.mxu1 %v11126_v43  ;;  %10742 = vmatprep.subr.mxu0 %v12519_v60 }
 0x5dc   :  { %10737 = vmatprep.subr.mxu1 %v11137_v46  ;;  %10746 = vmatprep.mubr.msk.f32.mxu0 %vm10940_vm1, %v12519_v60 }
 0x5dd   :  { %10738 = vmatpush3.msra.mxu1 %v11137_v46 }
 0x5de   :  { %10740 = vmatmul.mubr.f32.vlgmr.msra.gmra.mxu1 %v12291_v53  ;;  %10749 = vmatprep.subr.mxu1 %v12519_v60 }
 0x5df   :  { %10753 = vmatprep.mubr.msk.f32.mxu1 %vm10940_vm1, %v12519_v60 }
 0x67c   :  { %v10664_v24 = vpop.f32.mrf.mxu0 }
 0x67e   :  { %v7244_v61 = vpop.f32.mrf.mxu0 }
 0x680   :  { %v10678_v7 = vpop.f32.mrf.mxu0 }
 0x682   :  { %v7417_v22 = vpop.f32.mrf.mxu0 }
 0x684   :  { %v10671_v13 = vpop.f32.mrf.mxu1 }
 0x685   :  { %v7342_v6 = vadd.f32 %v10671_v13, %v10664_v24  ;;  %v9750_v24 = vld [vmem:[%s12512_s3 + $0xd1] sm:$0x1]  ;;  %v8255_v13 = vsub.f32 %v12376_v42, %v8254_v52 }
 0x686   :  { %v7335_v10 = vpop.f32.mrf.mxu1  ;;  %v10692_v28 = vpop.f32.mrf.mxu0 }
 0x687   :  { %v7425_v16 = vadd.f32 %v10678_v7, %v7342_v6  ;;  %v7336_v26 = vadd.f32 %v7335_v10, %v7244_v61  ;;  %v8646_v10 = vsel %vm68_vm0, %v9750_v24, 0 }
 0x688   :  { %v10685_v11 = vpop.f32.mrf.mxu1  ;;  %v7584_v59 = vpop.f32.mrf.mxu0 }
 0x689   :  { %v7418_v4 = vadd.f32 %v7417_v22, %v7336_v26  ;;  %v7508_v20 = vadd.f32 %v10685_v11, %v7425_v16  ;;  %v8256_v11 = vand.u32 4294901760, %v8255_v13 }
 0x68a   :  { %v7499_v58 = vpop.f32.mrf.mxu1 }
 0x68b   :  { %v7591_v8 = vadd.f32 %v10692_v28, %v7508_v20  ;;  %v7500_v29 = vadd.f32 %v7499_v58, %v7418_v4  ;;  %v12384_v4 = vand.u32 4294901760, %v8646_v10 }
 0x68d   :  { %v7585_v32 = vadd.f32 %v7584_v59, %v7500_v29  ;;  %v10699_v41 = vpop.f32.mrf.mxu1  ;;  %v10706_v35 = vpop.f32.mrf.mxu0  ;;  %v12389_v29 = vsub.f32 %v8646_v10, %v12384_v4 }
 0x68e   :  { %v7670_v36 = vadd.f32 %v10699_v41, %v7591_v8 }
 0x68f   :  { %v7663_v27 = vpop.f32.mrf.mxu1  ;;  %v7752_v19 = vpop.f32.mrf.mxu0 }
 0x690   :  { %v7763_v25 = vadd.f32 %v10706_v35, %v7670_v36  ;;  %v7664_v14 = vadd.f32 %v7663_v27, %v7585_v32  ;;  %v8717_v36 = vand.u32 4294901760, %v12389_v29 }
 0x692   :  { %v7753_v39 = vadd.f32 %v7752_v19, %v7664_v14  ;;  %v8718_v19 = vsub.f32 %v12389_v29, %v8717_v36  ;;  %v9108_v14 = vsel %vm68_vm0, %v9611_v63, 0 }
 0x693   :  { %v10713_v47 = vpop.f32.mrf.mxu1  ;;  %v10720_v12 = vpop.f32.mrf.mxu0 }
 0x694   :  { %v7850_v17 = vadd.f32 %v10713_v47, %v7763_v25  ;;  %v8719_v25 = vand.u32 4294901760, %v8718_v19 }
 0x695   :  { %v7843_v18 = vpop.f32.mrf.mxu1  ;;  %v7925_v33 = vpop.f32.mrf.mxu0 }
 0x696   :  { %v7933_v30 = vadd.f32 %v10720_v12, %v7850_v17  ;;  %v7844_v53 = vadd.f32 %v7843_v18, %v7753_v39  ;;  %v12420_v39 = vand.u32 4294901760, %v9108_v14 }
 0x698   :  { %v7926_v9 = vadd.f32 %v7925_v33, %v7844_v53  ;;  %v9178_v47 = vsub.f32 %v9108_v14, %v12420_v39 }
 0x699   :  { %v10727_v37 = vpop.f32.mrf.mxu1  ;;  %v10734_v57 = vpop.f32.mrf.mxu0 }
 0x69a   :  { %v8016_v51 = vadd.f32 %v10727_v37, %v7933_v30 }
 0x69b   :  { %v8007_v0 = vpop.f32.mrf.mxu1  ;;  %v8092_v61 = vpop.f32.mrf.mxu0 }
 0x69c   :  { %v8099_v55 = vadd.f32 %v10734_v57, %v8016_v51  ;;  %v8008_v15 = vadd.f32 %v8007_v0, %v7926_v9 }
 0x69e   :  { %v8093_v7 = vadd.f32 %v8092_v61, %v8008_v15  ;;  %v10741_v22 = vpop.f32.mrf.mxu1 }
 0x69f   :  { %v8178_v6 = vadd.f32 %v10741_v22, %v8099_v55 }
 0x6a0   :  { %v8171_v28 = vpop.f32.mrf.mxu1 }
 0x6a1   :  { %v8214_v16 = vand.u32 4294901760, %v8178_v6  ;;  %v8172_v26 = vadd.f32 %v8171_v28, %v8093_v7 }
 0x6a3   :  { %v8292_v20 = vsub.f32 %v8178_v6, %v8214_v16  ;;  %v8217_v59 = vand.u32 4294901760, %v8172_v26  ;;  %10743 = vmatpush3.msra.mxu0 %v8214_v16 }
 0x6a4   :  { %10744 = vmatprep.subr.mxu0 %v12519_v60 }
 0x6a5   :  { %v8293_v58 = vand.u32 4294901760, %v8292_v20  ;;  %v8299_v8 = vsub.f32 %v8172_v26, %v8217_v59  ;;  %10745 = vmatpush3.msra.mxu0 %v8217_v59 }
 0x6a6   :  { %10756 = vmatprep.subr.mxu0 %v12519_v60  ;;  %10747 = vmatmul.mubr.f32.vlgmr.msra.gmra.mxu0 %v8256_v11 }
 0x6a7   :  { %v8294_v31 = vsub.f32 %v8292_v20, %v8293_v58  ;;  %v8300_v32 = vand.u32 4294901760, %v8299_v8  ;;  %10757 = vmatpush3.msra.mxu0 %v8292_v20  ;;  %10760 = vmatprep.mubr.msk.f32.mxu0 %vm10940_vm1, %v12519_v60 }
 0x6a8   :  { %10758 = vmatprep.subr.mxu0 %v12519_v60 }
 0x6a9   :  { %v8301_v41 = vsub.f32 %v8299_v8, %v8300_v32  ;;  %10759 = vmatpush3.msra.mxu0 %v8299_v8  ;;  %v8295_v35 = vand.u32 4294901760, %v8294_v31 }
 0x6aa   :  { %10770 = vmatprep.subr.mxu0 %v12519_v60  ;;  %10761 = vmatmul.mubr.f32.vlgmr.msra.gmra.mxu0 %v12376_v42 }
 0x6ab   :  { %10750 = vmatpush3.msra.mxu1 %v8295_v35  ;;  %10771 = vmatpush3.msra.mxu0 %v8293_v58  ;;  %v8302_v27 = vand.u32 4294901760, %v8301_v41  ;;  %v9572_v35 = vrot.slane %v12090_v40, 7 }
 0x6ac   :  { %10751 = vmatprep.subr.mxu1 %v12519_v60  ;;  %10772 = vmatprep.subr.mxu0 %v12519_v60 }
 0x6ad   :  { %10752 = vmatpush3.msra.mxu1 %v8302_v27  ;;  %10773 = vmatpush3.msra.mxu0 %v8300_v32  ;;  %v9577_v63 = vsel %vm1755_vm2, %v11664_v44, %v9572_v35 }
 0x6ae   :  { %10754 = vmatmul.mubr.f32.vlgmr.msra.gmra.mxu1 %v12373_v3  ;;  %10763 = vmatprep.subr.mxu1 %v12519_v60 }
 0x6af   :  { %10774 = vmatprep.mubr.msk.f32.mxu0 %vm10940_vm1, %v12519_v60  ;;  %10784 = vmatprep.subr.mxu0 %v12519_v60 }
 0x6b0   :  { %10764 = vmatpush3.msra.mxu1 %v8214_v16  ;;  %10775 = vmatmul.mubr.f32.vlgmr.msra.gmra.mxu0 %v12373_v3 }
 0x6b1   :  { %10785 = vmatpush3.msra.mxu0 %v12103_v1  ;;  %10765 = vmatprep.subr.mxu1 %v12519_v60 }
 0x6b2   :  { %10786 = vmatprep.subr.mxu0 %v12519_v60  ;;  %10766 = vmatpush3.msra.mxu1 %v8217_v59 }
 0x6b3   :  { %10767 = vmatprep.mubr.msk.f32.mxu1 %vm10940_vm1, %v12519_v60  ;;  %10787 = vmatpush3.msra.mxu0 %v12287_v5 }
 0x6b4   :  { %10768 = vmatmul.mubr.f32.vlgmr.msra.gmra.mxu1 %v8254_v52  ;;  %10777 = vmatprep.subr.mxu1 %v12519_v60 }
 0x6b5   :  { %10788 = vmatprep.mubr.msk.f32.mxu0 %vm10940_vm1, %v12519_v60  ;;  %10798 = vmatprep.subr.mxu0 %v12519_v60 }
 0x6b6   :  { %10778 = vmatpush3.msra.mxu1 %v8214_v16  ;;  %10789 = vmatmul.mubr.f32.vlgmr.msra.gmra.mxu0 %v8719_v25 }
 0x6b7   :  { %10799 = vmatpush3.msra.mxu0 %v12110_v23  ;;  %10779 = vmatprep.subr.mxu1 %v12519_v60  ;;  %v9179_v23 = vand.u32 4294901760, %v9178_v47 }
 0x6b8   :  { %10800 = vmatprep.subr.mxu0 %v12519_v60  ;;  %10780 = vmatpush3.msra.mxu1 %v8217_v59 }
 0x6b9   :  { %10781 = vmatprep.mubr.msk.f32.mxu1 %vm10940_vm1, %v12519_v60  ;;  %10801 = vmatpush3.msra.mxu0 %v12295_v34 }
 0x6ba   :  { %10782 = vmatmul.mubr.f32.vlgmr.msra.gmra.mxu1 %v12373_v3  ;;  %10791 = vmatprep.subr.mxu1 %v12519_v60 }
 0x6bb   :  { %10802 = vmatprep.mubr.msk.f32.mxu0 %vm10940_vm1, %v12519_v60  ;;  %10812 = vmatprep.subr.mxu0 %v12519_v60 }
 0x6bc   :  { %10792 = vmatpush3.msra.mxu1 %v12129_v56  ;;  %10803 = vmatmul.mubr.f32.vlgmr.msra.gmra.mxu0 %v12389_v29 }
 0x6bd   :  { %10813 = vmatpush3.msra.mxu0 %v12118_v38  ;;  %10793 = vmatprep.subr.mxu1 %v12519_v60  ;;  %v9180_v38 = vsub.f32 %v9178_v47, %v9179_v23 }
 0x6be   :  { %10814 = vmatprep.subr.mxu0 %v12519_v60  ;;  %10794 = vmatpush3.msra.mxu1 %v12311_v45 }
 0x6bf   :  { %10795 = vmatprep.mubr.msk.f32.mxu1 %vm10940_vm1, %v12519_v60  ;;  %10815 = vmatpush3.msra.mxu0 %v12300_v21  ;;  %v9181_v56 = vand.u32 4294901760, %v9180_v38 }
 0x6c0   :  { %10796 = vmatmul.mubr.f32.vlgmr.msra.gmra.mxu1 %v12384_v4  ;;  %10805 = vmatprep.subr.mxu1 %v12519_v60 }
 0x6c1   :  { %10806 = vmatpush3.msra.mxu1 %v12103_v1  ;;  %10809 = vmatprep.mubr.msk.f32.mxu1 %vm10940_vm1, %v12519_v60 }
 0x6c2   :  { %10807 = vmatprep.subr.mxu1 %v12519_v60  ;;  %10816 = vmatprep.mubr.msk.f32.mxu0 %vm10940_vm1, %v12519_v60 }
 0x6c3   :  { %10808 = vmatpush3.msra.mxu1 %v12287_v5  ;;  %10817 = vmatmul.mubr.f32.vlgmr.msra.gmra.mxu0 %v12384_v4 }
 0x6c4   :  { %10810 = vmatmul.mubr.f32.vlgmr.msra.gmra.mxu1 %v8717_v36  ;;  %10819 = vmatprep.subr.mxu1 %v12519_v60 }
 0x6c5   :  { %10820 = vmatpush3.msra.mxu1 %v12103_v1  ;;  %10826 = vmatprep.subr.mxu0 %v12519_v60 }
 0x6c6   :  { %10821 = vmatprep.subr.mxu1 %v12519_v60  ;;  %10827 = vmatpush3.msra.mxu0 %v11126_v43 }
 0x6c7   :  { %10822 = vmatpush3.msra.mxu1 %v12287_v5  ;;  %10823 = vmatprep.mubr.msk.f32.mxu1 %vm10940_vm1, %v12519_v60 }
 0x6c8   :  { %10828 = vmatprep.subr.mxu0 %v12519_v60  ;;  %10824 = vmatmul.mubr.f32.vlgmr.msra.gmra.mxu1 %v12384_v4 }
 0x6c9   :  { %10829 = vmatpush3.msra.mxu0 %v11137_v46  ;;  %10830 = vmatprep.mubr.msk.f32.mxu0 %vm10940_vm1, %v12519_v60 }
 0x6ca   :  { %10833 = vmatprep.subr.mxu1 %v12519_v60  ;;  %10831 = vmatmul.mubr.f32.vlgmr.msra.gmra.mxu0 %v9181_v56 }
 0x6cb   :  { %10834 = vmatpush3.msra.mxu1 %v11193_v62  ;;  %10840 = vmatprep.subr.mxu0 %v12519_v60 }
 0x6cc   :  { %10835 = vmatprep.subr.mxu1 %v12519_v60  ;;  %10841 = vmatpush3.msra.mxu0 %v11141_v48 }
 0x6cd   :  { %10836 = vmatpush3.msra.mxu1 %v11208_v2  ;;  %10837 = vmatprep.mubr.msk.f32.mxu1 %vm10940_vm1, %v12519_v60 }
 0x6ce   :  { %10842 = vmatprep.subr.mxu0 %v12519_v60  ;;  %10838 = vmatmul.mubr.f32.vlgmr.msra.gmra.mxu1 %v12420_v39 }
 0x6cf   :  { %10843 = vmatpush3.msra.mxu0 %v11151_v50  ;;  %10844 = vmatprep.mubr.msk.f32.mxu0 %vm10940_vm1, %v12519_v60 }
 0x6d0   :  { %10847 = vmatprep.subr.mxu1 %v12519_v60  ;;  %10845 = vmatmul.mubr.f32.vlgmr.msra.gmra.mxu0 %v9178_v47 }
 0x6d1   :  { %10848 = vmatpush3.msra.mxu1 %v11126_v43  ;;  %10854 = vmatprep.subr.mxu0 %v12519_v60 }
 0x6d2   :  { %10849 = vmatprep.subr.mxu1 %v12519_v60  ;;  %10855 = vmatpush3.msra.mxu0 %v11148_v49 }
 0x6d3   :  { %10850 = vmatpush3.msra.mxu1 %v11137_v46  ;;  %10851 = vmatprep.mubr.msk.f32.mxu1 %vm10940_vm1, %v12519_v60 }
 0x6d4   :  { %10856 = vmatprep.subr.mxu0 %v12519_v60  ;;  %10852 = vmatmul.mubr.f32.vlgmr.msra.gmra.mxu1 %v9179_v23 }
 0x6d5   :  { %10857 = vmatpush3.msra.mxu0 %v11169_v54  ;;  %10858 = vmatprep.mubr.msk.f32.mxu0 %vm10940_vm1, %v12519_v60 }
 0x6d6   :  { %10861 = vmatprep.subr.mxu1 %v12519_v60  ;;  %10859 = vmatmul.mubr.f32.vlgmr.msra.gmra.mxu0 %v12420_v39 }
 0x6d7   :  { %10862 = vmatpush3.msra.mxu1 %v11126_v43  ;;  %10865 = vmatprep.mubr.msk.f32.mxu1 %vm10940_vm1, %v12519_v60 }
 0x6d8   :  { %10863 = vmatprep.subr.mxu1 %v12519_v60 }
 0x6d9   :  { %10864 = vmatpush3.msra.mxu1 %v11137_v46 }
 0x6da   :  { %10866 = vmatmul.mubr.f32.vlgmr.msra.gmra.mxu1 %v12420_v39 }
 0x766   :  { %v8258_v48 = vpop.f32.mrf.mxu0 }
 0x768   :  { %v10748_v49 = vpop.f32.mrf.mxu0 }
 0x76a   :  { %v8415_v50 = vpop.f32.mrf.mxu0 }
 0x76c   :  { %v10762_v54 = vpop.f32.mrf.mxu0 }
 0x76e   :  { %v8339_v62 = vpop.f32.mrf.mxu1 }
 0x76f   :  { %v8340_v2 = vadd.f32 %v8339_v62, %v8258_v48 }
 0x770   :  { %v10755_v1 = vpop.f32.mrf.mxu1  ;;  %v8567_v5 = vpop.f32.mrf.mxu0 }
 0x771   :  { %v8416_v34 = vadd.f32 %v8415_v50, %v8340_v2 }
 0x772   :  { %v10776_v21 = vpop.f32.mrf.mxu0 }
 0x774   :  { %v8490_v43 = vpop.f32.mrf.mxu1 }
 0x775   :  { %v8491_v45 = vadd.f32 %v8490_v43, %v8416_v34 }
 0x776   :  { %v10769_v3 = vpop.f32.mrf.mxu1  ;;  %v8721_v12 = vpop.f32.mrf.mxu0 }
 0x777   :  { %v8568_v17 = vadd.f32 %v8567_v5, %v8491_v45 }
 0x778   :  { %v10790_v60 = vpop.f32.mrf.mxu0 }
 0x77a   :  { %v8640_v18 = vpop.f32.mrf.mxu1 }
 0x77b   :  { %v8641_v46 = vadd.f32 %v8640_v18, %v8568_v17 }
 0x77c   :  { %v10783_v33 = vpop.f32.mrf.mxu1  ;;  %v8878_v30 = vpop.f32.mrf.mxu0 }
 0x77d   :  { %9751 = vst [vmem:[%s12516_s7 + $0x10] sm:$0xff] %v8641_v46  ;;  %s10941_s7 = smov [#allocation8]  }
 0x77e   :  { %v10804_v53 = vpop.f32.mrf.mxu0  ;;  %s9586_s18 = sshll.u32 %s10941_s7, 4  ;;  %s9587_s18 = int_to_ptr.vmem [resolvable:$true] %s9586_s18 }
 0x77f   :  { %s10910_s19 = scalar_lea.vmem %s9587_s18, 64  ;;  %p10915_p2 = scmp.lt.s32.totalorder %s9587_s18, %s9587_s18 }
 0x780   :  { %v8802_v42 = vpop.f32.mrf.mxu1  ;;  %p10911_p1 = scmp.ne.s32.totalorder %s9587_s18, %s10910_s19  ;;  %p10916_p3 = scmp.lt.s32.totalorder %s10910_s19, %s10910_s19 }
 0x781   :  { %v8803_v9 = vadd.f32 %v8802_v42, %v8721_v12 }
 0x782   :  { %v10797_v37 = vpop.f32.mrf.mxu1  ;;  %p10917_p4 = por %p10916_p3, %p10915_p2 }
 0x783   :  { %v8879_v57 = vadd.f32 %v8878_v30, %v8803_v9  ;;  %v9030_v51 = vpop.f32.mrf.mxu0 }
 0x784   :  { %v8953_v52 = vpop.f32.mrf.mxu1  ;;  %p10918_p5 = pnand %p10917_p4, %p10911_p1 }
 0x785   :  { %v8954_v0 = vadd.f32 %v8953_v52, %v8879_v57  ;;  %v10818_v55 = vpop.f32.mrf.mxu0 }
 0x786   :  { %v10811_v15 = vpop.f32.mrf.mxu1 }
 0x787   :  { %v9031_v24 = vadd.f32 %v9030_v51, %v8954_v0 }
 0x788   :  { %v9103_v61 = vpop.f32.mrf.mxu1 }
 0x789   :  { %v9104_v7 = vadd.f32 %v9103_v61, %v9031_v24 }
 0x78a   :  { %v9183_v22 = vpop.f32.mrf.mxu0  ;;  %v10825_v13 = vpop.f32.mrf.mxu1 }
 0x78b   :  { %v9184_v6 = vadd.f32 %v9183_v22, %v9104_v7 }
 0x78c   :  { %v10832_v10 = vpop.f32.mrf.mxu0 }
 0x78e   :  { %v9264_v28 = vpop.f32.mrf.mxu1 }
 0x78f   :  { %v9265_v16 = vadd.f32 %v9264_v28, %v9184_v6 }
 0x790   :  { %v9340_v26 = vpop.f32.mrf.mxu0  ;;  %v10839_v11 = vpop.f32.mrf.mxu1 }
 0x791   :  { %v9341_v4 = vadd.f32 %v9340_v26, %v9265_v16 }
 0x792   :  { %v10846_v20 = vpop.f32.mrf.mxu0 }
 0x794   :  { %v9415_v59 = vpop.f32.mrf.mxu1 }
 0x795   :  { %v9416_v58 = vadd.f32 %v9415_v59, %v9341_v4 }
 0x796   :  { %v9492_v8 = vpop.f32.mrf.mxu0  ;;  %v10853_v29 = vpop.f32.mrf.mxu1 }
 0x797   :  { %v9493_v31 = vadd.f32 %v9492_v8, %v9416_v58 }
 0x798   :  { %v10860_v32 = vpop.f32.mrf.mxu0 }
 0x79a   :  { %v9565_v41 = vpop.f32.mrf.mxu1 }
 0x79b   :  { %v9566_v36 = vadd.f32 %v9565_v41, %v9493_v31 }
 0x79c   :  { %v10867_v27 = vpop.f32.mrf.mxu1 }
 0x79d   :  { %v9575_v19 = vrot.slane %v9566_v36, 6 }
 0x79f   :  { %v9578_v25 = vsel %vm1757_vm3, %v9577_v63, %v9575_v19 }
 0x7a0   :  { %9579 = vst [vmem:[#allocation8] sm:$0x7] %v9578_v25 }
 0x7a1   :  { %10921 = shalt.err (!%p10918_p5)
}
 0x7a2   :  { %9589 = dma.vmem_to_hbm [thread:$0]  %s9587_s18, 64, %s12515_s6, [#allocation3]  }
 0x7a3   :  { %10934 = dma.done.wait [#allocation3], 64  }
 0x7a4   :  { %10935 = vsyncadd [#allocation3], 4294967232 }
 0x7a5   :  { %9597 = vsyncpa [#allocation3], 1 }
 0x7a6   :  { %9598 = vsyncpa [#allocation4], 1 }
 0x7a7   :  { %9599 = vsyncpa [#allocation6], 1 }

</bundles_post_ra>
